<compile_context>
chip_gen: v7x
topology: tpu7x:2x2x1
jax: 0.10.0
libtpu: 0.0.40
codegen_flags: <defaults>
</compile_context>

<pallas_src>
import math

import jax
import jax.numpy as jnp
from jax.experimental import pallas as pl
from jax.experimental.pallas import tpu as pltpu


# MXU operand dtype (accumulation is always f32). Set to jnp.float32 for exact-f32 math.
MXU_DTYPE = jnp.bfloat16


# ----------------------------- fused block kernel --------------------------- #

def _make_block_kernel(H, W, Cin, Cout, H1, W1, stride, equal_in_out, mxu_dtype):
    """Fused BasicBlock kernel for one image: bn1/relu + conv1 + bn2/relu +
    conv2 + shortcut + residual add, all in VMEM."""
    KH = KW = 3

    def kernel(*refs):
        if equal_in_out:
            (x_ref, s1_ref, b1_ref, w1_ref, s2_ref, b2_ref, w2_ref,
             o_ref, a_pad, h_pad) = refs
            ws_ref = None
        else:
            (x_ref, s1_ref, b1_ref, w1_ref, s2_ref, b2_ref, w2_ref, ws_ref,
             o_ref, a_pad, h_pad) = refs

        f32 = jnp.float32
        x = x_ref[...].astype(f32)                                # (H, W, Cin)

        # ---- bn1 + relu, fused with zero-padding into a VMEM scratch --------
        a = jnp.maximum(x * s1_ref[...] + b1_ref[...], 0.0)
        a_pad[...] = jnp.zeros_like(a_pad)
        a_pad[pl.ds(1, H), pl.ds(1, W), :] = a

        # ---- conv1: 3x3, stride `stride`, pad 1 (9 tap matmuls, f32 acc) ----
        # TODO(synk): pack the 9 taps along K (lane-offset im2col in VMEM) for a
        #             single deep-K MXU contraction instead of 9 shallow dots.
        acc = jnp.zeros((H1 * W1, Cout), f32)
        for dy in range(KH):
            for dx in range(KW):
                if stride == 1:
                    patch = a_pad[pl.ds(dy, H1), pl.ds(dx, W1), :]
                else:
                    patch = a_pad[pl.ds(dy, H1, stride), pl.ds(dx, W1, stride), :]
                acc += jnp.dot(
                    patch.reshape(H1 * W1, Cin).astype(mxu_dtype),
                    w1_ref[dy, dx],
                    preferred_element_type=f32)

        # ---- bn2 + relu (dropRate == 0 -> dropout is identity) --------------
        h = jnp.maximum(acc * s2_ref[...] + b2_ref[...], 0.0)
        h_pad[...] = jnp.zeros_like(h_pad)
        h_pad[pl.ds(1, H1), pl.ds(1, W1), :] = h.reshape(H1, W1, Cout)

        # ---- shortcut: identity, or 1x1 stride-s conv of relu(bn1(x)) -------
        if equal_in_out:
            acc2 = x.reshape(H1 * W1, Cout)
        else:
            if stride == 1:
                a_s = a_pad[pl.ds(1, H1), pl.ds(1, W1), :]
            else:
                a_s = a_pad[pl.ds(1, H1, stride), pl.ds(1, W1, stride), :]
            acc2 = jnp.dot(
                a_s.reshape(H1 * W1, Cin).astype(mxu_dtype),
                ws_ref[...],
                preferred_element_type=f32)

        # ---- conv2: 3x3, stride 1, pad 1, fused residual add ----------------
        for dy in range(KH):
            for dx in range(KW):
                patch = h_pad[pl.ds(dy, H1), pl.ds(dx, W1), :]
                acc2 += jnp.dot(
                    patch.reshape(H1 * W1, Cout).astype(mxu_dtype),
                    w2_ref[dy, dx],
                    preferred_element_type=f32)

        o_ref[...] = acc2.reshape(H1, W1, Cout).astype(o_ref.dtype)

    return kernel


def basic_block_forward(x, p, *, mxu_dtype=MXU_DTYPE):
    """x: (N, H, W, Cin) NHWC -> (N, H1, W1, Cout); one fused pallas_call."""
    N, H, W, Cin = x.shape
    Cout = p["w1"].shape[-1]
    stride = p["stride"]
    equal = p["equal_in_out"]
    H1 = (H + 2 - 3) // stride + 1
    W1 = (W + 2 - 3) // stride + 1

    kernel = _make_block_kernel(H, W, Cin, Cout, H1, W1, stride, equal, mxu_dtype)

    s1 = p["bn1_scale"].reshape(1, Cin).astype(jnp.float32)
    b1 = p["bn1_bias"].reshape(1, Cin).astype(jnp.float32)
    s2 = p["bn2_scale"].reshape(1, Cout).astype(jnp.float32)
    b2 = p["bn2_bias"].reshape(1, Cout).astype(jnp.float32)
    w1 = p["w1"].astype(mxu_dtype)     # weights shipped to VMEM in MXU dtype
    w2 = p["w2"].astype(mxu_dtype)

    in_specs = [
        pl.BlockSpec((None, H, W, Cin), lambda n: (n, 0, 0, 0)),
        pl.BlockSpec((1, Cin), lambda n: (0, 0)),
        pl.BlockSpec((1, Cin), lambda n: (0, 0)),
        pl.BlockSpec((3, 3, Cin, Cout), lambda n: (0, 0, 0, 0)),
        pl.BlockSpec((1, Cout), lambda n: (0, 0)),
        pl.BlockSpec((1, Cout), lambda n: (0, 0)),
        pl.BlockSpec((3, 3, Cout, Cout), lambda n: (0, 0, 0, 0)),
    ]
    args = [x, s1, b1, w1, s2, b2, w2]
    if not equal:
        ws = p["w_short"].reshape(Cin, Cout).astype(mxu_dtype)
        in_specs.append(pl.BlockSpec((Cin, Cout), lambda n: (0, 0)))
        args.append(ws)

    flops_per_px = 2 * (9 * Cin * Cout + 9 * Cout * Cout
                        + (0 if equal else Cin * Cout))
    cost = pl.CostEstimate(
        flops=int(N * H1 * W1 * flops_per_px),
        transcendentals=0,
        bytes_accessed=int(x.size * x.dtype.itemsize
                           + N * H1 * W1 * Cout * 4
                           + sum(int(a.size) * a.dtype.itemsize for a in args[1:])))

    return pl.pallas_call(
        kernel,
        out_shape=jax.ShapeDtypeStruct((N, H1, W1, Cout), x.dtype),
        grid=(N,),
        in_specs=in_specs,
        out_specs=pl.BlockSpec((None, H1, W1, Cout), lambda n: (n, 0, 0, 0)),
        scratch_shapes=[
            pltpu.VMEM((H + 2, W + 2, Cin), jnp.float32),    # padded relu(bn1(x))
            pltpu.VMEM((H1 + 2, W1 + 2, Cout), jnp.float32), # padded relu(bn2(conv1))
        ],
        compiler_params=pltpu.CompilerParams(
            dimension_semantics=("parallel",),
            vmem_limit_bytes=32 * 1024 * 1024),
        cost_estimate=cost,
    )(*args)


def network_block_forward(x_nchw, layer_params):
    # single NCHW -> NHWC transpose at the PyTorch boundary; NHWC across blocks.
    x = jnp.transpose(x_nchw, (0, 2, 3, 1))
    for p in layer_params:
        x = basic_block_forward(x, p)
    return jnp.transpose(x, (0, 3, 1, 2))


# ------------------------- deterministic parameters ------------------------- #

def init_basic_block(key, in_planes, out_planes, stride):
    ks = jax.random.split(key, 7)
    eps = 1e-5

    def conv_w(k, kh, kw, cin, cout):
        std = math.sqrt(2.0 / (kh * kw * cout))  # WRN init: N(0, sqrt(2/n))
        return std * jax.random.normal(k, (kh, kw, cin, cout), jnp.float32)

    def bn_affine(kg, kb, c):
        gamma = 1.0 + 0.1 * jax.random.normal(kg, (c,), jnp.float32)
        beta = 0.1 * jax.random.normal(kb, (c,), jnp.float32)
        running_mean = jnp.zeros((c,), jnp.float32)
        running_var = jnp.ones((c,), jnp.float32)
        scale = gamma / jnp.sqrt(running_var + eps)
        bias = beta - running_mean * scale
        return scale, bias

    equal = (in_planes == out_planes)
    p = {"stride": stride, "equal_in_out": equal}
    p["bn1_scale"], p["bn1_bias"] = bn_affine(ks[0], ks[1], in_planes)
    p["w1"] = conv_w(ks[2], 3, 3, in_planes, out_planes)
    p["bn2_scale"], p["bn2_bias"] = bn_affine(ks[3], ks[4], out_planes)
    p["w2"] = conv_w(ks[5], 3, 3, out_planes, out_planes)
    p["w_short"] = None if equal else conv_w(ks[6], 1, 1, in_planes, out_planes)
    return p


def init_network_block(key, nb_layers, in_planes, out_planes, stride):
    keys = jax.random.split(key, int(nb_layers))
    layers = []
    for i in range(int(nb_layers)):
        ip = in_planes if i == 0 else out_planes
        st = stride if i == 0 else 1
        layers.append(init_basic_block(keys[i], ip, out_planes, st))
    return layers


# --------------------------- pure-JAX references ---------------------------- #

def _conv_ref(x, w, stride, padding, compute_dtype=None):
    if compute_dtype is not None:
        x = x.astype(compute_dtype)
        w = w.astype(compute_dtype)
    return jax.lax.conv_general_dilated(
        x, w, window_strides=(stride, stride),
        padding=((padding, padding), (padding, padding)),
        dimension_numbers=("NHWC", "HWIO", "NHWC"),
        preferred_element_type=jnp.float32)


def _basic_block_ref(x, p, compute_dtype):
    a = jnp.maximum(x * p["bn1_scale"] + p["bn1_bias"], 0.0)
    shortcut = x if p["equal_in_out"] else _conv_ref(a, p["w_short"], p["stride"],
                                                     0, compute_dtype)
    h = _conv_ref(a, p["w1"], p["stride"], 1, compute_dtype)
    h = jnp.maximum(h * p["bn2_scale"] + p["bn2_bias"], 0.0)
    return _conv_ref(h, p["w2"], 1, 1, compute_dtype) + shortcut


def network_block_reference(x_nchw, layer_params, compute_dtype=None):
    x = jnp.transpose(x_nchw, (0, 2, 3, 1))
    for p in layer_params:
        x = _basic_block_ref(x, p, compute_dtype)
    return jnp.transpose(x, (0, 3, 1, 2))


# ---------------------------------- main ------------------------------------ #

if __name__ == "__main__":
    key = jax.random.PRNGKey(0)
    kx, kp = jax.random.split(key)

    # NetworkBlock(nb_layers=2, in_planes=4, out_planes=8, block=BasicBlock,
    #              stride=2, dropRate=0.0)
    N, C_in, H, W = 2, 4, 16, 16
    out_planes, nb_layers, stride = 8, 2, 2

    x = jax.random.normal(kx, (N, C_in, H, W), jnp.float32)  # NCHW (PyTorch)
    params = init_network_block(kp, nb_layers, C_in, out_planes, stride)

    fwd = jax.jit(lambda xx: network_block_forward(xx, params))
    y = fwd(x)
    jax.block_until_ready(y)
    assert y.shape == (N, out_planes, H // stride, W // stride), y.shape

    # Tight check against a reference using the same bf16 MXU operand rounding.
    y_mx = network_block_reference(x, params, compute_dtype=MXU_DTYPE)
    err_mx = float(jnp.max(jnp.abs(y - y_mx)))
    assert err_mx < 5e-3, err_mx

    # Loose sanity check against the exact f32 module semantics.
    y_f32 = network_block_reference(x, params, compute_dtype=None)
    assert jnp.allclose(y, y_f32, atol=5e-2, rtol=5e-2), (
        float(jnp.max(jnp.abs(y - y_f32))))

    print("KERNEL_OK")
</pallas_src>

<mosaic_0001>
module attributes {stable_mosaic.version = 11 : i64} {
  func.func @kernel(%arg0: i32, %arg1: memref<1x8x8x8xf32, #tpu.memory_space<vmem>>, %arg2: memref<1x8xf32, #tpu.memory_space<vmem>>, %arg3: memref<1x8xf32, #tpu.memory_space<vmem>>, %arg4: memref<3x3x8x8xbf16, #tpu.memory_space<vmem>>, %arg5: memref<1x8xf32, #tpu.memory_space<vmem>>, %arg6: memref<1x8xf32, #tpu.memory_space<vmem>>, %arg7: memref<3x3x8x8xbf16, #tpu.memory_space<vmem>>, %arg8: memref<1x8x8x8xf32, #tpu.memory_space<vmem>>, %arg9: memref<10x10x8xf32, #tpu.memory_space<vmem>>, %arg10: memref<10x10x8xf32, #tpu.memory_space<vmem>>) attributes {dimension_semantics = [#tpu.dimension_semantics<parallel>], iteration_bounds = array<i64: 2>, scalar_prefetch = 0 : i64, scratch_operands = 2 : i64, tpu.core_type = #tpu.core_type<tc>, window_params = [{transform_indices = @transform_0, window_bounds = array<i64: 1, 8, 8, 8>}, {pipeline_mode = #tpu.pipeline_mode<synchronous>, transform_indices = @transform_1, window_bounds = array<i64: 1, 8>}, {pipeline_mode = #tpu.pipeline_mode<synchronous>, transform_indices = @transform_2, window_bounds = array<i64: 1, 8>}, {pipeline_mode = #tpu.pipeline_mode<synchronous>, transform_indices = @transform_3, window_bounds = array<i64: 3, 3, 8, 8>}, {pipeline_mode = #tpu.pipeline_mode<synchronous>, transform_indices = @transform_4, window_bounds = array<i64: 1, 8>}, {pipeline_mode = #tpu.pipeline_mode<synchronous>, transform_indices = @transform_5, window_bounds = array<i64: 1, 8>}, {pipeline_mode = #tpu.pipeline_mode<synchronous>, transform_indices = @transform_6, window_bounds = array<i64: 3, 3, 8, 8>}, {transform_indices = @transform_7, window_bounds = array<i64: 1, 8, 8, 8>}]} {
    %c0 = arith.constant 0 : index
    %c0_0 = arith.constant 0 : index
    %c0_1 = arith.constant 0 : index
    %c0_2 = arith.constant 0 : index
    %0 = vector.load %arg1[%c0, %c0_0, %c0_1, %c0_2] : memref<1x8x8x8xf32, #tpu.memory_space<vmem>>, vector<1x8x8x8xf32>
    %1 = vector.shape_cast %0 : vector<1x8x8x8xf32> to vector<8x8x8xf32>
    %c0_3 = arith.constant 0 : index
    %c0_4 = arith.constant 0 : index
    %2 = vector.load %arg2[%c0_3, %c0_4] : memref<1x8xf32, #tpu.memory_space<vmem>>, vector<1x8xf32>
    %3 = vector.shape_cast %2 : vector<1x8xf32> to vector<1x1x8xf32>
    %4 = vector.broadcast %3 : vector<1x1x8xf32> to vector<8x8x8xf32>
    %5 = arith.mulf %1, %4 : vector<8x8x8xf32>
    %c0_5 = arith.constant 0 : index
    %c0_6 = arith.constant 0 : index
    %6 = vector.load %arg3[%c0_5, %c0_6] : memref<1x8xf32, #tpu.memory_space<vmem>>, vector<1x8xf32>
    %7 = vector.shape_cast %6 : vector<1x8xf32> to vector<1x1x8xf32>
    %8 = vector.broadcast %7 : vector<1x1x8xf32> to vector<8x8x8xf32>
    %9 = arith.addf %5, %8 : vector<8x8x8xf32>
    %cst = arith.constant 0.000000e+00 : f32
    %10 = vector.broadcast %cst : f32 to vector<8x8x8xf32>
    %11 = arith.maximumf %9, %10 : vector<8x8x8xf32>
    %cst_7 = arith.constant 0.000000e+00 : f32
    %12 = vector.broadcast %cst_7 : f32 to vector<10x10x8xf32>
    %c0_8 = arith.constant 0 : index
    %c0_9 = arith.constant 0 : index
    %c0_10 = arith.constant 0 : index
    %13 = vector.load %arg9[%c0_8, %c0_9, %c0_10] : memref<10x10x8xf32, #tpu.memory_space<vmem>>, vector<10x10x8xf32>
    tpu.vector_store %arg9[%c0_8, %c0_9, %c0_10], %12 {strides = array<i32>} : memref<10x10x8xf32, #tpu.memory_space<vmem>>, vector<10x10x8xf32>,
    %c1 = arith.constant 1 : index
    %c1_11 = arith.constant 1 : index
    %c0_12 = arith.constant 0 : index
    %14 = vector.load %arg9[%c1, %c1_11, %c0_12] : memref<10x10x8xf32, #tpu.memory_space<vmem>>, vector<8x8x8xf32>
    tpu.vector_store %arg9[%c1, %c1_11, %c0_12], %11 {strides = array<i32>} : memref<10x10x8xf32, #tpu.memory_space<vmem>>, vector<8x8x8xf32>,
    %cst_13 = arith.constant 0.000000e+00 : f32
    %15 = vector.broadcast %cst_13 : f32 to vector<64x8xf32>
    %c0_14 = arith.constant 0 : index
    %c0_15 = arith.constant 0 : index
    %c0_16 = arith.constant 0 : index
    %16 = vector.load %arg9[%c0_14, %c0_15, %c0_16] : memref<10x10x8xf32, #tpu.memory_space<vmem>>, vector<8x8x8xf32>
    %17 = vector.shape_cast %16 : vector<8x8x8xf32> to vector<64x8xf32>
    %18 = arith.truncf %17 : vector<64x8xf32> to vector<64x8xbf16>
    %c0_17 = arith.constant 0 : index
    %c0_18 = arith.constant 0 : index
    %c0_19 = arith.constant 0 : index
    %c0_20 = arith.constant 0 : index
    %19 = vector.load %arg4[%c0_17, %c0_18, %c0_19, %c0_20] : memref<3x3x8x8xbf16, #tpu.memory_space<vmem>>, vector<1x1x8x8xbf16>
    %20 = vector.shape_cast %19 : vector<1x1x8x8xbf16> to vector<8x8xbf16>
    %cst_21 = arith.constant dense<0.000000e+00> : vector<64x8xf32>
    %21 = tpu.matmul %18, %20, %cst_21 {dimension_numbers = #tpu.dot_dimension_numbers<[1], [0], [0], [1], [0, 0, 1, 1], [], []>} : vector<64x8xbf16>, vector<8x8xbf16>, vector<64x8xf32> -> vector<64x8xf32>
    %22 = arith.addf %15, %21 : vector<64x8xf32>
    %c0_22 = arith.constant 0 : index
    %c1_23 = arith.constant 1 : index
    %c0_24 = arith.constant 0 : index
    %23 = vector.load %arg9[%c0_22, %c1_23, %c0_24] : memref<10x10x8xf32, #tpu.memory_space<vmem>>, vector<8x8x8xf32>
    %24 = vector.shape_cast %23 : vector<8x8x8xf32> to vector<64x8xf32>
    %25 = arith.truncf %24 : vector<64x8xf32> to vector<64x8xbf16>
    %c0_25 = arith.constant 0 : index
    %c1_26 = arith.constant 1 : index
    %c0_27 = arith.constant 0 : index
    %c0_28 = arith.constant 0 : index
    %26 = vector.load %arg4[%c0_25, %c1_26, %c0_27, %c0_28] : memref<3x3x8x8xbf16, #tpu.memory_space<vmem>>, vector<1x1x8x8xbf16>
    %27 = vector.shape_cast %26 : vector<1x1x8x8xbf16> to vector<8x8xbf16>
    %cst_29 = arith.constant dense<0.000000e+00> : vector<64x8xf32>
    %28 = tpu.matmul %25, %27, %cst_29 {dimension_numbers = #tpu.dot_dimension_numbers<[1], [0], [0], [1], [0, 0, 1, 1], [], []>} : vector<64x8xbf16>, vector<8x8xbf16>, vector<64x8xf32> -> vector<64x8xf32>
    %29 = arith.addf %22, %28 : vector<64x8xf32>
    %c0_30 = arith.constant 0 : index
    %c2 = arith.constant 2 : index
    %c0_31 = arith.constant 0 : index
    %30 = vector.load %arg9[%c0_30, %c2, %c0_31] : memref<10x10x8xf32, #tpu.memory_space<vmem>>, vector<8x8x8xf32>
    %31 = vector.shape_cast %30 : vector<8x8x8xf32> to vector<64x8xf32>
    %32 = arith.truncf %31 : vector<64x8xf32> to vector<64x8xbf16>
    %c0_32 = arith.constant 0 : index
    %c2_33 = arith.constant 2 : index
    %c0_34 = arith.constant 0 : index
    %c0_35 = arith.constant 0 : index
    %33 = vector.load %arg4[%c0_32, %c2_33, %c0_34, %c0_35] : memref<3x3x8x8xbf16, #tpu.memory_space<vmem>>, vector<1x1x8x8xbf16>
    %34 = vector.shape_cast %33 : vector<1x1x8x8xbf16> to vector<8x8xbf16>
    %cst_36 = arith.constant dense<0.000000e+00> : vector<64x8xf32>
    %35 = tpu.matmul %32, %34, %cst_36 {dimension_numbers = #tpu.dot_dimension_numbers<[1], [0], [0], [1], [0, 0, 1, 1], [], []>} : vector<64x8xbf16>, vector<8x8xbf16>, vector<64x8xf32> -> vector<64x8xf32>
    %36 = arith.addf %29, %35 : vector<64x8xf32>
    %c1_37 = arith.constant 1 : index
    %c0_38 = arith.constant 0 : index
    %c0_39 = arith.constant 0 : index
    %37 = vector.load %arg9[%c1_37, %c0_38, %c0_39] : memref<10x10x8xf32, #tpu.memory_space<vmem>>, vector<8x8x8xf32>
    %38 = vector.shape_cast %37 : vector<8x8x8xf32> to vector<64x8xf32>
    %39 = arith.truncf %38 : vector<64x8xf32> to vector<64x8xbf16>
    %c1_40 = arith.constant 1 : index
    %c0_41 = arith.constant 0 : index
    %c0_42 = arith.constant 0 : index
    %c0_43 = arith.constant 0 : index
    %40 = vector.load %arg4[%c1_40, %c0_41, %c0_42, %c0_43] : memref<3x3x8x8xbf16, #tpu.memory_space<vmem>>, vector<1x1x8x8xbf16>
    %41 = vector.shape_cast %40 : vector<1x1x8x8xbf16> to vector<8x8xbf16>
    %cst_44 = arith.constant dense<0.000000e+00> : vector<64x8xf32>
    %42 = tpu.matmul %39, %41, %cst_44 {dimension_numbers = #tpu.dot_dimension_numbers<[1], [0], [0], [1], [0, 0, 1, 1], [], []>} : vector<64x8xbf16>, vector<8x8xbf16>, vector<64x8xf32> -> vector<64x8xf32>
    %43 = arith.addf %36, %42 : vector<64x8xf32>
    %c1_45 = arith.constant 1 : index
    %c1_46 = arith.constant 1 : index
    %c0_47 = arith.constant 0 : index
    %44 = vector.load %arg9[%c1_45, %c1_46, %c0_47] : memref<10x10x8xf32, #tpu.memory_space<vmem>>, vector<8x8x8xf32>
    %45 = vector.shape_cast %44 : vector<8x8x8xf32> to vector<64x8xf32>
    %46 = arith.truncf %45 : vector<64x8xf32> to vector<64x8xbf16>
    %c1_48 = arith.constant 1 : index
    %c1_49 = arith.constant 1 : index
    %c0_50 = arith.constant 0 : index
    %c0_51 = arith.constant 0 : index
    %47 = vector.load %arg4[%c1_48, %c1_49, %c0_50, %c0_51] : memref<3x3x8x8xbf16, #tpu.memory_space<vmem>>, vector<1x1x8x8xbf16>
    %48 = vector.shape_cast %47 : vector<1x1x8x8xbf16> to vector<8x8xbf16>
    %cst_52 = arith.constant dense<0.000000e+00> : vector<64x8xf32>
    %49 = tpu.matmul %46, %48, %cst_52 {dimension_numbers = #tpu.dot_dimension_numbers<[1], [0], [0], [1], [0, 0, 1, 1], [], []>} : vector<64x8xbf16>, vector<8x8xbf16>, vector<64x8xf32> -> vector<64x8xf32>
    %50 = arith.addf %43, %49 : vector<64x8xf32>
    %c1_53 = arith.constant 1 : index
    %c2_54 = arith.constant 2 : index
    %c0_55 = arith.constant 0 : index
    %51 = vector.load %arg9[%c1_53, %c2_54, %c0_55] : memref<10x10x8xf32, #tpu.memory_space<vmem>>, vector<8x8x8xf32>
    %52 = vector.shape_cast %51 : vector<8x8x8xf32> to vector<64x8xf32>
    %53 = arith.truncf %52 : vector<64x8xf32> to vector<64x8xbf16>
    %c1_56 = arith.constant 1 : index
    %c2_57 = arith.constant 2 : index
    %c0_58 = arith.constant 0 : index
    %c0_59 = arith.constant 0 : index
    %54 = vector.load %arg4[%c1_56, %c2_57, %c0_58, %c0_59] : memref<3x3x8x8xbf16, #tpu.memory_space<vmem>>, vector<1x1x8x8xbf16>
    %55 = vector.shape_cast %54 : vector<1x1x8x8xbf16> to vector<8x8xbf16>
    %cst_60 = arith.constant dense<0.000000e+00> : vector<64x8xf32>
    %56 = tpu.matmul %53, %55, %cst_60 {dimension_numbers = #tpu.dot_dimension_numbers<[1], [0], [0], [1], [0, 0, 1, 1], [], []>} : vector<64x8xbf16>, vector<8x8xbf16>, vector<64x8xf32> -> vector<64x8xf32>
    %57 = arith.addf %50, %56 : vector<64x8xf32>
    %c2_61 = arith.constant 2 : index
    %c0_62 = arith.constant 0 : index
    %c0_63 = arith.constant 0 : index
    %58 = vector.load %arg9[%c2_61, %c0_62, %c0_63] : memref<10x10x8xf32, #tpu.memory_space<vmem>>, vector<8x8x8xf32>
    %59 = vector.shape_cast %58 : vector<8x8x8xf32> to vector<64x8xf32>
    %60 = arith.truncf %59 : vector<64x8xf32> to vector<64x8xbf16>
    %c2_64 = arith.constant 2 : index
    %c0_65 = arith.constant 0 : index
    %c0_66 = arith.constant 0 : index
    %c0_67 = arith.constant 0 : index
    %61 = vector.load %arg4[%c2_64, %c0_65, %c0_66, %c0_67] : memref<3x3x8x8xbf16, #tpu.memory_space<vmem>>, vector<1x1x8x8xbf16>
    %62 = vector.shape_cast %61 : vector<1x1x8x8xbf16> to vector<8x8xbf16>
    %cst_68 = arith.constant dense<0.000000e+00> : vector<64x8xf32>
    %63 = tpu.matmul %60, %62, %cst_68 {dimension_numbers = #tpu.dot_dimension_numbers<[1], [0], [0], [1], [0, 0, 1, 1], [], []>} : vector<64x8xbf16>, vector<8x8xbf16>, vector<64x8xf32> -> vector<64x8xf32>
    %64 = arith.addf %57, %63 : vector<64x8xf32>
    %c2_69 = arith.constant 2 : index
    %c1_70 = arith.constant 1 : index
    %c0_71 = arith.constant 0 : index
    %65 = vector.load %arg9[%c2_69, %c1_70, %c0_71] : memref<10x10x8xf32, #tpu.memory_space<vmem>>, vector<8x8x8xf32>
    %66 = vector.shape_cast %65 : vector<8x8x8xf32> to vector<64x8xf32>
    %67 = arith.truncf %66 : vector<64x8xf32> to vector<64x8xbf16>
    %c2_72 = arith.constant 2 : index
    %c1_73 = arith.constant 1 : index
    %c0_74 = arith.constant 0 : index
    %c0_75 = arith.constant 0 : index
    %68 = vector.load %arg4[%c2_72, %c1_73, %c0_74, %c0_75] : memref<3x3x8x8xbf16, #tpu.memory_space<vmem>>, vector<1x1x8x8xbf16>
    %69 = vector.shape_cast %68 : vector<1x1x8x8xbf16> to vector<8x8xbf16>
    %cst_76 = arith.constant dense<0.000000e+00> : vector<64x8xf32>
    %70 = tpu.matmul %67, %69, %cst_76 {dimension_numbers = #tpu.dot_dimension_numbers<[1], [0], [0], [1], [0, 0, 1, 1], [], []>} : vector<64x8xbf16>, vector<8x8xbf16>, vector<64x8xf32> -> vector<64x8xf32>
    %71 = arith.addf %64, %70 : vector<64x8xf32>
    %c2_77 = arith.constant 2 : index
    %c2_78 = arith.constant 2 : index
    %c0_79 = arith.constant 0 : index
    %72 = vector.load %arg9[%c2_77, %c2_78, %c0_79] : memref<10x10x8xf32, #tpu.memory_space<vmem>>, vector<8x8x8xf32>
    %73 = vector.shape_cast %72 : vector<8x8x8xf32> to vector<64x8xf32>
    %74 = arith.truncf %73 : vector<64x8xf32> to vector<64x8xbf16>
    %c2_80 = arith.constant 2 : index
    %c2_81 = arith.constant 2 : index
    %c0_82 = arith.constant 0 : index
    %c0_83 = arith.constant 0 : index
    %75 = vector.load %arg4[%c2_80, %c2_81, %c0_82, %c0_83] : memref<3x3x8x8xbf16, #tpu.memory_space<vmem>>, vector<1x1x8x8xbf16>
    %76 = vector.shape_cast %75 : vector<1x1x8x8xbf16> to vector<8x8xbf16>
    %cst_84 = arith.constant dense<0.000000e+00> : vector<64x8xf32>
    %77 = tpu.matmul %74, %76, %cst_84 {dimension_numbers = #tpu.dot_dimension_numbers<[1], [0], [0], [1], [0, 0, 1, 1], [], []>} : vector<64x8xbf16>, vector<8x8xbf16>, vector<64x8xf32> -> vector<64x8xf32>
    %78 = arith.addf %71, %77 : vector<64x8xf32>
    %c0_85 = arith.constant 0 : index
    %c0_86 = arith.constant 0 : index
    %79 = vector.load %arg5[%c0_85, %c0_86] : memref<1x8xf32, #tpu.memory_space<vmem>>, vector<1x8xf32>
    %80 = vector.broadcast %79 : vector<1x8xf32> to vector<64x8xf32>
    %81 = arith.mulf %78, %80 : vector<64x8xf32>
    %c0_87 = arith.constant 0 : index
    %c0_88 = arith.constant 0 : index
    %82 = vector.load %arg6[%c0_87, %c0_88] : memref<1x8xf32, #tpu.memory_space<vmem>>, vector<1x8xf32>
    %83 = vector.broadcast %82 : vector<1x8xf32> to vector<64x8xf32>
    %84 = arith.addf %81, %83 : vector<64x8xf32>
    %cst_89 = arith.constant 0.000000e+00 : f32
    %85 = vector.broadcast %cst_89 : f32 to vector<64x8xf32>
    %86 = arith.maximumf %84, %85 : vector<64x8xf32>
    %cst_90 = arith.constant 0.000000e+00 : f32
    %87 = vector.broadcast %cst_90 : f32 to vector<10x10x8xf32>
    %c0_91 = arith.constant 0 : index
    %c0_92 = arith.constant 0 : index
    %c0_93 = arith.constant 0 : index
    %88 = vector.load %arg10[%c0_91, %c0_92, %c0_93] : memref<10x10x8xf32, #tpu.memory_space<vmem>>, vector<10x10x8xf32>
    tpu.vector_store %arg10[%c0_91, %c0_92, %c0_93], %87 {strides = array<i32>} : memref<10x10x8xf32, #tpu.memory_space<vmem>>, vector<10x10x8xf32>,
    %89 = vector.shape_cast %86 : vector<64x8xf32> to vector<8x8x8xf32>
    %c1_94 = arith.constant 1 : index
    %c1_95 = arith.constant 1 : index
    %c0_96 = arith.constant 0 : index
    %90 = vector.load %arg10[%c1_94, %c1_95, %c0_96] : memref<10x10x8xf32, #tpu.memory_space<vmem>>, vector<8x8x8xf32>
    tpu.vector_store %arg10[%c1_94, %c1_95, %c0_96], %89 {strides = array<i32>} : memref<10x10x8xf32, #tpu.memory_space<vmem>>, vector<8x8x8xf32>,
    %91 = vector.shape_cast %1 : vector<8x8x8xf32> to vector<64x8xf32>
    %c0_97 = arith.constant 0 : index
    %c0_98 = arith.constant 0 : index
    %c0_99 = arith.constant 0 : index
    %92 = vector.load %arg10[%c0_97, %c0_98, %c0_99] : memref<10x10x8xf32, #tpu.memory_space<vmem>>, vector<8x8x8xf32>
    %93 = vector.shape_cast %92 : vector<8x8x8xf32> to vector<64x8xf32>
    %94 = arith.truncf %93 : vector<64x8xf32> to vector<64x8xbf16>
    %c0_100 = arith.constant 0 : index
    %c0_101 = arith.constant 0 : index
    %c0_102 = arith.constant 0 : index
    %c0_103 = arith.constant 0 : index
    %95 = vector.load %arg7[%c0_100, %c0_101, %c0_102, %c0_103] : memref<3x3x8x8xbf16, #tpu.memory_space<vmem>>, vector<1x1x8x8xbf16>
    %96 = vector.shape_cast %95 : vector<1x1x8x8xbf16> to vector<8x8xbf16>
    %cst_104 = arith.constant dense<0.000000e+00> : vector<64x8xf32>
    %97 = tpu.matmul %94, %96, %cst_104 {dimension_numbers = #tpu.dot_dimension_numbers<[1], [0], [0], [1], [0, 0, 1, 1], [], []>} : vector<64x8xbf16>, vector<8x8xbf16>, vector<64x8xf32> -> vector<64x8xf32>
    %98 = arith.addf %91, %97 : vector<64x8xf32>
    %c0_105 = arith.constant 0 : index
    %c1_106 = arith.constant 1 : index
    %c0_107 = arith.constant 0 : index
    %99 = vector.load %arg10[%c0_105, %c1_106, %c0_107] : memref<10x10x8xf32, #tpu.memory_space<vmem>>, vector<8x8x8xf32>
    %100 = vector.shape_cast %99 : vector<8x8x8xf32> to vector<64x8xf32>
    %101 = arith.truncf %100 : vector<64x8xf32> to vector<64x8xbf16>
    %c0_108 = arith.constant 0 : index
    %c1_109 = arith.constant 1 : index
    %c0_110 = arith.constant 0 : index
    %c0_111 = arith.constant 0 : index
    %102 = vector.load %arg7[%c0_108, %c1_109, %c0_110, %c0_111] : memref<3x3x8x8xbf16, #tpu.memory_space<vmem>>, vector<1x1x8x8xbf16>
    %103 = vector.shape_cast %102 : vector<1x1x8x8xbf16> to vector<8x8xbf16>
    %cst_112 = arith.constant dense<0.000000e+00> : vector<64x8xf32>
    %104 = tpu.matmul %101, %103, %cst_112 {dimension_numbers = #tpu.dot_dimension_numbers<[1], [0], [0], [1], [0, 0, 1, 1], [], []>} : vector<64x8xbf16>, vector<8x8xbf16>, vector<64x8xf32> -> vector<64x8xf32>
    %105 = arith.addf %98, %104 : vector<64x8xf32>
    %c0_113 = arith.constant 0 : index
    %c2_114 = arith.constant 2 : index
    %c0_115 = arith.constant 0 : index
    %106 = vector.load %arg10[%c0_113, %c2_114, %c0_115] : memref<10x10x8xf32, #tpu.memory_space<vmem>>, vector<8x8x8xf32>
    %107 = vector.shape_cast %106 : vector<8x8x8xf32> to vector<64x8xf32>
    %108 = arith.truncf %107 : vector<64x8xf32> to vector<64x8xbf16>
    %c0_116 = arith.constant 0 : index
    %c2_117 = arith.constant 2 : index
    %c0_118 = arith.constant 0 : index
    %c0_119 = arith.constant 0 : index
    %109 = vector.load %arg7[%c0_116, %c2_117, %c0_118, %c0_119] : memref<3x3x8x8xbf16, #tpu.memory_space<vmem>>, vector<1x1x8x8xbf16>
    %110 = vector.shape_cast %109 : vector<1x1x8x8xbf16> to vector<8x8xbf16>
    %cst_120 = arith.constant dense<0.000000e+00> : vector<64x8xf32>
    %111 = tpu.matmul %108, %110, %cst_120 {dimension_numbers = #tpu.dot_dimension_numbers<[1], [0], [0], [1], [0, 0, 1, 1], [], []>} : vector<64x8xbf16>, vector<8x8xbf16>, vector<64x8xf32> -> vector<64x8xf32>
    %112 = arith.addf %105, %111 : vector<64x8xf32>
    %c1_121 = arith.constant 1 : index
    %c0_122 = arith.constant 0 : index
    %c0_123 = arith.constant 0 : index
    %113 = vector.load %arg10[%c1_121, %c0_122, %c0_123] : memref<10x10x8xf32, #tpu.memory_space<vmem>>, vector<8x8x8xf32>
    %114 = vector.shape_cast %113 : vector<8x8x8xf32> to vector<64x8xf32>
    %115 = arith.truncf %114 : vector<64x8xf32> to vector<64x8xbf16>
    %c1_124 = arith.constant 1 : index
    %c0_125 = arith.constant 0 : index
    %c0_126 = arith.constant 0 : index
    %c0_127 = arith.constant 0 : index
    %116 = vector.load %arg7[%c1_124, %c0_125, %c0_126, %c0_127] : memref<3x3x8x8xbf16, #tpu.memory_space<vmem>>, vector<1x1x8x8xbf16>
    %117 = vector.shape_cast %116 : vector<1x1x8x8xbf16> to vector<8x8xbf16>
    %cst_128 = arith.constant dense<0.000000e+00> : vector<64x8xf32>
    %118 = tpu.matmul %115, %117, %cst_128 {dimension_numbers = #tpu.dot_dimension_numbers<[1], [0], [0], [1], [0, 0, 1, 1], [], []>} : vector<64x8xbf16>, vector<8x8xbf16>, vector<64x8xf32> -> vector<64x8xf32>
    %119 = arith.addf %112, %118 : vector<64x8xf32>
    %c1_129 = arith.constant 1 : index
    %c1_130 = arith.constant 1 : index
    %c0_131 = arith.constant 0 : index
    %120 = vector.load %arg10[%c1_129, %c1_130, %c0_131] : memref<10x10x8xf32, #tpu.memory_space<vmem>>, vector<8x8x8xf32>
    %121 = vector.shape_cast %120 : vector<8x8x8xf32> to vector<64x8xf32>
    %122 = arith.truncf %121 : vector<64x8xf32> to vector<64x8xbf16>
    %c1_132 = arith.constant 1 : index
    %c1_133 = arith.constant 1 : index
    %c0_134 = arith.constant 0 : index
    %c0_135 = arith.constant 0 : index
    %123 = vector.load %arg7[%c1_132, %c1_133, %c0_134, %c0_135] : memref<3x3x8x8xbf16, #tpu.memory_space<vmem>>, vector<1x1x8x8xbf16>
    %124 = vector.shape_cast %123 : vector<1x1x8x8xbf16> to vector<8x8xbf16>
    %cst_136 = arith.constant dense<0.000000e+00> : vector<64x8xf32>
    %125 = tpu.matmul %122, %124, %cst_136 {dimension_numbers = #tpu.dot_dimension_numbers<[1], [0], [0], [1], [0, 0, 1, 1], [], []>} : vector<64x8xbf16>, vector<8x8xbf16>, vector<64x8xf32> -> vector<64x8xf32>
    %126 = arith.addf %119, %125 : vector<64x8xf32>
    %c1_137 = arith.constant 1 : index
    %c2_138 = arith.constant 2 : index
    %c0_139 = arith.constant 0 : index
    %127 = vector.load %arg10[%c1_137, %c2_138, %c0_139] : memref<10x10x8xf32, #tpu.memory_space<vmem>>, vector<8x8x8xf32>
    %128 = vector.shape_cast %127 : vector<8x8x8xf32> to vector<64x8xf32>
    %129 = arith.truncf %128 : vector<64x8xf32> to vector<64x8xbf16>
    %c1_140 = arith.constant 1 : index
    %c2_141 = arith.constant 2 : index
    %c0_142 = arith.constant 0 : index
    %c0_143 = arith.constant 0 : index
    %130 = vector.load %arg7[%c1_140, %c2_141, %c0_142, %c0_143] : memref<3x3x8x8xbf16, #tpu.memory_space<vmem>>, vector<1x1x8x8xbf16>
    %131 = vector.shape_cast %130 : vector<1x1x8x8xbf16> to vector<8x8xbf16>
    %cst_144 = arith.constant dense<0.000000e+00> : vector<64x8xf32>
    %132 = tpu.matmul %129, %131, %cst_144 {dimension_numbers = #tpu.dot_dimension_numbers<[1], [0], [0], [1], [0, 0, 1, 1], [], []>} : vector<64x8xbf16>, vector<8x8xbf16>, vector<64x8xf32> -> vector<64x8xf32>
    %133 = arith.addf %126, %132 : vector<64x8xf32>
    %c2_145 = arith.constant 2 : index
    %c0_146 = arith.constant 0 : index
    %c0_147 = arith.constant 0 : index
    %134 = vector.load %arg10[%c2_145, %c0_146, %c0_147] : memref<10x10x8xf32, #tpu.memory_space<vmem>>, vector<8x8x8xf32>
    %135 = vector.shape_cast %134 : vector<8x8x8xf32> to vector<64x8xf32>
    %136 = arith.truncf %135 : vector<64x8xf32> to vector<64x8xbf16>
    %c2_148 = arith.constant 2 : index
    %c0_149 = arith.constant 0 : index
    %c0_150 = arith.constant 0 : index
    %c0_151 = arith.constant 0 : index
    %137 = vector.load %arg7[%c2_148, %c0_149, %c0_150, %c0_151] : memref<3x3x8x8xbf16, #tpu.memory_space<vmem>>, vector<1x1x8x8xbf16>
    %138 = vector.shape_cast %137 : vector<1x1x8x8xbf16> to vector<8x8xbf16>
    %cst_152 = arith.constant dense<0.000000e+00> : vector<64x8xf32>
    %139 = tpu.matmul %136, %138, %cst_152 {dimension_numbers = #tpu.dot_dimension_numbers<[1], [0], [0], [1], [0, 0, 1, 1], [], []>} : vector<64x8xbf16>, vector<8x8xbf16>, vector<64x8xf32> -> vector<64x8xf32>
    %140 = arith.addf %133, %139 : vector<64x8xf32>
    %c2_153 = arith.constant 2 : index
    %c1_154 = arith.constant 1 : index
    %c0_155 = arith.constant 0 : index
    %141 = vector.load %arg10[%c2_153, %c1_154, %c0_155] : memref<10x10x8xf32, #tpu.memory_space<vmem>>, vector<8x8x8xf32>
    %142 = vector.shape_cast %141 : vector<8x8x8xf32> to vector<64x8xf32>
    %143 = arith.truncf %142 : vector<64x8xf32> to vector<64x8xbf16>
    %c2_156 = arith.constant 2 : index
    %c1_157 = arith.constant 1 : index
    %c0_158 = arith.constant 0 : index
    %c0_159 = arith.constant 0 : index
    %144 = vector.load %arg7[%c2_156, %c1_157, %c0_158, %c0_159] : memref<3x3x8x8xbf16, #tpu.memory_space<vmem>>, vector<1x1x8x8xbf16>
    %145 = vector.shape_cast %144 : vector<1x1x8x8xbf16> to vector<8x8xbf16>
    %cst_160 = arith.constant dense<0.000000e+00> : vector<64x8xf32>
    %146 = tpu.matmul %143, %145, %cst_160 {dimension_numbers = #tpu.dot_dimension_numbers<[1], [0], [0], [1], [0, 0, 1, 1], [], []>} : vector<64x8xbf16>, vector<8x8xbf16>, vector<64x8xf32> -> vector<64x8xf32>
    %147 = arith.addf %140, %146 : vector<64x8xf32>
    %c2_161 = arith.constant 2 : index
    %c2_162 = arith.constant 2 : index
    %c0_163 = arith.constant 0 : index
    %148 = vector.load %arg10[%c2_161, %c2_162, %c0_163] : memref<10x10x8xf32, #tpu.memory_space<vmem>>, vector<8x8x8xf32>
    %149 = vector.shape_cast %148 : vector<8x8x8xf32> to vector<64x8xf32>
    %150 = arith.truncf %149 : vector<64x8xf32> to vector<64x8xbf16>
    %c2_164 = arith.constant 2 : index
    %c2_165 = arith.constant 2 : index
    %c0_166 = arith.constant 0 : index
    %c0_167 = arith.constant 0 : index
    %151 = vector.load %arg7[%c2_164, %c2_165, %c0_166, %c0_167] : memref<3x3x8x8xbf16, #tpu.memory_space<vmem>>, vector<1x1x8x8xbf16>
    %152 = vector.shape_cast %151 : vector<1x1x8x8xbf16> to vector<8x8xbf16>
    %cst_168 = arith.constant dense<0.000000e+00> : vector<64x8xf32>
    %153 = tpu.matmul %150, %152, %cst_168 {dimension_numbers = #tpu.dot_dimension_numbers<[1], [0], [0], [1], [0, 0, 1, 1], [], []>} : vector<64x8xbf16>, vector<8x8xbf16>, vector<64x8xf32> -> vector<64x8xf32>
    %154 = arith.addf %147, %153 : vector<64x8xf32>
    %155 = vector.shape_cast %154 : vector<64x8xf32> to vector<8x8x8xf32>
    %c0_169 = arith.constant 0 : index
    %c0_170 = arith.constant 0 : index
    %c0_171 = arith.constant 0 : index
    %c0_172 = arith.constant 0 : index
    %156 = vector.load %arg8[%c0_169, %c0_170, %c0_171, %c0_172] : memref<1x8x8x8xf32, #tpu.memory_space<vmem>>, vector<1x8x8x8xf32>
    %157 = vector.shape_cast %156 : vector<1x8x8x8xf32> to vector<8x8x8xf32>
    %158 = vector.shape_cast %155 : vector<8x8x8xf32> to vector<1x8x8x8xf32>
    tpu.vector_store %arg8[%c0_169, %c0_170, %c0_171, %c0_172], %158 {strides = array<i32>} : memref<1x8x8x8xf32, #tpu.memory_space<vmem>>, vector<1x8x8x8xf32>,
    return
  }
  func.func @transform_0(%arg0: i32) -> (i32, i32, i32, i32) {
    %c0_i32 = arith.constant 0 : i32
    %c0_i32_0 = arith.constant 0 : i32
    %c0_i32_1 = arith.constant 0 : i32
    %c0_i32_2 = arith.constant 0 : i32
    return %arg0, %c0_i32, %c0_i32_0, %c0_i32_1 : i32, i32, i32, i32
  }
  func.func @transform_1(%arg0: i32) -> (i32, i32) {
    %c0_i32 = arith.constant 0 : i32
    %c0_i32_0 = arith.constant 0 : i32
    %c0_i32_1 = arith.constant 0 : i32
    return %c0_i32, %c0_i32_0 : i32, i32
  }
  func.func @transform_2(%arg0: i32) -> (i32, i32) {
    %c0_i32 = arith.constant 0 : i32
    %c0_i32_0 = arith.constant 0 : i32
    %c0_i32_1 = arith.constant 0 : i32
    return %c0_i32, %c0_i32_0 : i32, i32
  }
  func.func @transform_3(%arg0: i32) -> (i32, i32, i32, i32) {
    %c0_i32 = arith.constant 0 : i32
    %c0_i32_0 = arith.constant 0 : i32
    %c0_i32_1 = arith.constant 0 : i32
    %c0_i32_2 = arith.constant 0 : i32
    %c0_i32_3 = arith.constant 0 : i32
    return %c0_i32, %c0_i32_0, %c0_i32_1, %c0_i32_2 : i32, i32, i32, i32
  }
  func.func @transform_4(%arg0: i32) -> (i32, i32) {
    %c0_i32 = arith.constant 0 : i32
    %c0_i32_0 = arith.constant 0 : i32
    %c0_i32_1 = arith.constant 0 : i32
    return %c0_i32, %c0_i32_0 : i32, i32
  }
  func.func @transform_5(%arg0: i32) -> (i32, i32) {
    %c0_i32 = arith.constant 0 : i32
    %c0_i32_0 = arith.constant 0 : i32
    %c0_i32_1 = arith.constant 0 : i32
    return %c0_i32, %c0_i32_0 : i32, i32
  }
  func.func @transform_6(%arg0: i32) -> (i32, i32, i32, i32) {
    %c0_i32 = arith.constant 0 : i32
    %c0_i32_0 = arith.constant 0 : i32
    %c0_i32_1 = arith.constant 0 : i32
    %c0_i32_2 = arith.constant 0 : i32
    %c0_i32_3 = arith.constant 0 : i32
    return %c0_i32, %c0_i32_0, %c0_i32_1, %c0_i32_2 : i32, i32, i32, i32
  }
  func.func @transform_7(%arg0: i32) -> (i32, i32, i32, i32) {
    %c0_i32 = arith.constant 0 : i32
    %c0_i32_0 = arith.constant 0 : i32
    %c0_i32_1 = arith.constant 0 : i32
    %c0_i32_2 = arith.constant 0 : i32
    return %arg0, %c0_i32, %c0_i32_0, %c0_i32_1 : i32, i32, i32, i32
  }
}

module attributes {stable_mosaic.version = 11 : i64} {
  func.func @kernel(%arg0: i32, %arg1: memref<1x16x16x4xf32, #tpu.memory_space<vmem>>, %arg2: memref<1x4xf32, #tpu.memory_space<vmem>>, %arg3: memref<1x4xf32, #tpu.memory_space<vmem>>, %arg4: memref<3x3x4x8xbf16, #tpu.memory_space<vmem>>, %arg5: memref<1x8xf32, #tpu.memory_space<vmem>>, %arg6: memref<1x8xf32, #tpu.memory_space<vmem>>, %arg7: memref<3x3x8x8xbf16, #tpu.memory_space<vmem>>, %arg8: memref<4x8xbf16, #tpu.memory_space<vmem>>, %arg9: memref<1x8x8x8xf32, #tpu.memory_space<vmem>>, %arg10: memref<18x18x4xf32, #tpu.memory_space<vmem>>, %arg11: memref<10x10x8xf32, #tpu.memory_space<vmem>>) attributes {dimension_semantics = [#tpu.dimension_semantics<parallel>], iteration_bounds = array<i64: 2>, scalar_prefetch = 0 : i64, scratch_operands = 2 : i64, tpu.core_type = #tpu.core_type<tc>, window_params = [{transform_indices = @transform_0, window_bounds = array<i64: 1, 16, 16, 4>}, {pipeline_mode = #tpu.pipeline_mode<synchronous>, transform_indices = @transform_1, window_bounds = array<i64: 1, 4>}, {pipeline_mode = #tpu.pipeline_mode<synchronous>, transform_indices = @transform_2, window_bounds = array<i64: 1, 4>}, {pipeline_mode = #tpu.pipeline_mode<synchronous>, transform_indices = @transform_3, window_bounds = array<i64: 3, 3, 4, 8>}, {pipeline_mode = #tpu.pipeline_mode<synchronous>, transform_indices = @transform_4, window_bounds = array<i64: 1, 8>}, {pipeline_mode = #tpu.pipeline_mode<synchronous>, transform_indices = @transform_5, window_bounds = array<i64: 1, 8>}, {pipeline_mode = #tpu.pipeline_mode<synchronous>, transform_indices = @transform_6, window_bounds = array<i64: 3, 3, 8, 8>}, {pipeline_mode = #tpu.pipeline_mode<synchronous>, transform_indices = @transform_7, window_bounds = array<i64: 4, 8>}, {transform_indices = @transform_8, window_bounds = array<i64: 1, 8, 8, 8>}]} {
    %c0 = arith.constant 0 : index
    %c0_0 = arith.constant 0 : index
    %c0_1 = arith.constant 0 : index
    %c0_2 = arith.constant 0 : index
    %0 = vector.load %arg1[%c0, %c0_0, %c0_1, %c0_2] : memref<1x16x16x4xf32, #tpu.memory_space<vmem>>, vector<1x16x16x4xf32>
    %1 = vector.shape_cast %0 : vector<1x16x16x4xf32> to vector<16x16x4xf32>
    %c0_3 = arith.constant 0 : index
    %c0_4 = arith.constant 0 : index
    %2 = vector.load %arg2[%c0_3, %c0_4] : memref<1x4xf32, #tpu.memory_space<vmem>>, vector<1x4xf32>
    %3 = vector.shape_cast %2 : vector<1x4xf32> to vector<1x1x4xf32>
    %4 = vector.broadcast %3 : vector<1x1x4xf32> to vector<16x16x4xf32>
    %5 = arith.mulf %1, %4 : vector<16x16x4xf32>
    %c0_5 = arith.constant 0 : index
    %c0_6 = arith.constant 0 : index
    %6 = vector.load %arg3[%c0_5, %c0_6] : memref<1x4xf32, #tpu.memory_space<vmem>>, vector<1x4xf32>
    %7 = vector.shape_cast %6 : vector<1x4xf32> to vector<1x1x4xf32>
    %8 = vector.broadcast %7 : vector<1x1x4xf32> to vector<16x16x4xf32>
    %9 = arith.addf %5, %8 : vector<16x16x4xf32>
    %cst = arith.constant 0.000000e+00 : f32
    %10 = vector.broadcast %cst : f32 to vector<16x16x4xf32>
    %11 = arith.maximumf %9, %10 : vector<16x16x4xf32>
    %cst_7 = arith.constant 0.000000e+00 : f32
    %12 = vector.broadcast %cst_7 : f32 to vector<18x18x4xf32>
    %c0_8 = arith.constant 0 : index
    %c0_9 = arith.constant 0 : index
    %c0_10 = arith.constant 0 : index
    %13 = vector.load %arg10[%c0_8, %c0_9, %c0_10] : memref<18x18x4xf32, #tpu.memory_space<vmem>>, vector<18x18x4xf32>
    tpu.vector_store %arg10[%c0_8, %c0_9, %c0_10], %12 {strides = array<i32>} : memref<18x18x4xf32, #tpu.memory_space<vmem>>, vector<18x18x4xf32>,
    %c1 = arith.constant 1 : index
    %c1_11 = arith.constant 1 : index
    %c0_12 = arith.constant 0 : index
    %14 = vector.load %arg10[%c1, %c1_11, %c0_12] : memref<18x18x4xf32, #tpu.memory_space<vmem>>, vector<16x16x4xf32>
    tpu.vector_store %arg10[%c1, %c1_11, %c0_12], %11 {strides = array<i32>} : memref<18x18x4xf32, #tpu.memory_space<vmem>>, vector<16x16x4xf32>,
    %cst_13 = arith.constant 0.000000e+00 : f32
    %15 = vector.broadcast %cst_13 : f32 to vector<64x8xf32>
    %c0_14 = arith.constant 0 : index
    %c0_15 = arith.constant 0 : index
    %c0_16 = arith.constant 0 : index
    %16 = tpu.strided_load %arg10[%c0_14, %c0_15, %c0_16] {strides = array<i32: 2, 2, 1>} : memref<18x18x4xf32, #tpu.memory_space<vmem>>, vector<8x8x4xf32>
    %17 = vector.shape_cast %16 : vector<8x8x4xf32> to vector<64x4xf32>
    %18 = arith.truncf %17 : vector<64x4xf32> to vector<64x4xbf16>
    %c0_17 = arith.constant 0 : index
    %c0_18 = arith.constant 0 : index
    %c0_19 = arith.constant 0 : index
    %c0_20 = arith.constant 0 : index
    %19 = vector.load %arg4[%c0_17, %c0_18, %c0_19, %c0_20] : memref<3x3x4x8xbf16, #tpu.memory_space<vmem>>, vector<1x1x4x8xbf16>
    %20 = vector.shape_cast %19 : vector<1x1x4x8xbf16> to vector<4x8xbf16>
    %cst_21 = arith.constant dense<0.000000e+00> : vector<64x8xf32>
    %21 = tpu.matmul %18, %20, %cst_21 {dimension_numbers = #tpu.dot_dimension_numbers<[1], [0], [0], [1], [0, 0, 1, 1], [], []>} : vector<64x4xbf16>, vector<4x8xbf16>, vector<64x8xf32> -> vector<64x8xf32>
    %22 = arith.addf %15, %21 : vector<64x8xf32>
    %c0_22 = arith.constant 0 : index
    %c1_23 = arith.constant 1 : index
    %c0_24 = arith.constant 0 : index
    %23 = tpu.strided_load %arg10[%c0_22, %c1_23, %c0_24] {strides = array<i32: 2, 2, 1>} : memref<18x18x4xf32, #tpu.memory_space<vmem>>, vector<8x8x4xf32>
    %24 = vector.shape_cast %23 : vector<8x8x4xf32> to vector<64x4xf32>
    %25 = arith.truncf %24 : vector<64x4xf32> to vector<64x4xbf16>
    %c0_25 = arith.constant 0 : index
    %c1_26 = arith.constant 1 : index
    %c0_27 = arith.constant 0 : index
    %c0_28 = arith.constant 0 : index
    %26 = vector.load %arg4[%c0_25, %c1_26, %c0_27, %c0_28] : memref<3x3x4x8xbf16, #tpu.memory_space<vmem>>, vector<1x1x4x8xbf16>
    %27 = vector.shape_cast %26 : vector<1x1x4x8xbf16> to vector<4x8xbf16>
    %cst_29 = arith.constant dense<0.000000e+00> : vector<64x8xf32>
    %28 = tpu.matmul %25, %27, %cst_29 {dimension_numbers = #tpu.dot_dimension_numbers<[1], [0], [0], [1], [0, 0, 1, 1], [], []>} : vector<64x4xbf16>, vector<4x8xbf16>, vector<64x8xf32> -> vector<64x8xf32>
    %29 = arith.addf %22, %28 : vector<64x8xf32>
    %c0_30 = arith.constant 0 : index
    %c2 = arith.constant 2 : index
    %c0_31 = arith.constant 0 : index
    %30 = tpu.strided_load %arg10[%c0_30, %c2, %c0_31] {strides = array<i32: 2, 2, 1>} : memref<18x18x4xf32, #tpu.memory_space<vmem>>, vector<8x8x4xf32>
    %31 = vector.shape_cast %30 : vector<8x8x4xf32> to vector<64x4xf32>
    %32 = arith.truncf %31 : vector<64x4xf32> to vector<64x4xbf16>
    %c0_32 = arith.constant 0 : index
    %c2_33 = arith.constant 2 : index
    %c0_34 = arith.constant 0 : index
    %c0_35 = arith.constant 0 : index
    %33 = vector.load %arg4[%c0_32, %c2_33, %c0_34, %c0_35] : memref<3x3x4x8xbf16, #tpu.memory_space<vmem>>, vector<1x1x4x8xbf16>
    %34 = vector.shape_cast %33 : vector<1x1x4x8xbf16> to vector<4x8xbf16>
    %cst_36 = arith.constant dense<0.000000e+00> : vector<64x8xf32>
    %35 = tpu.matmul %32, %34, %cst_36 {dimension_numbers = #tpu.dot_dimension_numbers<[1], [0], [0], [1], [0, 0, 1, 1], [], []>} : vector<64x4xbf16>, vector<4x8xbf16>, vector<64x8xf32> -> vector<64x8xf32>
    %36 = arith.addf %29, %35 : vector<64x8xf32>
    %c1_37 = arith.constant 1 : index
    %c0_38 = arith.constant 0 : index
    %c0_39 = arith.constant 0 : index
    %37 = tpu.strided_load %arg10[%c1_37, %c0_38, %c0_39] {strides = array<i32: 2, 2, 1>} : memref<18x18x4xf32, #tpu.memory_space<vmem>>, vector<8x8x4xf32>
    %38 = vector.shape_cast %37 : vector<8x8x4xf32> to vector<64x4xf32>
    %39 = arith.truncf %38 : vector<64x4xf32> to vector<64x4xbf16>
    %c1_40 = arith.constant 1 : index
    %c0_41 = arith.constant 0 : index
    %c0_42 = arith.constant 0 : index
    %c0_43 = arith.constant 0 : index
    %40 = vector.load %arg4[%c1_40, %c0_41, %c0_42, %c0_43] : memref<3x3x4x8xbf16, #tpu.memory_space<vmem>>, vector<1x1x4x8xbf16>
    %41 = vector.shape_cast %40 : vector<1x1x4x8xbf16> to vector<4x8xbf16>
    %cst_44 = arith.constant dense<0.000000e+00> : vector<64x8xf32>
    %42 = tpu.matmul %39, %41, %cst_44 {dimension_numbers = #tpu.dot_dimension_numbers<[1], [0], [0], [1], [0, 0, 1, 1], [], []>} : vector<64x4xbf16>, vector<4x8xbf16>, vector<64x8xf32> -> vector<64x8xf32>
    %43 = arith.addf %36, %42 : vector<64x8xf32>
    %c1_45 = arith.constant 1 : index
    %c1_46 = arith.constant 1 : index
    %c0_47 = arith.constant 0 : index
    %44 = tpu.strided_load %arg10[%c1_45, %c1_46, %c0_47] {strides = array<i32: 2, 2, 1>} : memref<18x18x4xf32, #tpu.memory_space<vmem>>, vector<8x8x4xf32>
    %45 = vector.shape_cast %44 : vector<8x8x4xf32> to vector<64x4xf32>
    %46 = arith.truncf %45 : vector<64x4xf32> to vector<64x4xbf16>
    %c1_48 = arith.constant 1 : index
    %c1_49 = arith.constant 1 : index
    %c0_50 = arith.constant 0 : index
    %c0_51 = arith.constant 0 : index
    %47 = vector.load %arg4[%c1_48, %c1_49, %c0_50, %c0_51] : memref<3x3x4x8xbf16, #tpu.memory_space<vmem>>, vector<1x1x4x8xbf16>
    %48 = vector.shape_cast %47 : vector<1x1x4x8xbf16> to vector<4x8xbf16>
    %cst_52 = arith.constant dense<0.000000e+00> : vector<64x8xf32>
    %49 = tpu.matmul %46, %48, %cst_52 {dimension_numbers = #tpu.dot_dimension_numbers<[1], [0], [0], [1], [0, 0, 1, 1], [], []>} : vector<64x4xbf16>, vector<4x8xbf16>, vector<64x8xf32> -> vector<64x8xf32>
    %50 = arith.addf %43, %49 : vector<64x8xf32>
    %c1_53 = arith.constant 1 : index
    %c2_54 = arith.constant 2 : index
    %c0_55 = arith.constant 0 : index
    %51 = tpu.strided_load %arg10[%c1_53, %c2_54, %c0_55] {strides = array<i32: 2, 2, 1>} : memref<18x18x4xf32, #tpu.memory_space<vmem>>, vector<8x8x4xf32>
    %52 = vector.shape_cast %51 : vector<8x8x4xf32> to vector<64x4xf32>
    %53 = arith.truncf %52 : vector<64x4xf32> to vector<64x4xbf16>
    %c1_56 = arith.constant 1 : index
    %c2_57 = arith.constant 2 : index
    %c0_58 = arith.constant 0 : index
    %c0_59 = arith.constant 0 : index
    %54 = vector.load %arg4[%c1_56, %c2_57, %c0_58, %c0_59] : memref<3x3x4x8xbf16, #tpu.memory_space<vmem>>, vector<1x1x4x8xbf16>
    %55 = vector.shape_cast %54 : vector<1x1x4x8xbf16> to vector<4x8xbf16>
    %cst_60 = arith.constant dense<0.000000e+00> : vector<64x8xf32>
    %56 = tpu.matmul %53, %55, %cst_60 {dimension_numbers = #tpu.dot_dimension_numbers<[1], [0], [0], [1], [0, 0, 1, 1], [], []>} : vector<64x4xbf16>, vector<4x8xbf16>, vector<64x8xf32> -> vector<64x8xf32>
    %57 = arith.addf %50, %56 : vector<64x8xf32>
    %c2_61 = arith.constant 2 : index
    %c0_62 = arith.constant 0 : index
    %c0_63 = arith.constant 0 : index
    %58 = tpu.strided_load %arg10[%c2_61, %c0_62, %c0_63] {strides = array<i32: 2, 2, 1>} : memref<18x18x4xf32, #tpu.memory_space<vmem>>, vector<8x8x4xf32>
    %59 = vector.shape_cast %58 : vector<8x8x4xf32> to vector<64x4xf32>
    %60 = arith.truncf %59 : vector<64x4xf32> to vector<64x4xbf16>
    %c2_64 = arith.constant 2 : index
    %c0_65 = arith.constant 0 : index
    %c0_66 = arith.constant 0 : index
    %c0_67 = arith.constant 0 : index
    %61 = vector.load %arg4[%c2_64, %c0_65, %c0_66, %c0_67] : memref<3x3x4x8xbf16, #tpu.memory_space<vmem>>, vector<1x1x4x8xbf16>
    %62 = vector.shape_cast %61 : vector<1x1x4x8xbf16> to vector<4x8xbf16>
    %cst_68 = arith.constant dense<0.000000e+00> : vector<64x8xf32>
    %63 = tpu.matmul %60, %62, %cst_68 {dimension_numbers = #tpu.dot_dimension_numbers<[1], [0], [0], [1], [0, 0, 1, 1], [], []>} : vector<64x4xbf16>, vector<4x8xbf16>, vector<64x8xf32> -> vector<64x8xf32>
    %64 = arith.addf %57, %63 : vector<64x8xf32>
    %c2_69 = arith.constant 2 : index
    %c1_70 = arith.constant 1 : index
    %c0_71 = arith.constant 0 : index
    %65 = tpu.strided_load %arg10[%c2_69, %c1_70, %c0_71] {strides = array<i32: 2, 2, 1>} : memref<18x18x4xf32, #tpu.memory_space<vmem>>, vector<8x8x4xf32>
    %66 = vector.shape_cast %65 : vector<8x8x4xf32> to vector<64x4xf32>
    %67 = arith.truncf %66 : vector<64x4xf32> to vector<64x4xbf16>
    %c2_72 = arith.constant 2 : index
    %c1_73 = arith.constant 1 : index
    %c0_74 = arith.constant 0 : index
    %c0_75 = arith.constant 0 : index
    %68 = vector.load %arg4[%c2_72, %c1_73, %c0_74, %c0_75] : memref<3x3x4x8xbf16, #tpu.memory_space<vmem>>, vector<1x1x4x8xbf16>
    %69 = vector.shape_cast %68 : vector<1x1x4x8xbf16> to vector<4x8xbf16>
    %cst_76 = arith.constant dense<0.000000e+00> : vector<64x8xf32>
    %70 = tpu.matmul %67, %69, %cst_76 {dimension_numbers = #tpu.dot_dimension_numbers<[1], [0], [0], [1], [0, 0, 1, 1], [], []>} : vector<64x4xbf16>, vector<4x8xbf16>, vector<64x8xf32> -> vector<64x8xf32>
    %71 = arith.addf %64, %70 : vector<64x8xf32>
    %c2_77 = arith.constant 2 : index
    %c2_78 = arith.constant 2 : index
    %c0_79 = arith.constant 0 : index
    %72 = tpu.strided_load %arg10[%c2_77, %c2_78, %c0_79] {strides = array<i32: 2, 2, 1>} : memref<18x18x4xf32, #tpu.memory_space<vmem>>, vector<8x8x4xf32>
    %73 = vector.shape_cast %72 : vector<8x8x4xf32> to vector<64x4xf32>
    %74 = arith.truncf %73 : vector<64x4xf32> to vector<64x4xbf16>
    %c2_80 = arith.constant 2 : index
    %c2_81 = arith.constant 2 : index
    %c0_82 = arith.constant 0 : index
    %c0_83 = arith.constant 0 : index
    %75 = vector.load %arg4[%c2_80, %c2_81, %c0_82, %c0_83] : memref<3x3x4x8xbf16, #tpu.memory_space<vmem>>, vector<1x1x4x8xbf16>
    %76 = vector.shape_cast %75 : vector<1x1x4x8xbf16> to vector<4x8xbf16>
    %cst_84 = arith.constant dense<0.000000e+00> : vector<64x8xf32>
    %77 = tpu.matmul %74, %76, %cst_84 {dimension_numbers = #tpu.dot_dimension_numbers<[1], [0], [0], [1], [0, 0, 1, 1], [], []>} : vector<64x4xbf16>, vector<4x8xbf16>, vector<64x8xf32> -> vector<64x8xf32>
    %78 = arith.addf %71, %77 : vector<64x8xf32>
    %c0_85 = arith.constant 0 : index
    %c0_86 = arith.constant 0 : index
    %79 = vector.load %arg5[%c0_85, %c0_86] : memref<1x8xf32, #tpu.memory_space<vmem>>, vector<1x8xf32>
    %80 = vector.broadcast %79 : vector<1x8xf32> to vector<64x8xf32>
    %81 = arith.mulf %78, %80 : vector<64x8xf32>
    %c0_87 = arith.constant 0 : index
    %c0_88 = arith.constant 0 : index
    %82 = vector.load %arg6[%c0_87, %c0_88] : memref<1x8xf32, #tpu.memory_space<vmem>>, vector<1x8xf32>
    %83 = vector.broadcast %82 : vector<1x8xf32> to vector<64x8xf32>
    %84 = arith.addf %81, %83 : vector<64x8xf32>
    %cst_89 = arith.constant 0.000000e+00 : f32
    %85 = vector.broadcast %cst_89 : f32 to vector<64x8xf32>
    %86 = arith.maximumf %84, %85 : vector<64x8xf32>
    %cst_90 = arith.constant 0.000000e+00 : f32
    %87 = vector.broadcast %cst_90 : f32 to vector<10x10x8xf32>
    %c0_91 = arith.constant 0 : index
    %c0_92 = arith.constant 0 : index
    %c0_93 = arith.constant 0 : index
    %88 = vector.load %arg11[%c0_91, %c0_92, %c0_93] : memref<10x10x8xf32, #tpu.memory_space<vmem>>, vector<10x10x8xf32>
    tpu.vector_store %arg11[%c0_91, %c0_92, %c0_93], %87 {strides = array<i32>} : memref<10x10x8xf32, #tpu.memory_space<vmem>>, vector<10x10x8xf32>,
    %89 = vector.shape_cast %86 : vector<64x8xf32> to vector<8x8x8xf32>
    %c1_94 = arith.constant 1 : index
    %c1_95 = arith.constant 1 : index
    %c0_96 = arith.constant 0 : index
    %90 = vector.load %arg11[%c1_94, %c1_95, %c0_96] : memref<10x10x8xf32, #tpu.memory_space<vmem>>, vector<8x8x8xf32>
    tpu.vector_store %arg11[%c1_94, %c1_95, %c0_96], %89 {strides = array<i32>} : memref<10x10x8xf32, #tpu.memory_space<vmem>>, vector<8x8x8xf32>,
    %c1_97 = arith.constant 1 : index
    %c1_98 = arith.constant 1 : index
    %c0_99 = arith.constant 0 : index
    %91 = tpu.strided_load %arg10[%c1_97, %c1_98, %c0_99] {strides = array<i32: 2, 2, 1>} : memref<18x18x4xf32, #tpu.memory_space<vmem>>, vector<8x8x4xf32>
    %92 = vector.shape_cast %91 : vector<8x8x4xf32> to vector<64x4xf32>
    %93 = arith.truncf %92 : vector<64x4xf32> to vector<64x4xbf16>
    %c0_100 = arith.constant 0 : index
    %c0_101 = arith.constant 0 : index
    %94 = vector.load %arg8[%c0_100, %c0_101] : memref<4x8xbf16, #tpu.memory_space<vmem>>, vector<4x8xbf16>
    %cst_102 = arith.constant dense<0.000000e+00> : vector<64x8xf32>
    %95 = tpu.matmul %93, %94, %cst_102 {dimension_numbers = #tpu.dot_dimension_numbers<[1], [0], [0], [1], [0, 0, 1, 1], [], []>} : vector<64x4xbf16>, vector<4x8xbf16>, vector<64x8xf32> -> vector<64x8xf32>
    %c0_103 = arith.constant 0 : index
    %c0_104 = arith.constant 0 : index
    %c0_105 = arith.constant 0 : index
    %96 = vector.load %arg11[%c0_103, %c0_104, %c0_105] : memref<10x10x8xf32, #tpu.memory_space<vmem>>, vector<8x8x8xf32>
    %97 = vector.shape_cast %96 : vector<8x8x8xf32> to vector<64x8xf32>
    %98 = arith.truncf %97 : vector<64x8xf32> to vector<64x8xbf16>
    %c0_106 = arith.constant 0 : index
    %c0_107 = arith.constant 0 : index
    %c0_108 = arith.constant 0 : index
    %c0_109 = arith.constant 0 : index
    %99 = vector.load %arg7[%c0_106, %c0_107, %c0_108, %c0_109] : memref<3x3x8x8xbf16, #tpu.memory_space<vmem>>, vector<1x1x8x8xbf16>
    %100 = vector.shape_cast %99 : vector<1x1x8x8xbf16> to vector<8x8xbf16>
    %cst_110 = arith.constant dense<0.000000e+00> : vector<64x8xf32>
    %101 = tpu.matmul %98, %100, %cst_110 {dimension_numbers = #tpu.dot_dimension_numbers<[1], [0], [0], [1], [0, 0, 1, 1], [], []>} : vector<64x8xbf16>, vector<8x8xbf16>, vector<64x8xf32> -> vector<64x8xf32>
    %102 = arith.addf %95, %101 : vector<64x8xf32>
    %c0_111 = arith.constant 0 : index
    %c1_112 = arith.constant 1 : index
    %c0_113 = arith.constant 0 : index
    %103 = vector.load %arg11[%c0_111, %c1_112, %c0_113] : memref<10x10x8xf32, #tpu.memory_space<vmem>>, vector<8x8x8xf32>
    %104 = vector.shape_cast %103 : vector<8x8x8xf32> to vector<64x8xf32>
    %105 = arith.truncf %104 : vector<64x8xf32> to vector<64x8xbf16>
    %c0_114 = arith.constant 0 : index
    %c1_115 = arith.constant 1 : index
    %c0_116 = arith.constant 0 : index
    %c0_117 = arith.constant 0 : index
    %106 = vector.load %arg7[%c0_114, %c1_115, %c0_116, %c0_117] : memref<3x3x8x8xbf16, #tpu.memory_space<vmem>>, vector<1x1x8x8xbf16>
    %107 = vector.shape_cast %106 : vector<1x1x8x8xbf16> to vector<8x8xbf16>
    %cst_118 = arith.constant dense<0.000000e+00> : vector<64x8xf32>
    %108 = tpu.matmul %105, %107, %cst_118 {dimension_numbers = #tpu.dot_dimension_numbers<[1], [0], [0], [1], [0, 0, 1, 1], [], []>} : vector<64x8xbf16>, vector<8x8xbf16>, vector<64x8xf32> -> vector<64x8xf32>
    %109 = arith.addf %102, %108 : vector<64x8xf32>
    %c0_119 = arith.constant 0 : index
    %c2_120 = arith.constant 2 : index
    %c0_121 = arith.constant 0 : index
    %110 = vector.load %arg11[%c0_119, %c2_120, %c0_121] : memref<10x10x8xf32, #tpu.memory_space<vmem>>, vector<8x8x8xf32>
    %111 = vector.shape_cast %110 : vector<8x8x8xf32> to vector<64x8xf32>
    %112 = arith.truncf %111 : vector<64x8xf32> to vector<64x8xbf16>
    %c0_122 = arith.constant 0 : index
    %c2_123 = arith.constant 2 : index
    %c0_124 = arith.constant 0 : index
    %c0_125 = arith.constant 0 : index
    %113 = vector.load %arg7[%c0_122, %c2_123, %c0_124, %c0_125] : memref<3x3x8x8xbf16, #tpu.memory_space<vmem>>, vector<1x1x8x8xbf16>
    %114 = vector.shape_cast %113 : vector<1x1x8x8xbf16> to vector<8x8xbf16>
    %cst_126 = arith.constant dense<0.000000e+00> : vector<64x8xf32>
    %115 = tpu.matmul %112, %114, %cst_126 {dimension_numbers = #tpu.dot_dimension_numbers<[1], [0], [0], [1], [0, 0, 1, 1], [], []>} : vector<64x8xbf16>, vector<8x8xbf16>, vector<64x8xf32> -> vector<64x8xf32>
    %116 = arith.addf %109, %115 : vector<64x8xf32>
    %c1_127 = arith.constant 1 : index
    %c0_128 = arith.constant 0 : index
    %c0_129 = arith.constant 0 : index
    %117 = vector.load %arg11[%c1_127, %c0_128, %c0_129] : memref<10x10x8xf32, #tpu.memory_space<vmem>>, vector<8x8x8xf32>
    %118 = vector.shape_cast %117 : vector<8x8x8xf32> to vector<64x8xf32>
    %119 = arith.truncf %118 : vector<64x8xf32> to vector<64x8xbf16>
    %c1_130 = arith.constant 1 : index
    %c0_131 = arith.constant 0 : index
    %c0_132 = arith.constant 0 : index
    %c0_133 = arith.constant 0 : index
    %120 = vector.load %arg7[%c1_130, %c0_131, %c0_132, %c0_133] : memref<3x3x8x8xbf16, #tpu.memory_space<vmem>>, vector<1x1x8x8xbf16>
    %121 = vector.shape_cast %120 : vector<1x1x8x8xbf16> to vector<8x8xbf16>
    %cst_134 = arith.constant dense<0.000000e+00> : vector<64x8xf32>
    %122 = tpu.matmul %119, %121, %cst_134 {dimension_numbers = #tpu.dot_dimension_numbers<[1], [0], [0], [1], [0, 0, 1, 1], [], []>} : vector<64x8xbf16>, vector<8x8xbf16>, vector<64x8xf32> -> vector<64x8xf32>
    %123 = arith.addf %116, %122 : vector<64x8xf32>
    %c1_135 = arith.constant 1 : index
    %c1_136 = arith.constant 1 : index
    %c0_137 = arith.constant 0 : index
    %124 = vector.load %arg11[%c1_135, %c1_136, %c0_137] : memref<10x10x8xf32, #tpu.memory_space<vmem>>, vector<8x8x8xf32>
    %125 = vector.shape_cast %124 : vector<8x8x8xf32> to vector<64x8xf32>
    %126 = arith.truncf %125 : vector<64x8xf32> to vector<64x8xbf16>
    %c1_138 = arith.constant 1 : index
    %c1_139 = arith.constant 1 : index
    %c0_140 = arith.constant 0 : index
    %c0_141 = arith.constant 0 : index
    %127 = vector.load %arg7[%c1_138, %c1_139, %c0_140, %c0_141] : memref<3x3x8x8xbf16, #tpu.memory_space<vmem>>, vector<1x1x8x8xbf16>
    %128 = vector.shape_cast %127 : vector<1x1x8x8xbf16> to vector<8x8xbf16>
    %cst_142 = arith.constant dense<0.000000e+00> : vector<64x8xf32>
    %129 = tpu.matmul %126, %128, %cst_142 {dimension_numbers = #tpu.dot_dimension_numbers<[1], [0], [0], [1], [0, 0, 1, 1], [], []>} : vector<64x8xbf16>, vector<8x8xbf16>, vector<64x8xf32> -> vector<64x8xf32>
    %130 = arith.addf %123, %129 : vector<64x8xf32>
    %c1_143 = arith.constant 1 : index
    %c2_144 = arith.constant 2 : index
    %c0_145 = arith.constant 0 : index
    %131 = vector.load %arg11[%c1_143, %c2_144, %c0_145] : memref<10x10x8xf32, #tpu.memory_space<vmem>>, vector<8x8x8xf32>
    %132 = vector.shape_cast %131 : vector<8x8x8xf32> to vector<64x8xf32>
    %133 = arith.truncf %132 : vector<64x8xf32> to vector<64x8xbf16>
    %c1_146 = arith.constant 1 : index
    %c2_147 = arith.constant 2 : index
    %c0_148 = arith.constant 0 : index
    %c0_149 = arith.constant 0 : index
    %134 = vector.load %arg7[%c1_146, %c2_147, %c0_148, %c0_149] : memref<3x3x8x8xbf16, #tpu.memory_space<vmem>>, vector<1x1x8x8xbf16>
    %135 = vector.shape_cast %134 : vector<1x1x8x8xbf16> to vector<8x8xbf16>
    %cst_150 = arith.constant dense<0.000000e+00> : vector<64x8xf32>
    %136 = tpu.matmul %133, %135, %cst_150 {dimension_numbers = #tpu.dot_dimension_numbers<[1], [0], [0], [1], [0, 0, 1, 1], [], []>} : vector<64x8xbf16>, vector<8x8xbf16>, vector<64x8xf32> -> vector<64x8xf32>
    %137 = arith.addf %130, %136 : vector<64x8xf32>
    %c2_151 = arith.constant 2 : index
    %c0_152 = arith.constant 0 : index
    %c0_153 = arith.constant 0 : index
    %138 = vector.load %arg11[%c2_151, %c0_152, %c0_153] : memref<10x10x8xf32, #tpu.memory_space<vmem>>, vector<8x8x8xf32>
    %139 = vector.shape_cast %138 : vector<8x8x8xf32> to vector<64x8xf32>
    %140 = arith.truncf %139 : vector<64x8xf32> to vector<64x8xbf16>
    %c2_154 = arith.constant 2 : index
    %c0_155 = arith.constant 0 : index
    %c0_156 = arith.constant 0 : index
    %c0_157 = arith.constant 0 : index
    %141 = vector.load %arg7[%c2_154, %c0_155, %c0_156, %c0_157] : memref<3x3x8x8xbf16, #tpu.memory_space<vmem>>, vector<1x1x8x8xbf16>
    %142 = vector.shape_cast %141 : vector<1x1x8x8xbf16> to vector<8x8xbf16>
    %cst_158 = arith.constant dense<0.000000e+00> : vector<64x8xf32>
    %143 = tpu.matmul %140, %142, %cst_158 {dimension_numbers = #tpu.dot_dimension_numbers<[1], [0], [0], [1], [0, 0, 1, 1], [], []>} : vector<64x8xbf16>, vector<8x8xbf16>, vector<64x8xf32> -> vector<64x8xf32>
    %144 = arith.addf %137, %143 : vector<64x8xf32>
    %c2_159 = arith.constant 2 : index
    %c1_160 = arith.constant 1 : index
    %c0_161 = arith.constant 0 : index
    %145 = vector.load %arg11[%c2_159, %c1_160, %c0_161] : memref<10x10x8xf32, #tpu.memory_space<vmem>>, vector<8x8x8xf32>
    %146 = vector.shape_cast %145 : vector<8x8x8xf32> to vector<64x8xf32>
    %147 = arith.truncf %146 : vector<64x8xf32> to vector<64x8xbf16>
    %c2_162 = arith.constant 2 : index
    %c1_163 = arith.constant 1 : index
    %c0_164 = arith.constant 0 : index
    %c0_165 = arith.constant 0 : index
    %148 = vector.load %arg7[%c2_162, %c1_163, %c0_164, %c0_165] : memref<3x3x8x8xbf16, #tpu.memory_space<vmem>>, vector<1x1x8x8xbf16>
    %149 = vector.shape_cast %148 : vector<1x1x8x8xbf16> to vector<8x8xbf16>
    %cst_166 = arith.constant dense<0.000000e+00> : vector<64x8xf32>
    %150 = tpu.matmul %147, %149, %cst_166 {dimension_numbers = #tpu.dot_dimension_numbers<[1], [0], [0], [1], [0, 0, 1, 1], [], []>} : vector<64x8xbf16>, vector<8x8xbf16>, vector<64x8xf32> -> vector<64x8xf32>
    %151 = arith.addf %144, %150 : vector<64x8xf32>
    %c2_167 = arith.constant 2 : index
    %c2_168 = arith.constant 2 : index
    %c0_169 = arith.constant 0 : index
    %152 = vector.load %arg11[%c2_167, %c2_168, %c0_169] : memref<10x10x8xf32, #tpu.memory_space<vmem>>, vector<8x8x8xf32>
    %153 = vector.shape_cast %152 : vector<8x8x8xf32> to vector<64x8xf32>
    %154 = arith.truncf %153 : vector<64x8xf32> to vector<64x8xbf16>
    %c2_170 = arith.constant 2 : index
    %c2_171 = arith.constant 2 : index
    %c0_172 = arith.constant 0 : index
    %c0_173 = arith.constant 0 : index
    %155 = vector.load %arg7[%c2_170, %c2_171, %c0_172, %c0_173] : memref<3x3x8x8xbf16, #tpu.memory_space<vmem>>, vector<1x1x8x8xbf16>
    %156 = vector.shape_cast %155 : vector<1x1x8x8xbf16> to vector<8x8xbf16>
    %cst_174 = arith.constant dense<0.000000e+00> : vector<64x8xf32>
    %157 = tpu.matmul %154, %156, %cst_174 {dimension_numbers = #tpu.dot_dimension_numbers<[1], [0], [0], [1], [0, 0, 1, 1], [], []>} : vector<64x8xbf16>, vector<8x8xbf16>, vector<64x8xf32> -> vector<64x8xf32>
    %158 = arith.addf %151, %157 : vector<64x8xf32>
    %159 = vector.shape_cast %158 : vector<64x8xf32> to vector<8x8x8xf32>
    %c0_175 = arith.constant 0 : index
    %c0_176 = arith.constant 0 : index
    %c0_177 = arith.constant 0 : index
    %c0_178 = arith.constant 0 : index
    %160 = vector.load %arg9[%c0_175, %c0_176, %c0_177, %c0_178] : memref<1x8x8x8xf32, #tpu.memory_space<vmem>>, vector<1x8x8x8xf32>
    %161 = vector.shape_cast %160 : vector<1x8x8x8xf32> to vector<8x8x8xf32>
    %162 = vector.shape_cast %159 : vector<8x8x8xf32> to vector<1x8x8x8xf32>
    tpu.vector_store %arg9[%c0_175, %c0_176, %c0_177, %c0_178], %162 {strides = array<i32>} : memref<1x8x8x8xf32, #tpu.memory_space<vmem>>, vector<1x8x8x8xf32>,
    return
  }
  func.func @transform_0(%arg0: i32) -> (i32, i32, i32, i32) {
    %c0_i32 = arith.constant 0 : i32
    %c0_i32_0 = arith.constant 0 : i32
    %c0_i32_1 = arith.constant 0 : i32
    %c0_i32_2 = arith.constant 0 : i32
    return %arg0, %c0_i32, %c0_i32_0, %c0_i32_1 : i32, i32, i32, i32
  }
  func.func @transform_1(%arg0: i32) -> (i32, i32) {
    %c0_i32 = arith.constant 0 : i32
    %c0_i32_0 = arith.constant 0 : i32
    %c0_i32_1 = arith.constant 0 : i32
    return %c0_i32, %c0_i32_0 : i32, i32
  }
  func.func @transform_2(%arg0: i32) -> (i32, i32) {
    %c0_i32 = arith.constant 0 : i32
    %c0_i32_0 = arith.constant 0 : i32
    %c0_i32_1 = arith.constant 0 : i32
    return %c0_i32, %c0_i32_0 : i32, i32
  }
  func.func @transform_3(%arg0: i32) -> (i32, i32, i32, i32) {
    %c0_i32 = arith.constant 0 : i32
    %c0_i32_0 = arith.constant 0 : i32
    %c0_i32_1 = arith.constant 0 : i32
    %c0_i32_2 = arith.constant 0 : i32
    %c0_i32_3 = arith.constant 0 : i32
    return %c0_i32, %c0_i32_0, %c0_i32_1, %c0_i32_2 : i32, i32, i32, i32
  }
  func.func @transform_4(%arg0: i32) -> (i32, i32) {
    %c0_i32 = arith.constant 0 : i32
    %c0_i32_0 = arith.constant 0 : i32
    %c0_i32_1 = arith.constant 0 : i32
    return %c0_i32, %c0_i32_0 : i32, i32
  }
  func.func @transform_5(%arg0: i32) -> (i32, i32) {
    %c0_i32 = arith.constant 0 : i32
    %c0_i32_0 = arith.constant 0 : i32
    %c0_i32_1 = arith.constant 0 : i32
    return %c0_i32, %c0_i32_0 : i32, i32
  }
  func.func @transform_6(%arg0: i32) -> (i32, i32, i32, i32) {
    %c0_i32 = arith.constant 0 : i32
    %c0_i32_0 = arith.constant 0 : i32
    %c0_i32_1 = arith.constant 0 : i32
    %c0_i32_2 = arith.constant 0 : i32
    %c0_i32_3 = arith.constant 0 : i32
    return %c0_i32, %c0_i32_0, %c0_i32_1, %c0_i32_2 : i32, i32, i32, i32
  }
  func.func @transform_7(%arg0: i32) -> (i32, i32) {
    %c0_i32 = arith.constant 0 : i32
    %c0_i32_0 = arith.constant 0 : i32
    %c0_i32_1 = arith.constant 0 : i32
    return %c0_i32, %c0_i32_0 : i32, i32
  }
  func.func @transform_8(%arg0: i32) -> (i32, i32, i32, i32) {
    %c0_i32 = arith.constant 0 : i32
    %c0_i32_0 = arith.constant 0 : i32
    %c0_i32_1 = arith.constant 0 : i32
    %c0_i32_2 = arith.constant 0 : i32
    return %arg0, %c0_i32, %c0_i32_0, %c0_i32_1 : i32, i32, i32, i32
  }
}

</mosaic_0001>

<bundles_post_ra>
// kernel: _lambda_.3
= control target key start
LH: loop header
LB: loop body
LE: loop exit
PB: predicated region body
PF: predicated region fallthrough
CT: control target
= control target key end

     0   :  { %s2895_s24 = smov 0   ;;  %s3289_s0 = inlined_call_operand.vmem [shape: f32[2,8,8,8], index: 0, kind: input, shape index: {}]   ;;  %s3290_s1 = inlined_call_operand.vmem [shape: f32[1,8], index: 1, kind: input, shape index: {}]   ;;  %s3291_s2 = inlined_call_operand.vmem [shape: f32[1,8], index: 2, kind: input, shape index: {}]   ;;  %s3292_s3 = inlined_call_operand.vmem [shape: bf16[3,3,8,8], index: 3, kind: input, shape index: {}]   ;;  %s3293_s4 = inlined_call_operand.vmem [shape: f32[1,8], index: 4, kind: input, shape index: {}]   ;;  %s3294_s5 = inlined_call_operand.vmem [shape: f32[1,8], index: 5, kind: input, shape index: {}]   ;;  %s3295_s6 = inlined_call_operand.vmem [shape: bf16[3,3,8,8], index: 6, kind: input, shape index: {}]   ;;  %s3296_s7 = inlined_call_operand.vmem [shape: f32[2,8,8,8], index: 7, kind: output, shape index: {}]  }
   0x1 LB: > { %s2308_s25 = sadd.s32 4294967295, %s2852_s24   ;;  %p2312_p0 = scmp.ge.s32.totalorder %s2852_s24, 1  ;;  %s2852_s24 = sphi %s2895_s24, %s17_s24  }
   0x2   : > { %p237_p1 = scmp.lt.s32.totalorder %s2852_s24, 3 }
   0x4   : > { %p238_p2 = pnand %p2312_p0, %p237_p1 }
   0x5   : > { %v2319_v0 = vld [vmem:[%s3292_s3 + $0x4] sm:$0xf] (!%p238_p2)  ;;  %vm396_vm0 = vcmask (!%p238_p2), 1043456   ;;  %p269_p3 = scmp.lt.s32.totalorder (!%p238_p2), %s2308_s25, 1  ;;  %vm326_vm1 = vcmask (!%p238_p2), 64512   ;;  %vm328_vm2 = vcmask (!%p238_p2), 58368  }
   0x6   : > { %241 = sbr.rel (%p238_p2) target bundleno = 751 (0x2ef), region = 48  ;;  %2819 = vmatprep.subr.msk.bf16.mxu0 (!%p238_p2), %vm396_vm0, %v2319_v0  ;;  %v398_v1 = vsel (!%p238_p2), %vm396_vm0, %v2319_v0, 0  ;;  %v2854_v2 = vmov (!%p238_p2), 0.0   ;;  %v369_v3 = vld [vmem:[%s3292_s3] sm:$0xf] (!%p238_p2) }
   0x7   : > { %2504 = vmatpush3.bf16.msra.mxu0 (!%p238_p2), %v398_v1  ;;  %327 = vst.msk [vmem:[#allocation2] sm:$0xff] (!%p238_p2), %vm326_vm1, %v2854_v2  ;;  %330 = vst.msk [vmem:[#allocation2 + $0x10] sm:$0xff] (!%p238_p2), %vm326_vm1, %v2854_v2  ;;  %v2317_v4 = vld [vmem:[%s3290_s1] ss:$0 sm:$0xff] (!%p238_p2)  ;;  %v478_v46 = vsel (!%p238_p2), %vm396_vm0, %v369_v3, 0 }
   0x8   : > { %329 = vst.msk [vmem:[#allocation2 + $0x8] sm:$0x3] (!%p238_p2), %vm328_vm2, %v2854_v2  ;;  %331 = vst.msk [vmem:[#allocation2 + $0x18] sm:$0x3] (!%p238_p2), %vm328_vm2, %v2854_v2  ;;  %2820 = vmatprep.subr.msk.bf16.mxu0 (!%p238_p2), %vm396_vm0, %v369_v3  ;;  %v2318_v5 = vld [vmem:[%s3291_s2] ss:$0 sm:$0xff] (!%p238_p2) }
   0x9   : > { %332 = vst.msk [vmem:[#allocation2 + $0x20] sm:$0xff] (!%p238_p2), %vm326_vm1, %v2854_v2  ;;  %334 = vst.msk [vmem:[#allocation2 + $0x30] sm:$0xff] (!%p238_p2), %vm326_vm1, %v2854_v2  ;;  %v2328_v48 = vld [vmem:[%s3292_s3 + $0x8] sm:$0xf] (!%p238_p2)  ;;  %v2333_v62 = vld [vmem:[%s3292_s3 + $0xc] sm:$0xf] (!%p238_p2) }
   0xa   : > { %333 = vst.msk [vmem:[#allocation2 + $0x28] sm:$0x3] (!%p238_p2), %vm328_vm2, %v2854_v2  ;;  %335 = vst.msk [vmem:[#allocation2 + $0x38] sm:$0x3] (!%p238_p2), %vm328_vm2, %v2854_v2  ;;  %v572_v61 = vsel (!%p238_p2), %vm396_vm0, %v2328_v48, 0 }
   0xb   : > { %336 = vst.msk [vmem:[#allocation2 + $0x40] sm:$0xff] (!%p238_p2), %vm326_vm1, %v2854_v2  ;;  %338 = vst.msk [vmem:[#allocation2 + $0x50] sm:$0xff] (!%p238_p2), %vm326_vm1, %v2854_v2 }
   0xc   : > { %337 = vst.msk [vmem:[#allocation2 + $0x48] sm:$0x3] (!%p238_p2), %vm328_vm2, %v2854_v2  ;;  %339 = vst.msk [vmem:[#allocation2 + $0x58] sm:$0x3] (!%p238_p2), %vm328_vm2, %v2854_v2 }
   0xd   : > { %s3298_s25 = smov (!%p269_p3, %s2308_s25), 1  ;;  %340 = vst.msk [vmem:[#allocation2 + $0x60] sm:$0xff] %vm326_vm1, %v2854_v2  ;;  %342 = vst.msk [vmem:[#allocation2 + $0x70] sm:$0xff] %vm326_vm1, %v2854_v2 }
   0xe   : > { %341 = vst.msk [vmem:[#allocation2 + $0x68] sm:$0x3] %vm328_vm2, %v2854_v2  ;;  %343 = vst.msk [vmem:[#allocation2 + $0x78] sm:$0x3] %vm328_vm2, %v2854_v2  ;;  %s2411_s30 = sshll.u32 %s3298_s25, 6  ;;  %v357_v51 = vld [vmem:[#allocation2] sm:$0xff] }
   0xf   : > { %344 = vst.msk [vmem:[#allocation2 + $0x80] sm:$0xff] %vm326_vm1, %v2854_v2  ;;  %346 = vst.msk [vmem:[#allocation2 + $0x90] sm:$0xff] %vm326_vm1, %v2854_v2  ;;  %s273_s12 = scalar_lea.vmem %s3289_s0, %s2411_s30  ;;  %v370_v38 = vld [vmem:[#allocation2 + $0x1] sm:$0xff]  ;;  %s278_s13 = scalar_lea.vmem %s3296_s7, %s2411_s30 }
  0x10   : > { %345 = vst.msk [vmem:[#allocation2 + $0x88] sm:$0x3] %vm328_vm2, %v2854_v2  ;;  %347 = vst.msk [vmem:[#allocation2 + $0x98] sm:$0x3] %vm328_vm2, %v2854_v2  ;;  %v2966_v6 = vld [vmem:[%s273_s12] sm:$0xff]  ;;  %v2968_v7 = vld [vmem:[%s273_s12 + $0x8] sm:$0xff] }
  0x11   : > { %1298 = vst.msk [vmem:[#allocation3] sm:$0xff] %vm326_vm1, %v2854_v2  ;;  %1300 = vst.msk [vmem:[#allocation3 + $0x10] sm:$0xff] %vm326_vm1, %v2854_v2  ;;  %v2970_v8 = vld [vmem:[%s273_s12 + $0x10] sm:$0xff]  ;;  %v295_v9 = vmul.f32 %v2317_v4, %v2966_v6  ;;  %v296_v10 = vmul.f32 %v2317_v4, %v2968_v7  ;;  %v2975_v12 = vld [vmem:[%s273_s12 + $0x18] sm:$0xff] }
  0x12   : > { %1299 = vst.msk [vmem:[#allocation3 + $0x8] sm:$0x3] %vm328_vm2, %v2854_v2  ;;  %1301 = vst.msk [vmem:[#allocation3 + $0x18] sm:$0x3] %vm328_vm2, %v2854_v2  ;;  %v297_v11 = vmul.f32 %v2317_v4, %v2970_v8  ;;  %v2977_v13 = vld [vmem:[%s273_s12 + $0x20] sm:$0xff]  ;;  %v2979_v14 = vld [vmem:[%s273_s12 + $0x28] sm:$0xff]  ;;  %v298_v15 = vmul.f32 %v2317_v4, %v2975_v12 }
  0x13   : > { %1302 = vst.msk [vmem:[#allocation3 + $0x20] sm:$0xff] %vm326_vm1, %v2854_v2  ;;  %1304 = vst.msk [vmem:[#allocation3 + $0x30] sm:$0xff] %vm326_vm1, %v2854_v2  ;;  %v299_v16 = vmul.f32 %v2317_v4, %v2977_v13  ;;  %v2983_v17 = vld [vmem:[%s273_s12 + $0x30] sm:$0xff]  ;;  %v300_v18 = vmul.f32 %v2317_v4, %v2979_v14  ;;  %v2986_v19 = vld [vmem:[%s273_s12 + $0x38] sm:$0xff]  ;;  %v310_v20 = vadd.f32 %v2318_v5, %v295_v9 }
  0x14   : > { %1303 = vst.msk [vmem:[#allocation3 + $0x28] sm:$0x3] %vm328_vm2, %v2854_v2  ;;  %1305 = vst.msk [vmem:[#allocation3 + $0x38] sm:$0x3] %vm328_vm2, %v2854_v2  ;;  %v311_v21 = vadd.f32 %v2318_v5, %v296_v10  ;;  %v312_v22 = vadd.f32 %v2318_v5, %v297_v11  ;;  %v301_v23 = vmul.f32 %v2317_v4, %v2983_v17  ;;  %v545_v1 = vld [vmem:[#allocation2 + $0x2] sm:$0xff] }
  0x15   : > { %1306 = vst.msk [vmem:[#allocation3 + $0x40] sm:$0xff] %vm326_vm1, %v2854_v2  ;;  %1308 = vst.msk [vmem:[#allocation3 + $0x50] sm:$0xff] %vm326_vm1, %v2854_v2  ;;  %v313_v24 = vadd.f32 %v2318_v5, %v298_v15  ;;  %v314_v25 = vadd.f32 %v2318_v5, %v299_v16  ;;  %v315_v26 = vadd.f32 %v2318_v5, %v300_v18  ;;  %v318_v28 = vmax.f32 %v310_v20, 0.0  ;;  %v2338_v20 = vld [vmem:[%s3292_s3 + $0x10] sm:$0xf] }
  0x16   : > { %1307 = vst.msk [vmem:[#allocation3 + $0x48] sm:$0x3] %vm328_vm2, %v2854_v2  ;;  %1309 = vst.msk [vmem:[#allocation3 + $0x58] sm:$0x3] %vm328_vm2, %v2854_v2  ;;  %v302_v27 = vmul.f32 %v2317_v4, %v2986_v19  ;;  %v319_v29 = vmax.f32 %v311_v21, 0.0  ;;  %v320_v30 = vmax.f32 %v312_v22, 0.0  ;;  %v316_v31 = vadd.f32 %v2318_v5, %v301_v23 }
  0x17   : > { %1310 = vst.msk [vmem:[#allocation3 + $0x60] sm:$0xff] %vm326_vm1, %v2854_v2  ;;  %1312 = vst.msk [vmem:[#allocation3 + $0x70] sm:$0xff] %vm326_vm1, %v2854_v2  ;;  %v321_v32 = vmax.f32 %v313_v24, 0.0  ;;  %v322_v33 = vmax.f32 %v314_v25, 0.0  ;;  %v323_v34 = vmax.f32 %v315_v26, 0.0  ;;  %v674_v18 = vsel %vm396_vm0, %v2333_v62, 0 }
  0x18   : > { %1311 = vst.msk [vmem:[#allocation3 + $0x68] sm:$0x3] %vm328_vm2, %v2854_v2  ;;  %1313 = vst.msk [vmem:[#allocation3 + $0x78] sm:$0x3] %vm328_vm2, %v2854_v2  ;;  %v317_v35 = vadd.f32 %v2318_v5, %v302_v27  ;;  %v324_v36 = vmax.f32 %v316_v31, 0.0  ;;  %v776_v27 = vsel %vm396_vm0, %v2338_v20, 0 }
  0x19   : > { %1314 = vst.msk [vmem:[#allocation3 + $0x80] sm:$0xff] %vm326_vm1, %v2854_v2  ;;  %1316 = vst.msk [vmem:[#allocation3 + $0x90] sm:$0xff] %vm326_vm1, %v2854_v2 }
  0x1a   : > { %1315 = vst.msk [vmem:[#allocation3 + $0x88] sm:$0x3] %vm328_vm2, %v2854_v2  ;;  %1317 = vst.msk [vmem:[#allocation3 + $0x98] sm:$0x3] %vm328_vm2, %v2854_v2  ;;  %v325_v37 = vmax.f32 %v317_v35, 0.0 }
  0x1b   : > { %349 = vst.msk [vmem:[#allocation2 + $0x11] sm:$0xff] %vm326_vm1, %v318_v28  ;;  %350 = vst.msk [vmem:[#allocation2 + $0x21] sm:$0xff] %vm326_vm1, %v319_v29  ;;  %v2343_v28 = vld [vmem:[%s3292_s3 + $0x14] sm:$0xf]  ;;  %v2348_v35 = vld [vmem:[%s3292_s3 + $0x18] sm:$0xf] }
  0x1c   : > { %351 = vst.msk [vmem:[#allocation2 + $0x31] sm:$0xff] %vm326_vm1, %v320_v30  ;;  %352 = vst.msk [vmem:[#allocation2 + $0x41] sm:$0xff] %vm326_vm1, %v321_v32 }
  0x1d   : > { %353 = vst.msk [vmem:[#allocation2 + $0x51] sm:$0xff] %vm326_vm1, %v322_v33  ;;  %354 = vst.msk [vmem:[#allocation2 + $0x61] sm:$0xff] %vm326_vm1, %v323_v34  ;;  %v878_v34 = vsel %vm396_vm0, %v2343_v28, 0 }
  0x1e   : > { %355 = vst.msk [vmem:[#allocation2 + $0x71] sm:$0xff] %vm326_vm1, %v324_v36  ;;  %356 = vst.msk [vmem:[#allocation2 + $0x81] sm:$0xff] %vm326_vm1, %v325_v37 }
  0x22   : > { %v2998_v39 = vld [vmem:[#allocation2 + $0x11] sm:$0xff]  ;;  %v3000_v40 = vld [vmem:[#allocation2 + $0x21] sm:$0xff] }
  0x23   : > { %v3002_v41 = vld [vmem:[#allocation2 + $0x31] sm:$0xff]  ;;  %v378_v42 = vpack.c.bf16 %v2998_v39, %v370_v38  ;;  %v3009_v44 = vld [vmem:[#allocation2 + $0x41] sm:$0xff]  ;;  %v757_v31 = vpack.c.bf16 %v3000_v40, %v2998_v39 }
  0x24   : > { %v3007_v43 = vpack.c.bf16 %v3002_v41, %v3000_v40  ;;  %v3011_v45 = vld [vmem:[#allocation2 + $0x51] sm:$0xff]  ;;  %v3026_v49 = vld [vmem:[#allocation2 + $0x61] sm:$0xff]  ;;  %v758_v32 = vpack.c.bf16 %v3009_v44, %v3002_v41  ;;  %v981_v41 = vsel %vm396_vm0, %v2348_v35, 0 }
  0x25   : > { %v3016_v47 = vpack.c.bf16 %v3011_v45, %v3009_v44  ;;  %2505 = vmatprep.mubr.msk.bf16.mxu0 %vm326_vm1, %v378_v42  ;;  %v3028_v50 = vld [vmem:[#allocation2 + $0x71] sm:$0xff]  ;;  %v359_v55 = vld [vmem:[#allocation2 + $0x20] sm:$0xff]  ;;  %v759_v33 = vpack.c.bf16 %v3026_v49, %v3011_v45  ;;  %v2353_v42 = vld [vmem:[%s3292_s3 + $0x1c] sm:$0xf] }
  0x26   : > { %2506 = vmatmul.mubr.msk.bf16.vlgmr.msra.gmra.mrb[0].mxu0 %vm326_vm1, %v3007_v43  ;;  %v358_v52 = vld [vmem:[#allocation2 + $0x10] sm:$0xff]  ;;  %v3033_v53 = vpack.c.bf16 %v3028_v50, %v3026_v49  ;;  %v361_v57 = vld [vmem:[#allocation2 + $0x40] sm:$0xff] }
  0x27   : > { %2514 = vmatpush3.bf16.msra.mxu0 %v478_v46  ;;  %2509 = vmatprep.mubr.msk.bf16.mxu0 %vm326_vm1, %v3016_v47  ;;  %v365_v54 = vpack.c.bf16 %v358_v52, %v357_v51  ;;  %v360_v56 = vld [vmem:[#allocation2 + $0x30] sm:$0xff]  ;;  %v363_v63 = vld [vmem:[#allocation2 + $0x60] sm:$0xff]  ;;  %v655_v24 = vpack.c.bf16 %v359_v55, %v358_v52  ;;  %v1083_v46 = vsel %vm396_vm0, %v2353_v42, 0 }
  0x28   : > { %2821 = vmatprep.subr.msk.bf16.mxu0 %vm396_vm0, %v2328_v48  ;;  %v362_v58 = vld [vmem:[#allocation2 + $0x50] sm:$0xff]  ;;  %v3038_v59 = vpack.c.bf16 %v360_v56, %v359_v55  ;;  %v547_v5 = vld [vmem:[#allocation2 + $0x22] sm:$0xff]  ;;  %v656_v25 = vpack.c.bf16 %v361_v57, %v360_v56 }
  0x29   : > { %v3040_v60 = vpack.c.bf16 %v362_v58, %v361_v57  ;;  %v364_v0 = vld [vmem:[#allocation2 + $0x70] sm:$0xff]  ;;  %v549_v10 = vld [vmem:[#allocation2 + $0x42] sm:$0xff]  ;;  %v657_v26 = vpack.c.bf16 %v363_v63, %v362_v58  ;;  %v2363_v57 = vld [vmem:[%s3293_s4] ss:$0 sm:$0xff] }
  0x2a   : > { %v546_v2 = vld [vmem:[#allocation2 + $0x12] sm:$0xff]  ;;  %v3051_v3 = vpack.c.bf16 %v364_v0, %v363_v63  ;;  %v551_v21 = vld [vmem:[#allocation2 + $0x62] sm:$0xff] }
  0x2b   : > { %v553_v4 = vpack.c.bf16 %v546_v2, %v545_v1  ;;  %v548_v9 = vld [vmem:[#allocation2 + $0x32] sm:$0xff]  ;;  %v654_v29 = vld [vmem:[#allocation2 + $0x80] sm:$0xff]  ;;  %v859_v38 = vpack.c.bf16 %v547_v5, %v546_v2 }
  0x2c   : > { %v550_v11 = vld [vmem:[#allocation2 + $0x52] sm:$0xff]  ;;  %v3056_v15 = vpack.c.bf16 %v548_v9, %v547_v5  ;;  %v658_v30 = vpack.c.bf16 %v654_v29, %v364_v0  ;;  %v756_v36 = vld [vmem:[#allocation2 + $0x81] sm:$0xff]  ;;  %v860_v39 = vpack.c.bf16 %v549_v10, %v548_v9 }
  0x2d   : > { %v3058_v16 = vpack.c.bf16 %v550_v11, %v549_v10  ;;  %v552_v22 = vld [vmem:[#allocation2 + $0x72] sm:$0xff]  ;;  %v760_v37 = vpack.c.bf16 %v756_v36, %v3028_v50  ;;  %v861_v40 = vpack.c.bf16 %v551_v21, %v550_v11  ;;  %v858_v44 = vld [vmem:[#allocation2 + $0x82] sm:$0xff] }
  0x2e   : > { %2510 = vmatmul.mubr.msk.bf16.gmra.mrb[4].mxu0 %vm326_vm1, %v3033_v53  ;;  %v556_v23 = vpack.c.bf16 %v552_v22, %v551_v21  ;;  %v862_v45 = vpack.c.bf16 %v858_v44, %v552_v22  ;;  %v2358_v48 = vld [vmem:[%s3292_s3 + $0x20] sm:$0xf]  ;;  %v961_v49 = vld [vmem:[#allocation2 + $0x90] sm:$0xff]  ;;  %v2369_v56 = vld [vmem:[%s3295_s6 + $0x4] sm:$0xf] }
  0x2f   : > { %2515 = vmatprep.mubr.msk.bf16.mxu0 %vm326_vm1, %v365_v54  ;;  %v965_v50 = vpack.c.bf16 %v961_v49, %v654_v29  ;;  %v1185_v51 = vsel %vm396_vm0, %v2358_v48, 0  ;;  %v1063_v52 = vld [vmem:[#allocation2 + $0x91] sm:$0xff] }
  0x30   : > { %v1067_v54 = vpack.c.bf16 %v1063_v52, %v756_v36 }
  0x36   : > { %2516 = vmatmul.mubr.msk.bf16.vlgmr.msra.gmra.mrb[0].mxu0 %vm326_vm1, %v3038_v59 }
  0x37   : > { %2524 = vmatpush3.bf16.msra.mxu0 %v572_v61  ;;  %2519 = vmatprep.mubr.msk.bf16.mxu0 %vm326_vm1, %v3040_v60 }
  0x38   : > { %2822 = vmatprep.subr.msk.bf16.mxu0 %vm396_vm0, %v2333_v62 }
  0x3e   : > { %2520 = vmatmul.mubr.msk.bf16.gmra.mrb[4].mxu0 %vm326_vm1, %v3051_v3 }
  0x3f   : > { %2525 = vmatprep.mubr.msk.bf16.mxu0 %vm326_vm1, %v553_v4 }
  0x46   : > { %2526 = vmatmul.mubr.msk.bf16.vlgmr.msra.gmra.mrb[0].mxu0 %vm326_vm1, %v3056_v15 }
  0x47   : > { %2534 = vmatpush3.bf16.msra.mxu0 %v674_v18  ;;  %2529 = vmatprep.mubr.msk.bf16.mxu0 %vm326_vm1, %v3058_v16 }
  0x48   : > { %2823 = vmatprep.subr.msk.bf16.mxu0 %vm396_vm0, %v2338_v20 }
  0x4e   : > { %2530 = vmatmul.mubr.msk.bf16.gmra.mrb[4].mxu0 %vm326_vm1, %v556_v23 }
  0x4f   : > { %2535 = vmatprep.mubr.msk.bf16.mxu0 %vm326_vm1, %v655_v24 }
  0x56   : > { %2536 = vmatmul.mubr.msk.bf16.vlgmr.msra.gmra.mrb[0].mxu0 %vm326_vm1, %v656_v25 }
  0x57   : > { %2544 = vmatpush3.bf16.msra.mxu0 %v776_v27  ;;  %2539 = vmatprep.mubr.msk.bf16.mxu0 %vm326_vm1, %v657_v26 }
  0x58   : > { %2824 = vmatprep.subr.msk.bf16.mxu0 %vm396_vm0, %v2343_v28 }
  0x5e   : > { %2540 = vmatmul.mubr.msk.bf16.gmra.mrb[4].mxu0 %vm326_vm1, %v658_v30 }
  0x5f   : > { %2545 = vmatprep.mubr.msk.bf16.mxu0 %vm326_vm1, %v757_v31  ;;  %v1327_v31 = vld [vmem:[#allocation3] sm:$0xff] }
  0x66   : > { %2546 = vmatmul.mubr.msk.bf16.vlgmr.msra.gmra.mrb[0].mxu0 %vm326_vm1, %v758_v32 }
  0x67   : > { %2554 = vmatpush3.bf16.msra.mxu0 %v878_v34  ;;  %2549 = vmatprep.mubr.msk.bf16.mxu0 %vm326_vm1, %v759_v33 }
  0x68   : > { %2825 = vmatprep.subr.msk.bf16.mxu0 %vm396_vm0, %v2348_v35 }
  0x6e   : > { %2550 = vmatmul.mubr.msk.bf16.gmra.mrb[4].mxu0 %vm326_vm1, %v760_v37 }
  0x6f   : > { %2555 = vmatprep.mubr.msk.bf16.mxu0 %vm326_vm1, %v859_v38 }
  0x76   : > { %2556 = vmatmul.mubr.msk.bf16.vlgmr.msra.gmra.mrb[0].mxu0 %vm326_vm1, %v860_v39 }
  0x77   : > { %2564 = vmatpush3.bf16.msra.mxu0 %v981_v41  ;;  %2559 = vmatprep.mubr.msk.bf16.mxu0 %vm326_vm1, %v861_v40  ;;  %v1455_v41 = vsel %vm396_vm0, %v2369_v56, 0 }
  0x78   : > { %2826 = vmatprep.subr.msk.bf16.mxu0 %vm396_vm0, %v2353_v42  ;;  %v2374_v42 = vld [vmem:[%s3295_s6 + $0x8] sm:$0xf] }
  0x7e   : > { %2560 = vmatmul.mubr.msk.bf16.gmra.mrb[4].mxu0 %vm326_vm1, %v862_v45 }
  0x7f   : > { %2565 = vmatprep.mubr.msk.bf16.mxu0 %vm326_vm1, %v3038_v59  ;;  %v2364_v59 = vld [vmem:[%s3294_s5] ss:$0 sm:$0xff] }
  0x86   : > { %2566 = vmatmul.mubr.msk.bf16.vlgmr.msra.gmra.mrb[0].mxu0 %vm326_vm1, %v3040_v60 }
  0x87   : > { %2574 = vmatpush3.bf16.msra.mxu0 %v1083_v46  ;;  %2569 = vmatprep.mubr.msk.bf16.mxu0 %vm326_vm1, %v3051_v3 }
  0x88   : > { %2827 = vmatprep.subr.msk.bf16.mxu0 %vm396_vm0, %v2358_v48  ;;  %v1428_v48 = vld [vmem:[#allocation3 + $0x1] sm:$0xff] }
  0x8e   : > { %2570 = vmatmul.mubr.msk.bf16.gmra.mrb[4].mxu0 %vm326_vm1, %v965_v50 }
  0x8f   : > { %2575 = vmatprep.mubr.msk.bf16.mxu0 %vm326_vm1, %v3007_v43  ;;  %v1165_v43 = vld [vmem:[#allocation2 + $0x92] sm:$0xff] }
  0x90   : > { %v1169_v55 = vpack.c.bf16 %v1165_v43, %v858_v44 }
  0x96   : > { %2576 = vmatmul.mubr.msk.bf16.vlgmr.msra.gmra.mrb[0].mxu0 %vm326_vm1, %v3016_v47  ;;  %v1339_v47 = vld [vmem:[%s3295_s6] sm:$0xf] }
  0x97   : > { %2584 = vmatpush3.bf16.msra.mxu0 %v1185_v51  ;;  %2579 = vmatprep.mubr.msk.bf16.mxu0 %vm326_vm1, %v3033_v53  ;;  %v1353_v53 = vsel %vm396_vm0, %v1339_v47, 0 }
  0x98   : > { %2828 = vmatprep.subr.msk.bf16.mxu1 %vm396_vm0, %v1339_v47 }
  0x99   : > { %2594 = vmatpush3.bf16.msra.mxu1 %v1353_v53 }
  0x9a   : > { %2829 = vmatprep.subr.msk.bf16.mxu1 %vm396_vm0, %v2369_v56  ;;  %v1557_v56 = vsel %vm396_vm0, %v2374_v42, 0 }
  0x9e   : > { %2580 = vmatmul.mubr.msk.bf16.gmra.mrb[4].mxu0 %vm326_vm1, %v1067_v54 }
  0x9f   : > { %2585 = vmatprep.mubr.msk.bf16.mxu0 %vm326_vm1, %v3056_v15 }
  0xa6   : > { %2586 = vmatmul.mubr.msk.bf16.vlgmr.msra.gmra.mrb[0].mxu0 %vm326_vm1, %v3058_v16 }
  0xa7   : > { %2589 = vmatprep.mubr.msk.bf16.mxu0 %vm326_vm1, %v556_v23 }
  0xae   : > { %2590 = vmatmul.mubr.msk.bf16.gmra.mrb[4].mxu0 %vm326_vm1, %v1169_v55 }
 0x179   : > { %v2587_v58 = vpop.f32.mrb[0].mxu0 }
 0x17a   : > { %v1269_v60 = vmul.f32 %v2587_v58, %v2363_v57  ;;  %v1221_v61 = vpop.f32.mrb[1].mxu0 }
 0x17b   : > { %v1267_v62 = vmul.f32 %v2363_v57, %v1221_v61  ;;  %v2588_v63 = vpop.f32.mrb[2].mxu0  ;;  %v1530_v61 = vld [vmem:[#allocation3 + $0x2] sm:$0xff] }
 0x17c   : > { %v1284_v0 = vadd.f32 %v2364_v59, %v1269_v60  ;;  %v1270_v1 = vmul.f32 %v2588_v63, %v2363_v57  ;;  %v1224_v2 = vpop.f32.mrb[3].mxu0 }
 0x17d   : > { %v1282_v3 = vadd.f32 %v2364_v59, %v1267_v62  ;;  %v1268_v4 = vmul.f32 %v2363_v57, %v1224_v2 }
 0x17e   : > { %v1292_v5 = vmax.f32 %v1284_v0, 0.0  ;;  %v1285_v9 = vadd.f32 %v2364_v59, %v1270_v1 }
 0x17f   : > { %v1290_v10 = vmax.f32 %v1282_v3, 0.0  ;;  %v1283_v11 = vadd.f32 %v2364_v59, %v1268_v4 }
 0x180   : > { %1321 = vst.msk [vmem:[#allocation3 + $0x31] sm:$0xff] %vm326_vm1, %v1292_v5  ;;  %v1293_v15 = vmax.f32 %v1285_v9, 0.0 }
 0x181   : > { %1319 = vst.msk [vmem:[#allocation3 + $0x11] sm:$0xff] %vm326_vm1, %v1290_v10  ;;  %v1291_v16 = vmax.f32 %v1283_v11, 0.0  ;;  %v2591_v18 = vpop.f32.mrb[4].mxu0 }
 0x182   : > { %1322 = vst.msk [vmem:[#allocation3 + $0x41] sm:$0xff] %vm326_vm1, %v1293_v15  ;;  %v1273_v20 = vmul.f32 %v2591_v18, %v2363_v57  ;;  %v1237_v21 = vpop.f32.mrb[5].mxu0  ;;  %v2384_v15 = vld [vmem:[%s3295_s6 + $0x10] sm:$0xf] }
 0x183   : > { %1320 = vst.msk [vmem:[#allocation3 + $0x21] sm:$0xff] %vm326_vm1, %v1291_v16  ;;  %v1271_v22 = vmul.f32 %v2363_v57, %v1237_v21  ;;  %v2592_v23 = vpop.f32.mrb[6].mxu0 }
 0x184   : > { %v1288_v24 = vadd.f32 %v2364_v59, %v1273_v20  ;;  %v1274_v25 = vmul.f32 %v2592_v23, %v2363_v57  ;;  %v1240_v26 = vpop.f32.mrb[7].mxu0  ;;  %v1761_v23 = vsel %vm396_vm0, %v2384_v15, 0 }
 0x185   : > { %v1286_v27 = vadd.f32 %v2364_v59, %v1271_v22  ;;  %v1272_v28 = vmul.f32 %v2363_v57, %v1240_v26 }
 0x186   : > { %v1296_v29 = vmax.f32 %v1288_v24, 0.0  ;;  %v1289_v30 = vadd.f32 %v2364_v59, %v1274_v25  ;;  %v2389_v25 = vld [vmem:[%s3295_s6 + $0x14] sm:$0xf] }
 0x187   : > { %v1294_v32 = vmax.f32 %v1286_v27, 0.0  ;;  %v1287_v33 = vadd.f32 %v2364_v59, %v1272_v28  ;;  %v3155_v39 = vld [vmem:[#allocation3 + $0x30] sm:$0xff]  ;;  %v2379_v59 = vld [vmem:[%s3295_s6 + $0xc] sm:$0xf] }
 0x188   : > { %1325 = vst.msk [vmem:[#allocation3 + $0x71] sm:$0xff] %vm326_vm1, %v1296_v29  ;;  %v1297_v34 = vmax.f32 %v1289_v30, 0.0  ;;  %v3150_v35 = vld [vmem:[#allocation3 + $0x10] sm:$0xff]  ;;  %v1659_v9 = vsel %vm396_vm0, %v2379_v59, 0  ;;  %v1863_v30 = vsel %vm396_vm0, %v2389_v25, 0 }
 0x189   : > { %1323 = vst.msk [vmem:[#allocation3 + $0x51] sm:$0xff] %vm326_vm1, %v1294_v32  ;;  %v1295_v36 = vmax.f32 %v1287_v33, 0.0  ;;  %v1335_v37 = vpack.c.bf16 %v3150_v35, %v1327_v31  ;;  %v1331_v44 = vld [vmem:[#allocation3 + $0x40] sm:$0xff]  ;;  %v1429_v49 = vld [vmem:[#allocation3 + $0x11] sm:$0xff] }
 0x18a   : > { %1326 = vst.msk [vmem:[#allocation3 + $0x81] sm:$0xff] %vm326_vm1, %v1297_v34  ;;  %v1329_v38 = vld [vmem:[#allocation3 + $0x20] sm:$0xff]  ;;  %v1436_v54 = vpack.c.bf16 %v1429_v49, %v1428_v48  ;;  %v1431_v47 = vld [vmem:[#allocation3 + $0x31] sm:$0xff]  ;;  %v1641_v22 = vpack.c.bf16 %v1331_v44, %v3155_v39 }
 0x18b   : > { %1324 = vst.msk [vmem:[#allocation3 + $0x61] sm:$0xff] %vm326_vm1, %v1295_v36  ;;  %2595 = vmatprep.mubr.msk.bf16.mxu1 %vm326_vm1, %v1335_v37  ;;  %v3160_v40 = vpack.c.bf16 %v3155_v39, %v1329_v38  ;;  %v1430_v43 = vld [vmem:[#allocation3 + $0x21] sm:$0xff]  ;;  %v1531_v62 = vld [vmem:[#allocation3 + $0x12] sm:$0xff]  ;;  %v1640_v21 = vpack.c.bf16 %v1329_v38, %v3150_v35  ;;  %v2399_v39 = vld [vmem:[%s3295_s6 + $0x1c] sm:$0xf] }
 0x18c   : > { %v3178_v53 = vpack.c.bf16 %v1431_v47, %v1430_v43  ;;  %v1432_v57 = vld [vmem:[#allocation3 + $0x41] sm:$0xff]  ;;  %v1538_v1 = vpack.c.bf16 %v1531_v62, %v1530_v61  ;;  %v1533_v4 = vld [vmem:[#allocation3 + $0x32] sm:$0xff]  ;;  %v1742_v28 = vpack.c.bf16 %v1430_v43, %v1429_v49 }
 0x18d   : > { %2596 = vmatmul.mubr.msk.bf16.vlgmr.msra.gmra.mrb[0].mxu1 %vm326_vm1, %v3160_v40  ;;  %v1532_v2 = vld [vmem:[#allocation3 + $0x22] sm:$0xff]  ;;  %v1743_v29 = vpack.c.bf16 %v1432_v57, %v1431_v47  ;;  %v2394_v32 = vld [vmem:[%s3295_s6 + $0x18] sm:$0xf]  ;;  %v1946_v48 = vld [vmem:[#allocation3 + $0x90] sm:$0xff] }
 0x18e   : > { %2604 = vmatpush3.bf16.msra.mxu1 %v1455_v41  ;;  %v3196_v5 = vpack.c.bf16 %v1533_v4, %v1532_v2  ;;  %v1534_v10 = vld [vmem:[#allocation3 + $0x42] sm:$0xff]  ;;  %v1844_v35 = vpack.c.bf16 %v1532_v2, %v1531_v62  ;;  %v1966_v37 = vsel %vm396_vm0, %v2394_v32, 0 }
 0x18f   : > { %2830 = vmatprep.subr.msk.bf16.mxu1 %vm396_vm0, %v2374_v42  ;;  %v1334_v51 = vld [vmem:[#allocation3 + $0x70] sm:$0xff]  ;;  %v1845_v36 = vpack.c.bf16 %v1534_v10, %v1533_v4 }
 0x190   : > { %v1332_v45 = vld [vmem:[#allocation3 + $0x50] sm:$0xff] }
 0x191   : > { %v3169_v46 = vpack.c.bf16 %v1332_v45, %v1331_v44  ;;  %v1433_v55 = vld [vmem:[#allocation3 + $0x51] sm:$0xff]  ;;  %v1639_v26 = vld [vmem:[#allocation3 + $0x80] sm:$0xff]  ;;  %v2068_v44 = vsel %vm396_vm0, %v2399_v39, 0 }
 0x192   : > { %v1333_v50 = vld [vmem:[#allocation3 + $0x60] sm:$0xff]  ;;  %v3181_v58 = vpack.c.bf16 %v1433_v55, %v1432_v57  ;;  %v1435_v63 = vld [vmem:[#allocation3 + $0x71] sm:$0xff]  ;;  %v1643_v27 = vpack.c.bf16 %v1639_v26, %v1334_v51  ;;  %v1950_v49 = vpack.c.bf16 %v1946_v48, %v1639_v26 }
 0x193   : > { %2599 = vmatprep.mubr.msk.bf16.mxu1 %vm326_vm1, %v3169_v46  ;;  %v3173_v52 = vpack.c.bf16 %v1334_v51, %v1333_v50  ;;  %v1434_v60 = vld [vmem:[#allocation3 + $0x61] sm:$0xff]  ;;  %v1535_v3 = vld [vmem:[#allocation3 + $0x52] sm:$0xff]  ;;  %v1642_v24 = vpack.c.bf16 %v1333_v50, %v1332_v45 }
 0x194   : > { %v3191_v0 = vpack.c.bf16 %v1435_v63, %v1434_v60  ;;  %v3199_v11 = vpack.c.bf16 %v1535_v3, %v1534_v10  ;;  %v1536_v16 = vld [vmem:[#allocation3 + $0x62] sm:$0xff]  ;;  %v1537_v18 = vld [vmem:[#allocation3 + $0x72] sm:$0xff]  ;;  %v1744_v31 = vpack.c.bf16 %v1434_v60, %v1433_v55 }
 0x195   : > { %2600 = vmatmul.mubr.msk.bf16.gmra.mrb[4].mxu1 %vm326_vm1, %v3173_v52  ;;  %v1541_v20 = vpack.c.bf16 %v1537_v18, %v1536_v16  ;;  %v1741_v33 = vld [vmem:[#allocation3 + $0x81] sm:$0xff]  ;;  %v1846_v38 = vpack.c.bf16 %v1536_v16, %v1535_v3  ;;  %v2150_v51 = vld [vmem:[#allocation3 + $0x92] sm:$0xff] }
 0x196   : > { %2605 = vmatprep.mubr.msk.bf16.mxu1 %vm326_vm1, %v1436_v54  ;;  %v1745_v34 = vpack.c.bf16 %v1741_v33, %v1435_v63  ;;  %v1843_v41 = vld [vmem:[#allocation3 + $0x82] sm:$0xff] }
 0x197   : > { %v1847_v42 = vpack.c.bf16 %v1843_v41, %v1537_v18  ;;  %v2404_v45 = vld [vmem:[%s3295_s6 + $0x20] sm:$0xf] }
 0x19d   : > { %2606 = vmatmul.mubr.msk.bf16.vlgmr.msra.gmra.mrb[0].mxu1 %vm326_vm1, %v3178_v53 }
 0x19e   : > { %2614 = vmatpush3.bf16.msra.mxu1 %v1557_v56  ;;  %2609 = vmatprep.mubr.msk.bf16.mxu1 %vm326_vm1, %v3181_v58 }
 0x19f   : > { %2831 = vmatprep.subr.msk.bf16.mxu1 %vm396_vm0, %v2379_v59 }
 0x1a5   : > { %2610 = vmatmul.mubr.msk.bf16.gmra.mrb[4].mxu1 %vm326_vm1, %v3191_v0 }
 0x1a6   : > { %2615 = vmatprep.mubr.msk.bf16.mxu1 %vm326_vm1, %v1538_v1 }
 0x1ad   : > { %2616 = vmatmul.mubr.msk.bf16.vlgmr.msra.gmra.mrb[0].mxu1 %vm326_vm1, %v3196_v5 }
 0x1ae   : > { %2624 = vmatpush3.bf16.msra.mxu1 %v1659_v9  ;;  %2619 = vmatprep.mubr.msk.bf16.mxu1 %vm326_vm1, %v3199_v11 }
 0x1af   : > { %2832 = vmatprep.subr.msk.bf16.mxu1 %vm396_vm0, %v2384_v15 }
 0x1b5   : > { %2620 = vmatmul.mubr.msk.bf16.gmra.mrb[4].mxu1 %vm326_vm1, %v1541_v20 }
 0x1b6   : > { %2625 = vmatprep.mubr.msk.bf16.mxu1 %vm326_vm1, %v1640_v21 }
 0x1bd   : > { %2626 = vmatmul.mubr.msk.bf16.vlgmr.msra.gmra.mrb[0].mxu1 %vm326_vm1, %v1641_v22 }
 0x1be   : > { %2634 = vmatpush3.bf16.msra.mxu1 %v1761_v23  ;;  %2629 = vmatprep.mubr.msk.bf16.mxu1 %vm326_vm1, %v1642_v24 }
 0x1bf   : > { %2833 = vmatprep.subr.msk.bf16.mxu1 %vm396_vm0, %v2389_v25 }
 0x1c5   : > { %2630 = vmatmul.mubr.msk.bf16.gmra.mrb[4].mxu1 %vm326_vm1, %v1643_v27 }
 0x1c6   : > { %2635 = vmatprep.mubr.msk.bf16.mxu1 %vm326_vm1, %v1742_v28 }
 0x1cd   : > { %2636 = vmatmul.mubr.msk.bf16.vlgmr.msra.gmra.mrb[0].mxu1 %vm326_vm1, %v1743_v29 }
 0x1ce   : > { %2644 = vmatpush3.bf16.msra.mxu1 %v1863_v30  ;;  %2639 = vmatprep.mubr.msk.bf16.mxu1 %vm326_vm1, %v1744_v31 }
 0x1cf   : > { %2834 = vmatprep.subr.msk.bf16.mxu1 %vm396_vm0, %v2394_v32 }
 0x1d5   : > { %2640 = vmatmul.mubr.msk.bf16.gmra.mrb[4].mxu1 %vm326_vm1, %v1745_v34 }
 0x1d6   : > { %2645 = vmatprep.mubr.msk.bf16.mxu1 %vm326_vm1, %v1844_v35 }
 0x1dd   : > { %2646 = vmatmul.mubr.msk.bf16.vlgmr.msra.gmra.mrb[0].mxu1 %vm326_vm1, %v1845_v36 }
 0x1de   : > { %2654 = vmatpush3.bf16.msra.mxu1 %v1966_v37  ;;  %2649 = vmatprep.mubr.msk.bf16.mxu1 %vm326_vm1, %v1846_v38 }
 0x1df   : > { %2835 = vmatprep.subr.msk.bf16.mxu1 %vm396_vm0, %v2399_v39 }
 0x1e5   : > { %2650 = vmatmul.mubr.msk.bf16.gmra.mrb[4].mxu1 %vm326_vm1, %v1847_v42 }
 0x1e6   : > { %2655 = vmatprep.mubr.msk.bf16.mxu1 %vm326_vm1, %v3160_v40  ;;  %v2170_v40 = vsel %vm396_vm0, %v2404_v45, 0 }
 0x1ed   : > { %2656 = vmatmul.mubr.msk.bf16.vlgmr.msra.gmra.mrb[0].mxu1 %vm326_vm1, %v3169_v46  ;;  %v2048_v46 = vld [vmem:[#allocation3 + $0x91] sm:$0xff] }
 0x1ee   : > { %2664 = vmatpush3.bf16.msra.mxu1 %v2068_v44  ;;  %2659 = vmatprep.mubr.msk.bf16.mxu1 %vm326_vm1, %v3173_v52  ;;  %v2052_v50 = vpack.c.bf16 %v2048_v46, %v1741_v33  ;;  %v2154_v52 = vpack.c.bf16 %v2150_v51, %v1843_v41 }
 0x1ef   : > { %2836 = vmatprep.subr.msk.bf16.mxu1 %vm396_vm0, %v2404_v45 }
 0x1f5   : > { %2660 = vmatmul.mubr.msk.bf16.gmra.mrb[4].mxu1 %vm326_vm1, %v1950_v49 }
 0x1f6   : > { %2665 = vmatprep.mubr.msk.bf16.mxu1 %vm326_vm1, %v3178_v53 }
 0x1fd   : > { %2666 = vmatmul.mubr.msk.bf16.vlgmr.msra.gmra.mrb[0].mxu1 %vm326_vm1, %v3181_v58 }
 0x1fe   : > { %2674 = vmatpush3.bf16.msra.mxu1 %v2170_v40  ;;  %2669 = vmatprep.mubr.msk.bf16.mxu1 %vm326_vm1, %v3191_v0 }
 0x205   : > { %2670 = vmatmul.mubr.msk.bf16.gmra.mrb[4].mxu1 %vm326_vm1, %v2052_v50 }
 0x206   : > { %2675 = vmatprep.mubr.msk.bf16.mxu1 %vm326_vm1, %v3196_v5 }
 0x20d   : > { %2676 = vmatmul.mubr.msk.bf16.vlgmr.msra.gmra.mrb[0].mxu1 %vm326_vm1, %v3199_v11 }
 0x20e   : > { %2679 = vmatprep.mubr.msk.bf16.mxu1 %vm326_vm1, %v1541_v20 }
 0x215   : > { %2680 = vmatmul.mubr.msk.bf16.gmra.mrb[4].mxu1 %vm326_vm1, %v2154_v52 }
 0x2e0   : > { %v2677_v54 = vpop.f32.mrb[0].mxu1 }
 0x2e1   : > { %v2683_v43 = vadd.f32 %v2677_v54, %v2970_v8  ;;  %v2206_v55 = vpop.f32.mrb[1].mxu1 }
 0x2e2   : > { %v2684_v47 = vadd.f32 %v2206_v55, %v2966_v6  ;;  %v2678_v53 = vpop.f32.mrb[2].mxu1 }
 0x2e3   : > { %2247 = vst.msk [vmem:[%s278_s13 + $0x10] sm:$0xff] %vm326_vm1, %v2683_v43  ;;  %v2685_v56 = vadd.f32 %v2678_v53, %v2975_v12  ;;  %v2209_v57 = vpop.f32.mrb[3].mxu1 }
 0x2e4   : > { %2245 = vst.msk [vmem:[%s278_s13] sm:$0xff] %vm326_vm1, %v2684_v47  ;;  %v2686_v58 = vadd.f32 %v2209_v57, %v2968_v7 }
 0x2e5   : > { %2248 = vst.msk [vmem:[%s278_s13 + $0x18] sm:$0xff] %vm326_vm1, %v2685_v56 }
 0x2e6   : > { %2246 = vst.msk [vmem:[%s278_s13 + $0x8] sm:$0xff] %vm326_vm1, %v2686_v58 }
 0x2e8   : > { %v2681_v59 = vpop.f32.mrb[4].mxu1 }
 0x2e9   : > { %v2687_v8 = vadd.f32 %v2681_v59, %v2983_v17  ;;  %v2222_v60 = vpop.f32.mrb[5].mxu1 }
 0x2ea   : > { %v2688_v6 = vadd.f32 %v2222_v60, %v2977_v13  ;;  %v2682_v61 = vpop.f32.mrb[6].mxu1 }
 0x2eb   : > { %2251 = vst.msk [vmem:[%s278_s13 + $0x30] sm:$0xff] %vm326_vm1, %v2687_v8  ;;  %v2689_v12 = vadd.f32 %v2682_v61, %v2986_v19  ;;  %v2225_v62 = vpop.f32.mrb[7].mxu1 }
 0x2ec   : > { %2249 = vst.msk [vmem:[%s278_s13 + $0x20] sm:$0xff] %vm326_vm1, %v2688_v6  ;;  %v2690_v7 = vadd.f32 %v2225_v62, %v2979_v14 }
 0x2ed   : > { %2252 = vst.msk [vmem:[%s278_s13 + $0x38] sm:$0xff] %vm326_vm1, %v2689_v12 }
 0x2ee   : > { %2250 = vst.msk [vmem:[%s278_s13 + $0x28] sm:$0xff] %vm326_vm1, %v2690_v7 }
 0x2ef PF: > { %s17_s24 = sadd.s32 1, %s2852_s24  }
 0x2f0   : > { %p14_p4 = scmp.ge.s32.totalorder %s17_s24, 4  }
 0x2f2   :  { %16 = sbr.rel (!%p14_p4) target bundleno = 1 (0x1), region = 98 }

// kernel: _lambda_.2
= control target key start
LH: loop header
LB: loop body
LE: loop exit
PB: predicated region body
PF: predicated region fallthrough
CT: control target
= control target key end

     0   :  { %s3307_s27 = smov 0   ;;  %s3872_s0 = inlined_call_operand.vmem [shape: f32[2,16,16,4], index: 0, kind: input, shape index: {}]   ;;  %s3873_s1 = inlined_call_operand.vmem [shape: f32[1,4], index: 1, kind: input, shape index: {}]   ;;  %s3874_s2 = inlined_call_operand.vmem [shape: f32[1,4], index: 2, kind: input, shape index: {}]   ;;  %s3875_s3 = inlined_call_operand.vmem [shape: bf16[3,3,4,8], index: 3, kind: input, shape index: {}]   ;;  %s3876_s4 = inlined_call_operand.vmem [shape: f32[1,8], index: 4, kind: input, shape index: {}]   ;;  %s3877_s5 = inlined_call_operand.vmem [shape: f32[1,8], index: 5, kind: input, shape index: {}]   ;;  %s3878_s6 = inlined_call_operand.vmem [shape: bf16[3,3,8,8], index: 6, kind: input, shape index: {}]   ;;  %s3879_s7 = inlined_call_operand.vmem [shape: bf16[4,8], index: 7, kind: input, shape index: {}]   ;;  %s3880_s8 = inlined_call_operand.vmem [shape: f32[2,8,8,8], index: 8, kind: output, shape index: {}]  }
   0x1 LB: > { %s2692_s28 = sadd.s32 4294967295, %s3259_s27   ;;  %p2696_p0 = scmp.ge.s32.totalorder %s3259_s27, 1  ;;  %s3259_s27 = sphi %s3307_s27, %s18_s27  }
   0x2   : > { %p262_p1 = scmp.lt.s32.totalorder %s3259_s27, 3 }
   0x4   : > { %p263_p2 = pnand %p2696_p0, %p262_p1 }
   0x5   : > { %v2703_v0 = vld [vmem:[%s3875_s3 + $0x2] sm:$0x3] (!%p263_p2)  ;;  %vm592_vm0 = vcmask (!%p263_p2), 1041408   ;;  %p296_p3 = scmp.lt.s32.totalorder (!%p263_p2), %s2692_s28, 1  ;;  %vm449_vm1 = vcmask (!%p263_p2), 31744   ;;  %vm452_vm2 = vcmask (!%p263_p2), 25600  }
   0x6   : > { %266 = sbr.rel (%p263_p2) target bundleno = 772 (0x304), region = 52  ;;  %3224 = vmatprep.subr.msk.bf16.mxu0 (!%p263_p2), %vm592_vm0, %v2703_v0  ;;  %v594_v1 = vsel (!%p263_p2), %vm592_vm0, %v2703_v0, 0  ;;  %v3261_v2 = vmov (!%p263_p2), 0.0   ;;  %v3427_v3 = vld [vmem:[%s3875_s3] sm:$0x3] (!%p263_p2)  ;;  %vm1548_vm3 = vcmask (!%p263_p2), 64512  }
   0x7   : > { %2897 = vmatpush3.bf16.msra.mxu0 (!%p263_p2), %v594_v1  ;;  %450 = vst.msk [vmem:[#allocation2] sm:$0xff] (!%p263_p2), %vm449_vm1, %v3261_v2  ;;  %451 = vst.msk [vmem:[#allocation2 + $0x8] sm:$0xff] (!%p263_p2), %vm449_vm1, %v3261_v2  ;;  %v3435_v4 = vld [vmem:[%s3873_s1] ss:$0 sm:$0xff] (!%p263_p2)  ;;  %vm1550_vm4 = vcmask (!%p263_p2), 58368   ;;  %vm1617_vm5 = vcmask (!%p263_p2), 1043456  }
   0x8   : > { %457 = vst.msk [vmem:[#allocation2 + $0x30] sm:$0xff] (!%p263_p2), %vm449_vm1, %v3261_v2  ;;  %458 = vst.msk [vmem:[#allocation2 + $0x38] sm:$0xff] (!%p263_p2), %vm449_vm1, %v3261_v2  ;;  %3225 = vmatprep.subr.msk.bf16.mxu0 (!%p263_p2), %vm592_vm0, %v3427_v3  ;;  %v3445_v5 = vld [vmem:[%s3874_s2] ss:$0 sm:$0xff] (!%p263_p2) }
   0x9   : > { %459 = vst.msk [vmem:[#allocation2 + $0x40] sm:$0x3] (!%p263_p2), %vm452_vm2, %v3261_v2  ;;  %453 = vst.msk [vmem:[#allocation2 + $0x10] sm:$0x3] (!%p263_p2), %vm452_vm2, %v3261_v2 }
   0xa   : > { %454 = vst.msk [vmem:[#allocation2 + $0x18] sm:$0xff] (!%p263_p2), %vm449_vm1, %v3261_v2  ;;  %455 = vst.msk [vmem:[#allocation2 + $0x20] sm:$0xff] (!%p263_p2), %vm449_vm1, %v3261_v2 }
   0xb   : > { %456 = vst.msk [vmem:[#allocation2 + $0x28] sm:$0x3] (!%p263_p2), %vm452_vm2, %v3261_v2  ;;  %462 = vst.msk [vmem:[#allocation2 + $0x58] sm:$0x3] (!%p263_p2), %vm452_vm2, %v3261_v2 }
   0xc   : > { %460 = vst.msk [vmem:[#allocation2 + $0x48] sm:$0xff] (!%p263_p2), %vm449_vm1, %v3261_v2  ;;  %461 = vst.msk [vmem:[#allocation2 + $0x50] sm:$0xff] (!%p263_p2), %vm449_vm1, %v3261_v2 }
   0xd   : > { %s3882_s28 = smov (!%p296_p3, %s2692_s28), 1  ;;  %463 = vst.msk [vmem:[#allocation2 + $0x60] sm:$0xff] %vm449_vm1, %v3261_v2  ;;  %464 = vst.msk [vmem:[#allocation2 + $0x68] sm:$0xff] %vm449_vm1, %v3261_v2 }
   0xe   : > { %465 = vst.msk [vmem:[#allocation2 + $0x70] sm:$0x3] %vm452_vm2, %v3261_v2  ;;  %468 = vst.msk [vmem:[#allocation2 + $0x88] sm:$0x3] %vm452_vm2, %v3261_v2  ;;  %s2799_s11 = sshll.u32 %s3882_s28, 8  ;;  %s2800_s17 = sshll.u32 %s3882_s28, 6 }
   0xf   : > { %466 = vst.msk [vmem:[#allocation2 + $0x78] sm:$0xff] %vm449_vm1, %v3261_v2  ;;  %467 = vst.msk [vmem:[#allocation2 + $0x80] sm:$0xff] %vm449_vm1, %v3261_v2  ;;  %s3440_s16 = scalar_lea.vmem %s3872_s0, %s2799_s11  ;;  %s305_s20 = scalar_lea.vmem %s3880_s8, %s2800_s17 }
  0x10   : > { %469 = vst.msk [vmem:[#allocation2 + $0x90] sm:$0xff] %vm449_vm1, %v3261_v2  ;;  %470 = vst.msk [vmem:[#allocation2 + $0x98] sm:$0xff] %vm449_vm1, %v3261_v2  ;;  %v309_v6 = vld [vmem:[%s3440_s16 + $0x10] sm:$0xff]  ;;  %v310_v7 = vld [vmem:[%s3440_s16 + $0x18] sm:$0xff] }
  0x11   : > { %471 = vst.msk [vmem:[#allocation2 + $0xa0] sm:$0x3] %vm452_vm2, %v3261_v2  ;;  %474 = vst.msk [vmem:[#allocation2 + $0xb8] sm:$0x3] %vm452_vm2, %v3261_v2  ;;  %v313_v8 = vld [vmem:[%s3440_s16 + $0x30] sm:$0xff]  ;;  %v348_v9 = vmul.f32 %v3435_v4, %v309_v6  ;;  %v349_v10 = vmul.f32 %v3435_v4, %v310_v7  ;;  %v314_v11 = vld [vmem:[%s3440_s16 + $0x38] sm:$0xff] }
  0x12   : > { %472 = vst.msk [vmem:[#allocation2 + $0xa8] sm:$0xff] %vm449_vm1, %v3261_v2  ;;  %473 = vst.msk [vmem:[#allocation2 + $0xb0] sm:$0xff] %vm449_vm1, %v3261_v2  ;;  %v317_v12 = vld [vmem:[%s3440_s16 + $0x50] sm:$0xff]  ;;  %v318_v13 = vld [vmem:[%s3440_s16 + $0x58] sm:$0xff]  ;;  %v352_v14 = vmul.f32 %v3435_v4, %v313_v8  ;;  %v353_v15 = vmul.f32 %v3435_v4, %v314_v11 }
  0x13   : > { %475 = vst.msk [vmem:[#allocation2 + $0xc0] sm:$0xff] %vm449_vm1, %v3261_v2  ;;  %476 = vst.msk [vmem:[#allocation2 + $0xc8] sm:$0xff] %vm449_vm1, %v3261_v2  ;;  %v356_v16 = vmul.f32 %v3435_v4, %v317_v12  ;;  %v357_v17 = vmul.f32 %v3435_v4, %v318_v13  ;;  %v321_v18 = vld [vmem:[%s3440_s16 + $0x70] sm:$0xff]  ;;  %v322_v19 = vld [vmem:[%s3440_s16 + $0x78] sm:$0xff]  ;;  %v387_v21 = vadd.f32 %v3445_v5, %v348_v9 }
  0x14   : > { %477 = vst.msk [vmem:[#allocation2 + $0xd0] sm:$0x3] %vm452_vm2, %v3261_v2  ;;  %480 = vst.msk [vmem:[#allocation2 + $0xe8] sm:$0x3] %vm452_vm2, %v3261_v2  ;;  %v325_v20 = vld [vmem:[%s3440_s16 + $0x90] sm:$0xff]  ;;  %v388_v22 = vadd.f32 %v3445_v5, %v349_v10  ;;  %v391_v23 = vadd.f32 %v3445_v5, %v352_v14  ;;  %v326_v24 = vld [vmem:[%s3440_s16 + $0x98] sm:$0xff]  ;;  %v360_v25 = vmul.f32 %v3435_v4, %v321_v18 }
  0x15   : > { %478 = vst.msk [vmem:[#allocation2 + $0xd8] sm:$0xff] %vm449_vm1, %v3261_v2  ;;  %479 = vst.msk [vmem:[#allocation2 + $0xe0] sm:$0xff] %vm449_vm1, %v3261_v2  ;;  %v392_v26 = vadd.f32 %v3445_v5, %v353_v15  ;;  %v395_v27 = vadd.f32 %v3445_v5, %v356_v16  ;;  %v396_v28 = vadd.f32 %v3445_v5, %v357_v17  ;;  %v329_v30 = vld [vmem:[%s3440_s16 + $0xb0] sm:$0xff]  ;;  %v419_v31 = vmax.f32 %v387_v21, 0.0  ;;  %v330_v35 = vld [vmem:[%s3440_s16 + $0xb8] sm:$0xff] }
  0x16   : > { %481 = vst.msk [vmem:[#allocation2 + $0xf0] sm:$0xff] %vm449_vm1, %v3261_v2  ;;  %482 = vst.msk [vmem:[#allocation2 + $0xf8] sm:$0xff] %vm449_vm1, %v3261_v2  ;;  %v361_v29 = vmul.f32 %v3435_v4, %v322_v19  ;;  %v420_v32 = vmax.f32 %v388_v22, 0.0  ;;  %v423_v33 = vmax.f32 %v391_v23, 0.0  ;;  %v364_v34 = vmul.f32 %v3435_v4, %v325_v20  ;;  %v333_v36 = vld [vmem:[%s3440_s16 + $0xd0] sm:$0xff]  ;;  %v334_v37 = vld [vmem:[%s3440_s16 + $0xd8] sm:$0xff] }
  0x17   : > { %483 = vst.msk [vmem:[#allocation2 + $0x100] sm:$0x3] %vm452_vm2, %v3261_v2  ;;  %486 = vst.msk [vmem:[#allocation2 + $0x118] sm:$0x3] %vm452_vm2, %v3261_v2  ;;  %v424_v38 = vmax.f32 %v392_v26, 0.0  ;;  %v427_v39 = vmax.f32 %v395_v27, 0.0  ;;  %v365_v41 = vmul.f32 %v3435_v4, %v326_v24  ;;  %v399_v42 = vadd.f32 %v3445_v5, %v360_v25 }
  0x18   : > { %484 = vst.msk [vmem:[#allocation2 + $0x108] sm:$0xff] %vm449_vm1, %v3261_v2  ;;  %485 = vst.msk [vmem:[#allocation2 + $0x110] sm:$0xff] %vm449_vm1, %v3261_v2  ;;  %v428_v40 = vmax.f32 %v396_v28, 0.0  ;;  %v400_v43 = vadd.f32 %v3445_v5, %v361_v29  ;;  %v403_v44 = vadd.f32 %v3445_v5, %v364_v34  ;;  %v368_v45 = vmul.f32 %v3435_v4, %v329_v30  ;;  %v307_v50 = vld [vmem:[%s3440_s16] sm:$0xff]  ;;  %v308_v51 = vld [vmem:[%s3440_s16 + $0x8] sm:$0xff] }
  0x19   : > { %487 = vst.msk [vmem:[#allocation2 + $0x120] sm:$0xff] %vm449_vm1, %v3261_v2  ;;  %488 = vst.msk [vmem:[#allocation2 + $0x128] sm:$0xff] %vm449_vm1, %v3261_v2  ;;  %v404_v46 = vadd.f32 %v3445_v5, %v365_v41  ;;  %v369_v47 = vmul.f32 %v3435_v4, %v330_v35  ;;  %v372_v48 = vmul.f32 %v3435_v4, %v333_v36  ;;  %v311_v52 = vld [vmem:[%s3440_s16 + $0x20] sm:$0xff]  ;;  %v431_v53 = vmax.f32 %v399_v42, 0.0  ;;  %v312_v57 = vld [vmem:[%s3440_s16 + $0x28] sm:$0xff] }
  0x1a   : > { %489 = vst.msk [vmem:[#allocation2 + $0x130] sm:$0x3] %vm452_vm2, %v3261_v2  ;;  %492 = vst.msk [vmem:[#allocation2 + $0x148] sm:$0x3] %vm452_vm2, %v3261_v2  ;;  %v373_v49 = vmul.f32 %v3435_v4, %v334_v37  ;;  %v432_v54 = vmax.f32 %v400_v43, 0.0  ;;  %v435_v55 = vmax.f32 %v403_v44, 0.0  ;;  %v407_v56 = vadd.f32 %v3445_v5, %v368_v45 }
  0x1b   : > { %490 = vst.msk [vmem:[#allocation2 + $0x138] sm:$0xff] %vm449_vm1, %v3261_v2  ;;  %491 = vst.msk [vmem:[#allocation2 + $0x140] sm:$0xff] %vm449_vm1, %v3261_v2  ;;  %v436_v58 = vmax.f32 %v404_v46, 0.0  ;;  %v408_v59 = vadd.f32 %v3445_v5, %v369_v47  ;;  %v411_v60 = vadd.f32 %v3445_v5, %v372_v48  ;;  %v315_v62 = vld [vmem:[%s3440_s16 + $0x40] sm:$0xff]  ;;  %v346_v0 = vmul.f32 %v3435_v4, %v307_v50  ;;  %v316_v7 = vld [vmem:[%s3440_s16 + $0x48] sm:$0xff] }
  0x1c   : > { %493 = vst.msk [vmem:[#allocation2 + $0x150] sm:$0xff] %vm449_vm1, %v3261_v2  ;;  %494 = vst.msk [vmem:[#allocation2 + $0x158] sm:$0xff] %vm449_vm1, %v3261_v2  ;;  %v412_v61 = vadd.f32 %v3445_v5, %v373_v49  ;;  %v439_v63 = vmax.f32 %v407_v56, 0.0  ;;  %v347_v1 = vmul.f32 %v3435_v4, %v308_v51  ;;  %v350_v6 = vmul.f32 %v3435_v4, %v311_v52  ;;  %v559_v8 = vld [vmem:[#allocation2 + $0x1] ss:$2 sm:$0xff] }
  0x1d   : > { %495 = vst.msk [vmem:[#allocation2 + $0x160] sm:$0x3] %vm452_vm2, %v3261_v2  ;;  %498 = vst.msk [vmem:[#allocation2 + $0x178] sm:$0x3] %vm452_vm2, %v3261_v2  ;;  %v440_v9 = vmax.f32 %v408_v59, 0.0  ;;  %v443_v10 = vmax.f32 %v411_v60, 0.0  ;;  %v351_v12 = vmul.f32 %v3435_v4, %v312_v57  ;;  %v385_v14 = vadd.f32 %v3445_v5, %v346_v0 }
  0x1e   : > { %496 = vst.msk [vmem:[#allocation2 + $0x168] sm:$0xff] %vm449_vm1, %v3261_v2  ;;  %497 = vst.msk [vmem:[#allocation2 + $0x170] sm:$0xff] %vm449_vm1, %v3261_v2  ;;  %v444_v11 = vmax.f32 %v412_v61, 0.0  ;;  %v319_v13 = vld [vmem:[%s3440_s16 + $0x60] sm:$0xff]  ;;  %v386_v15 = vadd.f32 %v3445_v5, %v347_v1  ;;  %v320_v16 = vld [vmem:[%s3440_s16 + $0x68] sm:$0xff]  ;;  %v354_v17 = vmul.f32 %v3435_v4, %v315_v62  ;;  %v355_v20 = vmul.f32 %v3435_v4, %v316_v7 }
  0x1f   : > { %499 = vst.msk [vmem:[#allocation2 + $0x180] sm:$0xff] %vm449_vm1, %v3261_v2  ;;  %500 = vst.msk [vmem:[#allocation2 + $0x188] sm:$0xff] %vm449_vm1, %v3261_v2  ;;  %v323_v18 = vld [vmem:[%s3440_s16 + $0x80] sm:$0xff]  ;;  %v324_v21 = vld [vmem:[%s3440_s16 + $0x88] sm:$0xff]  ;;  %v674_v26 = vsel %vm592_vm0, %v3427_v3, 0  ;;  %v358_v27 = vmul.f32 %v3435_v4, %v319_v13  ;;  %v389_v30 = vadd.f32 %v3445_v5, %v350_v6  ;;  %v417_v36 = vmax.f32 %v385_v14, 0.0 }
  0x20   : > { %501 = vst.msk [vmem:[#allocation2 + $0x190] sm:$0x3] %vm452_vm2, %v3261_v2  ;;  %v327_v22 = vld [vmem:[%s3440_s16 + $0xa0] sm:$0xff]  ;;  %v328_v28 = vld [vmem:[%s3440_s16 + $0xa8] sm:$0xff]  ;;  %v418_v37 = vmax.f32 %v386_v15, 0.0  ;;  %v362_v42 = vmul.f32 %v3435_v4, %v323_v18  ;;  %v363_v43 = vmul.f32 %v3435_v4, %v324_v21  ;;  %v337_v14 = vld [vmem:[%s3440_s16 + $0xf0] sm:$0xff] }
  0x21   : > { %508 = vst.msk [vmem:[#allocation2 + $0x31] sm:$0xff] %vm449_vm1, %v419_v31  ;;  %509 = vst.msk [vmem:[#allocation2 + $0x39] sm:$0xff] %vm449_vm1, %v420_v32  ;;  %v390_v31 = vadd.f32 %v3445_v5, %v351_v12  ;;  %v359_v32 = vmul.f32 %v3435_v4, %v320_v16  ;;  %v332_v34 = vld [vmem:[%s3440_s16 + $0xc8] sm:$0xff]  ;;  %v335_v35 = vld [vmem:[%s3440_s16 + $0xe0] sm:$0xff]  ;;  %v366_v44 = vmul.f32 %v3435_v4, %v327_v22 }
  0x22   : > { %512 = vst.msk [vmem:[#allocation2 + $0x61] sm:$0xff] %vm449_vm1, %v423_v33  ;;  %513 = vst.msk [vmem:[#allocation2 + $0x69] sm:$0xff] %vm449_vm1, %v424_v38  ;;  %v331_v33 = vld [vmem:[%s3440_s16 + $0xc0] sm:$0xff]  ;;  %v393_v38 = vadd.f32 %v3445_v5, %v354_v17  ;;  %v367_v45 = vmul.f32 %v3435_v4, %v328_v28  ;;  %v397_v47 = vadd.f32 %v3445_v5, %v358_v27  ;;  %v338_v28 = vld [vmem:[%s3440_s16 + $0xf8] sm:$0xff] }
  0x23   : > { %516 = vst.msk [vmem:[#allocation2 + $0x91] sm:$0xff] %vm449_vm1, %v427_v39  ;;  %517 = vst.msk [vmem:[#allocation2 + $0x99] sm:$0xff] %vm449_vm1, %v428_v40  ;;  %v3536_v3 = vld [vmem:[%s3875_s3 + $0x4] sm:$0x3]  ;;  %v394_v39 = vadd.f32 %v3445_v5, %v355_v20  ;;  %v336_v40 = vld [vmem:[%s3440_s16 + $0xe8] sm:$0xff]  ;;  %v370_v48 = vmul.f32 %v3435_v4, %v331_v33  ;;  %v371_v49 = vmul.f32 %v3435_v4, %v332_v34 }
  0x24   : > { %520 = vst.msk [vmem:[#allocation2 + $0xc1] sm:$0xff] %vm449_vm1, %v431_v53  ;;  %521 = vst.msk [vmem:[#allocation2 + $0xc9] sm:$0xff] %vm449_vm1, %v432_v54  ;;  %v374_v50 = vmul.f32 %v3435_v4, %v335_v35  ;;  %v538_v52 = vld [vmem:[#allocation2] ss:$2 sm:$0xff]  ;;  %v421_v54 = vmax.f32 %v389_v30, 0.0  ;;  %v375_v56 = vmul.f32 %v3435_v4, %v336_v40  ;;  %v401_v59 = vadd.f32 %v3445_v5, %v362_v42 }
  0x25   : > { %524 = vst.msk [vmem:[#allocation2 + $0xf1] sm:$0xff] %vm449_vm1, %v435_v55  ;;  %525 = vst.msk [vmem:[#allocation2 + $0xf9] sm:$0xff] %vm449_vm1, %v436_v58  ;;  %v398_v55 = vadd.f32 %v3445_v5, %v359_v32  ;;  %v402_v60 = vadd.f32 %v3445_v5, %v363_v43  ;;  %v405_v61 = vadd.f32 %v3445_v5, %v366_v44  ;;  %v776_v34 = vsel %vm592_vm0, %v3536_v3, 0  ;;  %v2717_v35 = vld [vmem:[%s3875_s3 + $0x6] sm:$0x3] }
  0x26   : > { %528 = vst.msk [vmem:[#allocation2 + $0x121] sm:$0xff] %vm449_vm1, %v439_v63  ;;  %529 = vst.msk [vmem:[#allocation2 + $0x129] sm:$0xff] %vm449_vm1, %v440_v9  ;;  %v406_v62 = vadd.f32 %v3445_v5, %v367_v45  ;;  %v409_v0 = vadd.f32 %v3445_v5, %v370_v48  ;;  %v410_v1 = vadd.f32 %v3445_v5, %v371_v49  ;;  %v425_v9 = vmax.f32 %v393_v38, 0.0  ;;  %v2722_v48 = vld [vmem:[%s3875_s3 + $0x8] sm:$0x3] }
  0x27   : > { %532 = vst.msk [vmem:[#allocation2 + $0x151] sm:$0xff] %vm449_vm1, %v443_v10  ;;  %533 = vst.msk [vmem:[#allocation2 + $0x159] sm:$0xff] %vm449_vm1, %v444_v11  ;;  %v413_v6 = vadd.f32 %v3445_v5, %v374_v50  ;;  %v426_v10 = vmax.f32 %v394_v39, 0.0  ;;  %v429_v11 = vmax.f32 %v397_v47, 0.0  ;;  %v430_v12 = vmax.f32 %v398_v55, 0.0 }
  0x28   : > { %v561_v19 = vld [vmem:[#allocation2 + $0x31] ss:$2 sm:$0xff]  ;;  %506 = vst.msk [vmem:[#allocation2 + $0x19] sm:$0xff] %vm449_vm1, %v417_v36  ;;  %507 = vst.msk [vmem:[#allocation2 + $0x21] sm:$0xff] %vm449_vm1, %v418_v37  ;;  %v540_v53 = vld [vmem:[#allocation2 + $0x30] ss:$2 sm:$0xff]  ;;  %v414_v18 = vadd.f32 %v3445_v5, %v375_v56  ;;  %v377_v32 = vmul.f32 %v3435_v4, %v338_v28 }
  0x29   : > { %v574_v23 = vpack.c.bf16 %v561_v19, %v559_v8  ;;  %v563_v24 = vld [vmem:[#allocation2 + $0x61] ss:$2 sm:$0xff]  ;;  %510 = vst.msk [vmem:[#allocation2 + $0x49] sm:$0xff] %vm449_vm1, %v421_v54  ;;  %v553_v7 = vpack.c.bf16 %v540_v53, %v538_v52  ;;  %v422_v8 = vmax.f32 %v390_v31, 0.0  ;;  %v433_v13 = vmax.f32 %v401_v59, 0.0  ;;  %514 = vst.msk [vmem:[#allocation2 + $0x79] sm:$0xff] %vm449_vm1, %v425_v9 }
  0x2a   : > { %v565_v25 = vld [vmem:[#allocation2 + $0x91] ss:$2 sm:$0xff]  ;;  %v434_v15 = vmax.f32 %v402_v60, 0.0  ;;  %v437_v16 = vmax.f32 %v405_v61, 0.0  ;;  %v438_v17 = vmax.f32 %v406_v62, 0.0  ;;  %515 = vst.msk [vmem:[#allocation2 + $0x81] sm:$0xff] %vm449_vm1, %v426_v10  ;;  %v416_v38 = vadd.f32 %v3445_v5, %v377_v32 }
  0x2b   : > { %v575_v29 = vpack.c.bf16 %v565_v25, %v563_v24  ;;  %2898 = vmatprep.mubr.msk.bf16.mxu0 %vm449_vm1, %v574_v23  ;;  %v567_v41 = vld [vmem:[#allocation2 + $0xc1] ss:$2 sm:$0xff]  ;;  %511 = vst.msk [vmem:[#allocation2 + $0x51] sm:$0xff] %vm449_vm1, %v422_v8  ;;  %518 = vst.msk [vmem:[#allocation2 + $0xa9] sm:$0xff] %vm449_vm1, %v429_v11  ;;  %v441_v19 = vmax.f32 %v409_v0, 0.0  ;;  %v442_v20 = vmax.f32 %v410_v1, 0.0  ;;  %v376_v25 = vmul.f32 %v3435_v4, %v337_v14 }
  0x2c   : > { %v569_v46 = vld [vmem:[#allocation2 + $0xf1] ss:$2 sm:$0xff]  ;;  %519 = vst.msk [vmem:[#allocation2 + $0xb1] sm:$0xff] %vm449_vm1, %v430_v12  ;;  %522 = vst.msk [vmem:[#allocation2 + $0xd9] sm:$0xff] %vm449_vm1, %v433_v13  ;;  %v445_v21 = vmax.f32 %v413_v6, 0.0  ;;  %v446_v24 = vmax.f32 %v414_v18, 0.0 }
  0x2d   : > { %2899 = vmatmul.mubr.msk.bf16.vlgmr.msra.gmra.mrb[0].mxu0 %vm449_vm1, %v575_v29  ;;  %v576_v51 = vpack.c.bf16 %v569_v46, %v567_v41  ;;  %v571_v57 = vld [vmem:[#allocation2 + $0x121] ss:$2 sm:$0xff]  ;;  %v542_v22 = vld [vmem:[#allocation2 + $0x60] ss:$2 sm:$0xff]  ;;  %v544_v23 = vld [vmem:[#allocation2 + $0x90] ss:$2 sm:$0xff]  ;;  %v415_v29 = vadd.f32 %v3445_v5, %v376_v25 }
  0x2e   : > { %2907 = vmatpush3.bf16.msra.mxu0 %v674_v26  ;;  %v573_v58 = vld [vmem:[#allocation2 + $0x151] ss:$2 sm:$0xff]  ;;  %523 = vst.msk [vmem:[#allocation2 + $0xe1] sm:$0xff] %vm449_vm1, %v434_v15  ;;  %526 = vst.msk [vmem:[#allocation2 + $0x109] sm:$0xff] %vm449_vm1, %v437_v16  ;;  %v546_v26 = vld [vmem:[#allocation2 + $0xc0] ss:$2 sm:$0xff]  ;;  %v554_v30 = vpack.c.bf16 %v544_v23, %v542_v22 }
  0x2f   : > { %3226 = vmatprep.subr.msk.bf16.mxu0 %vm592_vm0, %v3536_v3  ;;  %2902 = vmatprep.mubr.msk.bf16.mxu0 %vm449_vm1, %v576_v51  ;;  %v577_v63 = vpack.c.bf16 %v573_v58, %v571_v57  ;;  %527 = vst.msk [vmem:[#allocation2 + $0x111] sm:$0xff] %vm449_vm1, %v438_v17  ;;  %v548_v27 = vld [vmem:[#allocation2 + $0xf0] ss:$2 sm:$0xff]  ;;  %530 = vst.msk [vmem:[#allocation2 + $0x139] sm:$0xff] %vm449_vm1, %v441_v19  ;;  %v447_v33 = vmax.f32 %v415_v29, 0.0  ;;  %v448_v41 = vmax.f32 %v416_v38, 0.0 }
  0x30   : > { %531 = vst.msk [vmem:[#allocation2 + $0x141] sm:$0xff] %vm449_vm1, %v442_v20  ;;  %534 = vst.msk [vmem:[#allocation2 + $0x169] sm:$0xff] %vm449_vm1, %v445_v21  ;;  %v555_v31 = vpack.c.bf16 %v548_v27, %v546_v26  ;;  %v550_v36 = vld [vmem:[#allocation2 + $0x120] ss:$2 sm:$0xff]  ;;  %v552_v37 = vld [vmem:[#allocation2 + $0x150] ss:$2 sm:$0xff] }
  0x31   : > { %535 = vst.msk [vmem:[#allocation2 + $0x171] sm:$0xff] %vm449_vm1, %v446_v24  ;;  %536 = vst.msk [vmem:[#allocation2 + $0x181] sm:$0xff] %vm449_vm1, %v447_v33  ;;  %v742_v4 = vld [vmem:[#allocation2 + $0x2] ss:$2 sm:$0xff]  ;;  %v744_v39 = vld [vmem:[#allocation2 + $0x32] ss:$2 sm:$0xff]  ;;  %v556_v3 = vpack.c.bf16 %v552_v37, %v550_v36 }
  0x32   : > { %v757_v40 = vpack.c.bf16 %v744_v39, %v742_v4  ;;  %537 = vst.msk [vmem:[#allocation2 + $0x189] sm:$0xff] %vm449_vm1, %v448_v41  ;;  %v746_v42 = vld [vmem:[#allocation2 + $0x62] ss:$2 sm:$0xff]  ;;  %v748_v43 = vld [vmem:[#allocation2 + $0x92] ss:$2 sm:$0xff]  ;;  %v885_v5 = vsel %vm592_vm0, %v2717_v35, 0 }
  0x33   : > { %v750_v44 = vld [vmem:[#allocation2 + $0xc2] ss:$2 sm:$0xff]  ;;  %v752_v45 = vld [vmem:[#allocation2 + $0xf2] ss:$2 sm:$0xff]  ;;  %v758_v46 = vpack.c.bf16 %v748_v43, %v746_v42  ;;  %v995_v61 = vsel %vm592_vm0, %v2722_v48, 0  ;;  %1556 = vst.msk [vmem:[#allocation3 + $0x30] sm:$0xff] %vm1548_vm3, %v3261_v2 }
  0x34   : > { %v759_v47 = vpack.c.bf16 %v752_v45, %v750_v44  ;;  %v754_v49 = vld [vmem:[#allocation2 + $0x122] ss:$2 sm:$0xff]  ;;  %v756_v50 = vld [vmem:[#allocation2 + $0x152] ss:$2 sm:$0xff]  ;;  %v961_v1 = vld [vmem:[#allocation2 + $0x19] ss:$2 sm:$0xff] }
  0x35   : > { %2903 = vmatmul.mubr.msk.bf16.gmra.mrb[4].mxu0 %vm449_vm1, %v577_v63  ;;  %v851_v51 = vld [vmem:[#allocation2 + $0x18] ss:$2 sm:$0xff]  ;;  %v853_v52 = vld [vmem:[#allocation2 + $0x48] ss:$2 sm:$0xff]  ;;  %v760_v53 = vpack.c.bf16 %v756_v50, %v754_v49  ;;  %v963_v6 = vld [vmem:[#allocation2 + $0x49] ss:$2 sm:$0xff] }
  0x36   : > { %2908 = vmatprep.mubr.msk.bf16.mxu0 %vm449_vm1, %v553_v7  ;;  %v866_v54 = vpack.c.bf16 %v853_v52, %v851_v51  ;;  %v855_v55 = vld [vmem:[#allocation2 + $0x78] ss:$2 sm:$0xff]  ;;  %v857_v56 = vld [vmem:[#allocation2 + $0xa8] ss:$2 sm:$0xff]  ;;  %v976_v8 = vpack.c.bf16 %v963_v6, %v961_v1  ;;  %v965_v9 = vld [vmem:[#allocation2 + $0x79] ss:$2 sm:$0xff] }
  0x37   : > { %v859_v57 = vld [vmem:[#allocation2 + $0xd8] ss:$2 sm:$0xff]  ;;  %v861_v58 = vld [vmem:[#allocation2 + $0x108] ss:$2 sm:$0xff]  ;;  %v867_v59 = vpack.c.bf16 %v857_v56, %v855_v55  ;;  %v967_v10 = vld [vmem:[#allocation2 + $0xa9] ss:$2 sm:$0xff] }
  0x38   : > { %v868_v60 = vpack.c.bf16 %v861_v58, %v859_v57  ;;  %v2727_v62 = vld [vmem:[%s3875_s3 + $0xa] sm:$0x3]  ;;  %v863_v63 = vld [vmem:[#allocation2 + $0x138] ss:$2 sm:$0xff]  ;;  %v969_v11 = vld [vmem:[#allocation2 + $0xd9] ss:$2 sm:$0xff]  ;;  %v977_v13 = vpack.c.bf16 %v967_v10, %v965_v9 }
  0x39   : > { %v865_v0 = vld [vmem:[#allocation2 + $0x168] ss:$2 sm:$0xff]  ;;  %v971_v12 = vld [vmem:[#allocation2 + $0x109] ss:$2 sm:$0xff]  ;;  %v1105_v15 = vsel %vm592_vm0, %v2727_v62, 0  ;;  %1549 = vst.msk [vmem:[#allocation3] sm:$0xff] %vm1548_vm3, %v3261_v2 }
  0x3a   : > { %v869_v7 = vpack.c.bf16 %v865_v0, %v863_v63  ;;  %v978_v14 = vpack.c.bf16 %v971_v12, %v969_v11  ;;  %v2732_v16 = vld [vmem:[%s3875_s3 + $0xc] sm:$0x3]  ;;  %v973_v17 = vld [vmem:[#allocation2 + $0x139] ss:$2 sm:$0xff]  ;;  %v1071_v19 = vld [vmem:[#allocation2 + $0x1a] ss:$2 sm:$0xff] }
  0x3b   : > { %v975_v18 = vld [vmem:[#allocation2 + $0x169] ss:$2 sm:$0xff]  ;;  %v1073_v20 = vld [vmem:[#allocation2 + $0x4a] ss:$2 sm:$0xff]  ;;  %v1075_v23 = vld [vmem:[#allocation2 + $0x7a] ss:$2 sm:$0xff] }
  0x3c   : > { %v979_v21 = vpack.c.bf16 %v975_v18, %v973_v17  ;;  %v1086_v22 = vpack.c.bf16 %v1073_v20, %v1071_v19  ;;  %v1077_v24 = vld [vmem:[#allocation2 + $0xaa] ss:$2 sm:$0xff]  ;;  %v1079_v25 = vld [vmem:[#allocation2 + $0xda] ss:$2 sm:$0xff]  ;;  %v1215_v29 = vsel %vm592_vm0, %v2732_v16, 0  ;;  %1552 = vst.msk [vmem:[#allocation3 + $0x10] sm:$0xff] %vm1548_vm3, %v3261_v2 }
  0x3d   : > { %2909 = vmatmul.mubr.msk.bf16.vlgmr.msra.gmra.mrb[0].mxu0 %vm449_vm1, %v554_v30  ;;  %v1081_v26 = vld [vmem:[#allocation2 + $0x10a] ss:$2 sm:$0xff]  ;;  %v1087_v27 = vpack.c.bf16 %v1077_v24, %v1075_v23  ;;  %v1291_v45 = vld [vmem:[#allocation2 + $0x31] ss:$2 sm:$0xff]  ;;  %v1297_v49 = vld [vmem:[#allocation2 + $0xc1] ss:$2 sm:$0xff] }
  0x3e   : > { %2917 = vmatpush3.bf16.msra.mxu0 %v776_v34  ;;  %2912 = vmatprep.mubr.msk.bf16.mxu0 %vm449_vm1, %v555_v31  ;;  %v1088_v28 = vpack.c.bf16 %v1081_v26, %v1079_v25  ;;  %v2737_v30 = vld [vmem:[%s3875_s3 + $0xe] sm:$0x3]  ;;  %v1083_v31 = vld [vmem:[#allocation2 + $0x13a] ss:$2 sm:$0xff]  ;;  %v2742_v42 = vld [vmem:[%s3875_s3 + $0x10] sm:$0x3] }
  0x3f   : > { %3227 = vmatprep.subr.msk.bf16.mxu0 %vm592_vm0, %v2717_v35  ;;  %v1085_v32 = vld [vmem:[#allocation2 + $0x16a] ss:$2 sm:$0xff]  ;;  %v1325_v41 = vsel %vm592_vm0, %v2737_v30, 0  ;;  %v1299_v50 = vld [vmem:[#allocation2 + $0xf1] ss:$2 sm:$0xff]  ;;  %1554 = vst.msk [vmem:[#allocation3 + $0x20] sm:$0xff] %vm1548_vm3, %v3261_v2 }
  0x40   : > { %v1181_v33 = vld [vmem:[#allocation2 + $0x30] ss:$2 sm:$0xff]  ;;  %v1183_v34 = vld [vmem:[#allocation2 + $0x60] ss:$2 sm:$0xff]  ;;  %v1089_v35 = vpack.c.bf16 %v1085_v32, %v1083_v31  ;;  %v1301_v51 = vld [vmem:[#allocation2 + $0x121] ss:$2 sm:$0xff] }
  0x41   : > { %v1196_v36 = vpack.c.bf16 %v1183_v34, %v1181_v33  ;;  %v1185_v37 = vld [vmem:[#allocation2 + $0x90] ss:$2 sm:$0xff]  ;;  %v1187_v38 = vld [vmem:[#allocation2 + $0xc0] ss:$2 sm:$0xff]  ;;  %v1303_v55 = vld [vmem:[#allocation2 + $0x151] ss:$2 sm:$0xff] }
  0x42   : > { %v1189_v4 = vld [vmem:[#allocation2 + $0xf0] ss:$2 sm:$0xff]  ;;  %v1191_v39 = vld [vmem:[#allocation2 + $0x120] ss:$2 sm:$0xff]  ;;  %v1305_v56 = vld [vmem:[#allocation2 + $0x181] ss:$2 sm:$0xff] }
  0x43   : > { %v1193_v43 = vld [vmem:[#allocation2 + $0x150] ss:$2 sm:$0xff]  ;;  %v1195_v44 = vld [vmem:[#allocation2 + $0x180] ss:$2 sm:$0xff]  ;;  %1557 = vst.msk [vmem:[#allocation3 + $0x38] sm:$0x3] %vm1550_vm4, %v3261_v2 }
  0x44   : > { %v1401_v57 = vld [vmem:[#allocation2 + $0x32] ss:$2 sm:$0xff]  ;;  %v1403_v58 = vld [vmem:[#allocation2 + $0x62] ss:$2 sm:$0xff]  ;;  %1551 = vst.msk [vmem:[#allocation3 + $0x8] sm:$0x3] %vm1550_vm4, %v3261_v2 }
  0x45   : > { %2913 = vmatmul.mubr.msk.bf16.gmra.mrb[4].mxu0 %vm449_vm1, %v556_v3  ;;  %v1197_v3 = vpack.c.bf16 %v1187_v38, %v1185_v37  ;;  %v1409_v63 = vld [vmem:[#allocation2 + $0xf2] ss:$2 sm:$0xff]  ;;  %v1411_v0 = vld [vmem:[#allocation2 + $0x122] ss:$2 sm:$0xff]  ;;  %1553 = vst.msk [vmem:[#allocation3 + $0x18] sm:$0x3] %vm1550_vm4, %v3261_v2 }
  0x46   : > { %2918 = vmatprep.mubr.msk.bf16.mxu0 %vm449_vm1, %v757_v40  ;;  %v1198_v40 = vpack.c.bf16 %v1191_v39, %v1189_v4  ;;  %v1418_v6 = vpack.c.bf16 %v1411_v0, %v1409_v63  ;;  %1555 = vst.msk [vmem:[#allocation3 + $0x28] sm:$0x3] %vm1550_vm4, %v3261_v2  ;;  %1559 = vst.msk [vmem:[#allocation3 + $0x48] sm:$0x3] %vm1550_vm4, %v3261_v2  ;;  %v1604_v10 = vld [vmem:[%s3878_s6] sm:$0xf] }
  0x47   : > { %1558 = vst.msk [vmem:[#allocation3 + $0x40] sm:$0xff] %vm1548_vm3, %v3261_v2  ;;  %1560 = vst.msk [vmem:[#allocation3 + $0x50] sm:$0xff] %vm1548_vm3, %v3261_v2  ;;  %v1619_v11 = vsel %vm1617_vm5, %v1604_v10, 0  ;;  %3234 = vmatprep.subr.msk.bf16.mxu1 %vm1617_vm5, %v1604_v10  ;;  %v1591_v12 = vld [vmem:[%s3879_s7] sm:$0x3] }
  0x48   : > { %1561 = vst.msk [vmem:[#allocation3 + $0x58] sm:$0x3] %vm1550_vm4, %v3261_v2  ;;  %1563 = vst.msk [vmem:[#allocation3 + $0x68] sm:$0x3] %vm1550_vm4, %v3261_v2  ;;  %3087 = vmatpush3.bf16.msra.mxu1 %v1619_v11  ;;  %v1584_v63 = vld [vmem:[#allocation2 + $0x109] ss:$2 sm:$0xff] }
  0x49   : > { %1562 = vst.msk [vmem:[#allocation3 + $0x60] sm:$0xff] %vm1548_vm3, %v3261_v2  ;;  %1564 = vst.msk [vmem:[#allocation3 + $0x70] sm:$0xff] %vm1548_vm3, %v3261_v2  ;;  %3235 = vmatprep.subr.msk.bf16.mxu1 %vm592_vm0, %v1591_v12 }
  0x4a   : > { %1565 = vst.msk [vmem:[#allocation3 + $0x78] sm:$0x3] %vm1550_vm4, %v3261_v2  ;;  %1567 = vst.msk [vmem:[#allocation3 + $0x88] sm:$0x3] %vm1550_vm4, %v3261_v2 }
  0x4b   : > { %1566 = vst.msk [vmem:[#allocation3 + $0x80] sm:$0xff] %vm1548_vm3, %v3261_v2  ;;  %1568 = vst.msk [vmem:[#allocation3 + $0x90] sm:$0xff] %vm1548_vm3, %v3261_v2 }
  0x4c   : > { %1569 = vst.msk [vmem:[#allocation3 + $0x98] sm:$0x3] %vm1550_vm4, %v3261_v2  ;;  %v2747_v2 = vld [vmem:[%s3876_s4] ss:$0 sm:$0xff] }
  0x4d   : > { %2919 = vmatmul.mubr.msk.bf16.vlgmr.msra.gmra.mrb[0].mxu0 %vm449_vm1, %v758_v46  ;;  %v1293_v46 = vld [vmem:[#allocation2 + $0x61] ss:$2 sm:$0xff] }
  0x4e   : > { %2927 = vmatpush3.bf16.msra.mxu0 %v885_v5  ;;  %2922 = vmatprep.mubr.msk.bf16.mxu0 %vm449_vm1, %v759_v47  ;;  %v1199_v47 = vpack.c.bf16 %v1195_v44, %v1193_v43  ;;  %v1306_v5 = vpack.c.bf16 %v1293_v46, %v1291_v45 }
  0x4f   : > { %3228 = vmatprep.subr.msk.bf16.mxu0 %vm592_vm0, %v2722_v48  ;;  %v1295_v48 = vld [vmem:[#allocation2 + $0x91] ss:$2 sm:$0xff] }
  0x50   : > { %v1307_v52 = vpack.c.bf16 %v1297_v49, %v1295_v48  ;;  %v1579_v49 = vld [vmem:[#allocation2 + $0x19] ss:$2 sm:$0xff] }
  0x55   : > { %2923 = vmatmul.mubr.msk.bf16.gmra.mrb[4].mxu0 %vm449_vm1, %v760_v53  ;;  %v1308_v53 = vpack.c.bf16 %v1301_v51, %v1299_v50  ;;  %v1580_v50 = vld [vmem:[#allocation2 + $0x49] ss:$2 sm:$0xff] }
  0x56   : > { %2928 = vmatprep.mubr.msk.bf16.mxu0 %vm449_vm1, %v866_v54  ;;  %v1435_v54 = vsel %vm592_vm0, %v2742_v42, 0 }
  0x5d   : > { %2929 = vmatmul.mubr.msk.bf16.vlgmr.msra.gmra.mrb[0].mxu0 %vm449_vm1, %v867_v59  ;;  %v1309_v59 = vpack.c.bf16 %v1305_v56, %v1303_v55  ;;  %v1587_v56 = vpack.c.bf16 %v1580_v50, %v1579_v49 }
  0x5e   : > { %2937 = vmatpush3.bf16.msra.mxu0 %v995_v61  ;;  %2932 = vmatprep.mubr.msk.bf16.mxu0 %vm449_vm1, %v868_v60  ;;  %v1416_v60 = vpack.c.bf16 %v1403_v58, %v1401_v57  ;;  %v1405_v61 = vld [vmem:[#allocation2 + $0x92] ss:$2 sm:$0xff]  ;;  %v1699_v58 = vsel %vm592_vm0, %v1591_v12, 0 }
  0x5f   : > { %3229 = vmatprep.subr.msk.bf16.mxu0 %vm592_vm0, %v2727_v62  ;;  %v1407_v62 = vld [vmem:[#allocation2 + $0xc2] ss:$2 sm:$0xff] }
  0x60   : > { %v1417_v1 = vpack.c.bf16 %v1407_v62, %v1405_v61  ;;  %v1582_v61 = vld [vmem:[#allocation2 + $0xa9] ss:$2 sm:$0xff]  ;;  %v1583_v62 = vld [vmem:[#allocation2 + $0xd9] ss:$2 sm:$0xff] }
  0x65   : > { %2933 = vmatmul.mubr.msk.bf16.gmra.mrb[4].mxu0 %vm449_vm1, %v869_v7  ;;  %v1413_v7 = vld [vmem:[#allocation2 + $0x152] ss:$2 sm:$0xff] }
  0x66   : > { %2938 = vmatprep.mubr.msk.bf16.mxu0 %vm449_vm1, %v976_v8  ;;  %v1415_v8 = vld [vmem:[#allocation2 + $0x182] ss:$2 sm:$0xff] }
  0x67   : > { %v1419_v9 = vpack.c.bf16 %v1415_v8, %v1413_v7  ;;  %v2762_v7 = vld [vmem:[%s3878_s6 + $0x8] sm:$0xf]  ;;  %v1585_v8 = vld [vmem:[#allocation2 + $0x139] ss:$2 sm:$0xff] }
  0x6d   : > { %2939 = vmatmul.mubr.msk.bf16.vlgmr.msra.gmra.mrb[0].mxu0 %vm449_vm1, %v977_v13 }
  0x6e   : > { %2947 = vmatpush3.bf16.msra.mxu0 %v1105_v15  ;;  %2942 = vmatprep.mubr.msk.bf16.mxu0 %vm449_vm1, %v978_v14  ;;  %v2748_v14 = vld [vmem:[%s3877_s5] ss:$0 sm:$0xff] }
  0x6f   : > { %3230 = vmatprep.subr.msk.bf16.mxu0 %vm592_vm0, %v2732_v16 }
  0x75   : > { %2943 = vmatmul.mubr.msk.bf16.gmra.mrb[4].mxu0 %vm449_vm1, %v979_v21 }
  0x76   : > { %2948 = vmatprep.mubr.msk.bf16.mxu0 %vm449_vm1, %v1086_v22 }
  0x7d   : > { %2949 = vmatmul.mubr.msk.bf16.vlgmr.msra.gmra.mrb[0].mxu0 %vm449_vm1, %v1087_v27 }
  0x7e   : > { %2957 = vmatpush3.bf16.msra.mxu0 %v1215_v29  ;;  %2952 = vmatprep.mubr.msk.bf16.mxu0 %vm449_vm1, %v1088_v28 }
  0x7f   : > { %3231 = vmatprep.subr.msk.bf16.mxu0 %vm592_vm0, %v2737_v30 }
  0x85   : > { %2953 = vmatmul.mubr.msk.bf16.gmra.mrb[4].mxu0 %vm449_vm1, %v1089_v35 }
  0x86   : > { %2958 = vmatprep.mubr.msk.bf16.mxu0 %vm449_vm1, %v1196_v36 }
  0x8d   : > { %2959 = vmatmul.mubr.msk.bf16.vlgmr.msra.gmra.mrb[0].mxu0 %vm449_vm1, %v1197_v3 }
  0x8e   : > { %2967 = vmatpush3.bf16.msra.mxu0 %v1325_v41  ;;  %2962 = vmatprep.mubr.msk.bf16.mxu0 %vm449_vm1, %v1198_v40  ;;  %v1592_v40 = vld [vmem:[#allocation3] sm:$0xff] }
  0x8f   : > { %3232 = vmatprep.subr.msk.bf16.mxu0 %vm592_vm0, %v2742_v42 }
  0x95   : > { %2963 = vmatmul.mubr.msk.bf16.gmra.mrb[4].mxu0 %vm449_vm1, %v1199_v47 }
  0x96   : > { %2968 = vmatprep.mubr.msk.bf16.mxu0 %vm449_vm1, %v1306_v5 }
  0x9d   : > { %2969 = vmatmul.mubr.msk.bf16.vlgmr.msra.gmra.mrb[0].mxu0 %vm449_vm1, %v1307_v52 }
  0x9e   : > { %2977 = vmatpush3.bf16.msra.mxu0 %v1435_v54  ;;  %2972 = vmatprep.mubr.msk.bf16.mxu0 %vm449_vm1, %v1308_v53 }
  0x9f   : > { %3233 = vmatprep.subr.msk.bf16.mxu0 %vm1617_vm5, %v1604_v10 }
  0xa5   : > { %2973 = vmatmul.mubr.msk.bf16.gmra.mrb[4].mxu0 %vm449_vm1, %v1309_v59  ;;  %v2757_v59 = vld [vmem:[%s3878_s6 + $0x4] sm:$0xf] }
  0xa6   : > { %2978 = vmatprep.mubr.msk.bf16.mxu0 %vm449_vm1, %v1416_v60  ;;  %v1581_v60 = vld [vmem:[#allocation2 + $0x79] ss:$2 sm:$0xff] }
  0xa7   : > { %v1588_v0 = vpack.c.bf16 %v1582_v61, %v1581_v60  ;;  %v2792_v60 = vld [vmem:[%s3878_s6 + $0x20] sm:$0xf] }
  0xa8   : > { %v2284_v61 = vld [vmem:[#allocation3 + $0x90] sm:$0xff] }
  0xad   : > { %2979 = vmatmul.mubr.msk.bf16.vlgmr.msra.gmra.mrb[0].mxu0 %vm449_vm1, %v1417_v1  ;;  %v1589_v1 = vpack.c.bf16 %v1584_v63, %v1583_v62  ;;  %v2488_v63 = vld [vmem:[#allocation3 + $0x92] sm:$0xff] }
  0xae   : > { %2982 = vmatprep.mubr.msk.bf16.mxu0 %vm449_vm1, %v1418_v6  ;;  %2987 = vmatpush3.bf16.msra.mxu0 %v1619_v11  ;;  %v1793_v6 = vsel %vm1617_vm5, %v2757_v59, 0  ;;  %v1766_v11 = vld [vmem:[#allocation3 + $0x1] sm:$0xff] }
  0xb5   : > { %2983 = vmatmul.mubr.msk.bf16.gmra.mrb[4].mxu0 %vm449_vm1, %v1419_v9  ;;  %v1586_v9 = vld [vmem:[#allocation2 + $0x169] ss:$2 sm:$0xff] }
  0xb6   : > { %v1590_v10 = vpack.c.bf16 %v1586_v9, %v1585_v8 }
 0x180   : > { %v2980_v13 = vpop.f32.mrb[0].mxu0 }
 0x181   : > { %v1519_v15 = vmul.f32 %v2980_v13, %v2747_v2  ;;  %v1471_v16 = vpop.f32.mrb[1].mxu0 }
 0x182   : > { %v1517_v17 = vmul.f32 %v2747_v2, %v1471_v16  ;;  %v2981_v18 = vpop.f32.mrb[2].mxu0 }
 0x183   : > { %v1534_v19 = vadd.f32 %v2748_v14, %v1519_v15  ;;  %v1520_v20 = vmul.f32 %v2981_v18, %v2747_v2  ;;  %v1474_v21 = vpop.f32.mrb[3].mxu0 }
 0x184   : > { %v1532_v22 = vadd.f32 %v2748_v14, %v1517_v17  ;;  %v1518_v23 = vmul.f32 %v2747_v2, %v1474_v21  ;;  %v1895_v17 = vsel %vm1617_vm5, %v2762_v7, 0 }
 0x185   : > { %v1542_v24 = vmax.f32 %v1534_v19, 0.0  ;;  %v1535_v25 = vadd.f32 %v2748_v14, %v1520_v20  ;;  %v2767_v20 = vld [vmem:[%s3878_s6 + $0xc] sm:$0xf] }
 0x186   : > { %v1540_v26 = vmax.f32 %v1532_v22, 0.0  ;;  %v1533_v27 = vadd.f32 %v2748_v14, %v1518_v23  ;;  %v1868_v22 = vld [vmem:[#allocation3 + $0x2] sm:$0xff] }
 0x187   : > { %1573 = vst.msk [vmem:[#allocation3 + $0x31] sm:$0xff] %vm1548_vm3, %v1542_v24  ;;  %v1543_v28 = vmax.f32 %v1535_v25, 0.0 }
 0x188   : > { %1571 = vst.msk [vmem:[#allocation3 + $0x11] sm:$0xff] %vm1548_vm3, %v1540_v26  ;;  %v1541_v29 = vmax.f32 %v1533_v27, 0.0  ;;  %v2984_v30 = vpop.f32.mrb[4].mxu0 }
 0x189   : > { %1574 = vst.msk [vmem:[#allocation3 + $0x41] sm:$0xff] %vm1548_vm3, %v1543_v28  ;;  %v1523_v31 = vmul.f32 %v2984_v30, %v2747_v2  ;;  %v1487_v32 = vpop.f32.mrb[5].mxu0 }
 0x18a   : > { %1572 = vst.msk [vmem:[#allocation3 + $0x21] sm:$0xff] %vm1548_vm3, %v1541_v29  ;;  %v1521_v33 = vmul.f32 %v2747_v2, %v1487_v32  ;;  %v2985_v34 = vpop.f32.mrb[6].mxu0 }
 0x18b   : > { %v1538_v35 = vadd.f32 %v2748_v14, %v1523_v31  ;;  %v1524_v36 = vmul.f32 %v2985_v34, %v2747_v2  ;;  %v1490_v37 = vpop.f32.mrb[7].mxu0  ;;  %v1997_v31 = vsel %vm1617_vm5, %v2767_v20, 0  ;;  %v2772_v34 = vld [vmem:[%s3878_s6 + $0x10] sm:$0xf] }
 0x18c   : > { %v1536_v38 = vadd.f32 %v2748_v14, %v1521_v33  ;;  %v1522_v4 = vmul.f32 %v2747_v2, %v1490_v37 }
 0x18d   : > { %v1546_v39 = vmax.f32 %v1538_v35, 0.0  ;;  %v1539_v3 = vadd.f32 %v2748_v14, %v1524_v36 }
 0x18e   : > { %v1544_v41 = vmax.f32 %v1536_v38, 0.0  ;;  %v1537_v42 = vadd.f32 %v2748_v14, %v1522_v4  ;;  %v3720_v5 = vld [vmem:[#allocation3 + $0x30] sm:$0xff] }
 0x18f   : > { %1577 = vst.msk [vmem:[#allocation3 + $0x71] sm:$0xff] %vm1548_vm3, %v1546_v39  ;;  %v1547_v43 = vmax.f32 %v1539_v3, 0.0  ;;  %v3713_v44 = vld [vmem:[#allocation3 + $0x10] sm:$0xff]  ;;  %v2099_v39 = vsel %vm1617_vm5, %v2772_v34, 0 }
 0x190   : > { %1575 = vst.msk [vmem:[#allocation3 + $0x51] sm:$0xff] %vm1548_vm3, %v1544_v41  ;;  %v1545_v45 = vmax.f32 %v1537_v42, 0.0  ;;  %v1600_v46 = vpack.c.bf16 %v3713_v44, %v1592_v40  ;;  %v3730_v51 = vld [vmem:[#allocation3 + $0x40] sm:$0xff]  ;;  %v1767_v12 = vld [vmem:[#allocation3 + $0x11] sm:$0xff] }
 0x191   : > { %1578 = vst.msk [vmem:[#allocation3 + $0x81] sm:$0xff] %vm1548_vm3, %v1547_v43  ;;  %v3718_v47 = vld [vmem:[#allocation3 + $0x20] sm:$0xff]  ;;  %v1774_v2 = vpack.c.bf16 %v1767_v12, %v1766_v11  ;;  %v1769_v15 = vld [vmem:[#allocation3 + $0x31] sm:$0xff]  ;;  %v1979_v4 = vpack.c.bf16 %v3730_v51, %v3720_v5 }
 0x192   : > { %1576 = vst.msk [vmem:[#allocation3 + $0x61] sm:$0xff] %vm1548_vm3, %v1545_v45  ;;  %2988 = vmatprep.mubr.msk.bf16.mxu0 %vm1548_vm3, %v1600_v46  ;;  %v3726_v48 = vpack.c.bf16 %v3720_v5, %v3718_v47  ;;  %v1768_v13 = vld [vmem:[#allocation3 + $0x21] sm:$0xff]  ;;  %v1869_v23 = vld [vmem:[#allocation3 + $0x12] sm:$0xff]  ;;  %v1978_v38 = vpack.c.bf16 %v3718_v47, %v3713_v44 }
 0x193   : > { %v3765_v16 = vpack.c.bf16 %v1769_v15, %v1768_v13  ;;  %v1770_v18 = vld [vmem:[#allocation3 + $0x41] sm:$0xff]  ;;  %v1876_v26 = vpack.c.bf16 %v1869_v23, %v1868_v22  ;;  %v1871_v29 = vld [vmem:[#allocation3 + $0x32] sm:$0xff]  ;;  %v2080_v43 = vpack.c.bf16 %v1768_v13, %v1767_v12 }
 0x194   : > { %2989 = vmatmul.mubr.msk.bf16.vlgmr.msra.gmra.mrb[8].mxu0 %vm1548_vm3, %v3726_v48  ;;  %v1870_v27 = vld [vmem:[#allocation3 + $0x22] sm:$0xff]  ;;  %v2081_v44 = vpack.c.bf16 %v1770_v18, %v1769_v15 }
 0x195   : > { %v3783_v30 = vpack.c.bf16 %v1871_v29, %v1870_v27  ;;  %v1872_v32 = vld [vmem:[#allocation3 + $0x42] sm:$0xff]  ;;  %v2182_v50 = vpack.c.bf16 %v1870_v27, %v1869_v23 }
 0x196   : > { %v3740_v55 = vld [vmem:[#allocation3 + $0x70] sm:$0xff]  ;;  %v2777_v40 = vld [vmem:[%s3878_s6 + $0x14] sm:$0xf]  ;;  %v2782_v47 = vld [vmem:[%s3878_s6 + $0x18] sm:$0xf] }
 0x197   : > { %v3732_v52 = vld [vmem:[#allocation3 + $0x50] sm:$0xff]  ;;  %v2201_v45 = vsel %vm1617_vm5, %v2777_v40, 0 }
 0x198   : > { %v3736_v53 = vpack.c.bf16 %v3732_v52, %v3730_v51  ;;  %v1771_v14 = vld [vmem:[#allocation3 + $0x51] sm:$0xff]  ;;  %v1977_v41 = vld [vmem:[#allocation3 + $0x80] sm:$0xff]  ;;  %v2183_v51 = vpack.c.bf16 %v1872_v32, %v1871_v29 }
 0x199   : > { %v3738_v54 = vld [vmem:[#allocation3 + $0x60] sm:$0xff]  ;;  %v3768_v19 = vpack.c.bf16 %v1771_v14, %v1770_v18  ;;  %v1773_v24 = vld [vmem:[#allocation3 + $0x71] sm:$0xff]  ;;  %v1981_v42 = vpack.c.bf16 %v1977_v41, %v3740_v55  ;;  %v2288_v62 = vpack.c.bf16 %v2284_v61, %v1977_v41 }
 0x19a   : > { %2992 = vmatprep.mubr.msk.bf16.mxu1 %vm1548_vm3, %v3736_v53  ;;  %v3746_v57 = vpack.c.bf16 %v3740_v55, %v3738_v54  ;;  %v1772_v21 = vld [vmem:[#allocation3 + $0x61] sm:$0xff]  ;;  %v1873_v28 = vld [vmem:[#allocation3 + $0x52] sm:$0xff]  ;;  %v1980_v3 = vpack.c.bf16 %v3738_v54, %v3732_v52  ;;  %v2304_v52 = vsel %vm1617_vm5, %v2782_v47, 0  ;;  %v2787_v55 = vld [vmem:[%s3878_s6 + $0x1c] sm:$0xf] }
 0x19b   : > { %v3778_v25 = vpack.c.bf16 %v1773_v24, %v1772_v21  ;;  %v3786_v33 = vpack.c.bf16 %v1873_v28, %v1872_v32  ;;  %v1874_v35 = vld [vmem:[#allocation3 + $0x62] sm:$0xff]  ;;  %v1875_v36 = vld [vmem:[#allocation3 + $0x72] sm:$0xff]  ;;  %v2082_v46 = vpack.c.bf16 %v1772_v21, %v1771_v14 }
 0x19c   : > { %2993 = vmatmul.mubr.msk.bf16.vlgmr.msra.gmra.mrb[0].mxu1 %vm1548_vm3, %v3746_v57  ;;  %v1879_v37 = vpack.c.bf16 %v1875_v36, %v1874_v35  ;;  %v2079_v5 = vld [vmem:[#allocation3 + $0x81] sm:$0xff]  ;;  %v2184_v54 = vpack.c.bf16 %v1874_v35, %v1873_v28 }
 0x19d   : > { %2997 = vmatpush3.bf16.msra.mxu1 %v1699_v58  ;;  %2998 = vmatprep.mubr.msk.bf16.mxu1 %vm449_vm1, %v1587_v56  ;;  %v2083_v49 = vpack.c.bf16 %v2079_v5, %v1773_v24  ;;  %v2181_v56 = vld [vmem:[#allocation3 + $0x82] sm:$0xff] }
 0x19e   : > { %3236 = vmatprep.subr.msk.bf16.mxu1 %vm1617_vm5, %v2757_v59  ;;  %v2185_v58 = vpack.c.bf16 %v2181_v56, %v1875_v36  ;;  %v2406_v59 = vsel %vm1617_vm5, %v2787_v55, 0 }
 0x1a4   : > { %2999 = vmatmul.mubr.msk.bf16.vlgmr.msra.gmra.mrb[4].mxu1 %vm449_vm1, %v1588_v0  ;;  %v2492_v0 = vpack.c.bf16 %v2488_v63, %v2181_v56 }
 0x1a5   : > { %3007 = vmatpush3.bf16.msra.mxu1 %v1793_v6  ;;  %3002 = vmatprep.mubr.msk.bf16.mxu1 %vm449_vm1, %v1589_v1 }
 0x1a6   : > { %3237 = vmatprep.subr.msk.bf16.mxu1 %vm1617_vm5, %v2762_v7 }
 0x1ac   : > { %3003 = vmatmul.mubr.msk.bf16.gmra.mrb[0].mxu1 %vm449_vm1, %v1590_v10 }
 0x1ad   : > { %3008 = vmatprep.mubr.msk.bf16.mxu1 %vm1548_vm3, %v1774_v2 }
 0x1b4   : > { %3009 = vmatmul.mubr.msk.bf16.vlgmr.msra.gmra.mrb[4].mxu1 %vm1548_vm3, %v3765_v16 }
 0x1b5   : > { %3017 = vmatpush3.bf16.msra.mxu1 %v1895_v17  ;;  %3012 = vmatprep.mubr.msk.bf16.mxu1 %vm1548_vm3, %v3768_v19 }
 0x1b6   : > { %3238 = vmatprep.subr.msk.bf16.mxu1 %vm1617_vm5, %v2767_v20 }
 0x1bc   : > { %3013 = vmatmul.mubr.msk.bf16.gmra.mrb[0].mxu1 %vm1548_vm3, %v3778_v25 }
 0x1bd   : > { %3018 = vmatprep.mubr.msk.bf16.mxu1 %vm1548_vm3, %v1876_v26 }
 0x1c4   : > { %3019 = vmatmul.mubr.msk.bf16.vlgmr.msra.gmra.mrb[4].mxu1 %vm1548_vm3, %v3783_v30 }
 0x1c5   : > { %3027 = vmatpush3.bf16.msra.mxu1 %v1997_v31  ;;  %3022 = vmatprep.mubr.msk.bf16.mxu1 %vm1548_vm3, %v3786_v33 }
 0x1c6   : > { %3239 = vmatprep.subr.msk.bf16.mxu1 %vm1617_vm5, %v2772_v34 }
 0x1cc   : > { %3023 = vmatmul.mubr.msk.bf16.gmra.mrb[0].mxu1 %vm1548_vm3, %v1879_v37 }
 0x1cd   : > { %3028 = vmatprep.mubr.msk.bf16.mxu1 %vm1548_vm3, %v1978_v38 }
 0x1d4   : > { %3029 = vmatmul.mubr.msk.bf16.vlgmr.msra.gmra.mrb[4].mxu1 %vm1548_vm3, %v1979_v4 }
 0x1d5   : > { %3037 = vmatpush3.bf16.msra.mxu1 %v2099_v39  ;;  %3032 = vmatprep.mubr.msk.bf16.mxu1 %vm1548_vm3, %v1980_v3 }
 0x1d6   : > { %3240 = vmatprep.subr.msk.bf16.mxu1 %vm1617_vm5, %v2777_v40 }
 0x1dc   : > { %3033 = vmatmul.mubr.msk.bf16.gmra.mrb[0].mxu1 %vm1548_vm3, %v1981_v42 }
 0x1dd   : > { %3038 = vmatprep.mubr.msk.bf16.mxu1 %vm1548_vm3, %v2080_v43 }
 0x1e4   : > { %3039 = vmatmul.mubr.msk.bf16.vlgmr.msra.gmra.mrb[4].mxu1 %vm1548_vm3, %v2081_v44 }
 0x1e5   : > { %3047 = vmatpush3.bf16.msra.mxu1 %v2201_v45  ;;  %3042 = vmatprep.mubr.msk.bf16.mxu1 %vm1548_vm3, %v2082_v46 }
 0x1e6   : > { %3241 = vmatprep.subr.msk.bf16.mxu1 %vm1617_vm5, %v2782_v47 }
 0x1ec   : > { %3043 = vmatmul.mubr.msk.bf16.gmra.mrb[0].mxu1 %vm1548_vm3, %v2083_v49 }
 0x1ed   : > { %3048 = vmatprep.mubr.msk.bf16.mxu1 %vm1548_vm3, %v2182_v50 }
 0x1f4   : > { %3049 = vmatmul.mubr.msk.bf16.vlgmr.msra.gmra.mrb[4].mxu1 %vm1548_vm3, %v2183_v51 }
 0x1f5   : > { %3057 = vmatpush3.bf16.msra.mxu1 %v2304_v52  ;;  %3052 = vmatprep.mubr.msk.bf16.mxu1 %vm1548_vm3, %v2184_v54 }
 0x1f6   : > { %3242 = vmatprep.subr.msk.bf16.mxu1 %vm1617_vm5, %v2787_v55 }
 0x1fc   : > { %3053 = vmatmul.mubr.msk.bf16.gmra.mrb[0].mxu1 %vm1548_vm3, %v2185_v58 }
 0x1fd   : > { %3058 = vmatprep.mubr.msk.bf16.mxu1 %vm1548_vm3, %v3726_v48  ;;  %v2508_v48 = vsel %vm1617_vm5, %v2792_v60, 0 }
 0x204   : > { %3059 = vmatmul.mubr.msk.bf16.vlgmr.msra.gmra.mrb[4].mxu1 %vm1548_vm3, %v3736_v53  ;;  %v2386_v53 = vld [vmem:[#allocation3 + $0x91] sm:$0xff] }
 0x205   : > { %3067 = vmatpush3.bf16.msra.mxu1 %v2406_v59  ;;  %3062 = vmatprep.mubr.msk.bf16.mxu1 %vm1548_vm3, %v3746_v57  ;;  %v2390_v57 = vpack.c.bf16 %v2386_v53, %v2079_v5 }
 0x206   : > { %3243 = vmatprep.subr.msk.bf16.mxu1 %vm1617_vm5, %v2792_v60 }
 0x20c   : > { %3063 = vmatmul.mubr.msk.bf16.gmra.mrb[0].mxu1 %vm1548_vm3, %v2288_v62 }
 0x20d   : > { %3068 = vmatprep.mubr.msk.bf16.mxu1 %vm1548_vm3, %v3765_v16 }
 0x214   : > { %3069 = vmatmul.mubr.msk.bf16.vlgmr.msra.gmra.mrb[4].mxu1 %vm1548_vm3, %v3768_v19 }
 0x215   : > { %3077 = vmatpush3.bf16.msra.mxu1 %v2508_v48  ;;  %3072 = vmatprep.mubr.msk.bf16.mxu1 %vm1548_vm3, %v3778_v25 }
 0x21c   : > { %3073 = vmatmul.mubr.msk.bf16.gmra.mrb[0].mxu1 %vm1548_vm3, %v2390_v57 }
 0x21d   : > { %3078 = vmatprep.mubr.msk.bf16.mxu1 %vm1548_vm3, %v3783_v30 }
 0x224   : > { %3079 = vmatmul.mubr.msk.bf16.vlgmr.msra.gmra.mrb[4].mxu1 %vm1548_vm3, %v3786_v33 }
 0x225   : > { %3082 = vmatprep.mubr.msk.bf16.mxu1 %vm1548_vm3, %v1879_v37 }
 0x22c   : > { %3083 = vmatmul.mubr.msk.bf16.gmra.mrb[0].mxu1 %vm1548_vm3, %v2492_v0 }
 0x267   : > { %v2990_v1 = vpop.f32.mrb[8].mxu0 }
 0x268   : > { %v1655_v6 = vpop.f32.mrb[9].mxu0 }
 0x269   : > { %v2991_v7 = vpop.f32.mrb[10].mxu0 }
 0x26a   : > { %v1658_v8 = vpop.f32.mrb[11].mxu0 }
 0x2f7   : > { %v3080_v9 = vpop.f32.mrb[4].mxu1 }
 0x2f8   : > { %v3088_v10 = vadd.f32 %v3080_v9, %v2990_v1  ;;  %v2544_v11 = vpop.f32.mrb[5].mxu1 }
 0x2f9   : > { %v3089_v12 = vadd.f32 %v2544_v11, %v1655_v6  ;;  %v3081_v2 = vpop.f32.mrb[6].mxu1 }
 0x2fa   : > { %2585 = vst.msk [vmem:[%s305_s20 + $0x10] sm:$0xff] %vm1548_vm3, %v3088_v10  ;;  %v3090_v13 = vadd.f32 %v3081_v2, %v2991_v7  ;;  %v2547_v14 = vpop.f32.mrb[7].mxu1 }
 0x2fb   : > { %2583 = vst.msk [vmem:[%s305_s20] sm:$0xff] %vm1548_vm3, %v3089_v12  ;;  %v3091_v15 = vadd.f32 %v2547_v14, %v1658_v8 }
 0x2fc   : > { %2586 = vst.msk [vmem:[%s305_s20 + $0x18] sm:$0xff] %vm1548_vm3, %v3090_v13 }
 0x2fd   : > { %2584 = vst.msk [vmem:[%s305_s20 + $0x8] sm:$0xff] %vm1548_vm3, %v3091_v15 }
 0x2ff   : > { %v3084_v16 = vpop.f32.mrb[0].mxu1 }
 0x300   : > { %2589 = vst.msk [vmem:[%s305_s20 + $0x30] sm:$0xff] %vm1548_vm3, %v3084_v16  ;;  %v2560_v17 = vpop.f32.mrb[1].mxu1 }
 0x301   : > { %2587 = vst.msk [vmem:[%s305_s20 + $0x20] sm:$0xff] %vm1548_vm3, %v2560_v17  ;;  %v3085_v18 = vpop.f32.mrb[2].mxu1 }
 0x302   : > { %2590 = vst.msk [vmem:[%s305_s20 + $0x38] sm:$0xff] %vm1548_vm3, %v3085_v18  ;;  %v2563_v19 = vpop.f32.mrb[3].mxu1 }
 0x303   : > { %2588 = vst.msk [vmem:[%s305_s20 + $0x28] sm:$0xff] %vm1548_vm3, %v2563_v19 }
 0x304 PF: > { %s18_s27 = sadd.s32 1, %s3259_s27  }
 0x305   : > { %p15_p4 = scmp.ge.s32.totalorder %s18_s27, 4  }
 0x307   :  { %17 = sbr.rel (!%p15_p4) target bundleno = 1 (0x1), region = 171 }

</bundles_post_ra>
